<compile_context>
chip_gen: v5e
topology: v5e:2x2
jax: 0.10.0
libtpu: 0.0.40
codegen_flags: <defaults>
</compile_context>

<pallas_src>
import numpy as np
import jax
import jax.numpy as jnp
from jax.experimental import pallas as pl
from jax.experimental.pallas import tpu as pltpu

COMPUTE_DTYPE = jnp.bfloat16  # MXU operand dtype; accumulation stays f32


# ---------------------------------------------------------------------------
# Fused whole-network kernel (one sample per grid step)
# ---------------------------------------------------------------------------
def _lenet_kernel(x_ref, w1_ref, b1_ref, w2_ref, b2_ref,
                  f1_ref, fb1_ref, f2_ref, fb2_ref, f3_ref, fb3_ref,
                  o_ref, h1_ref):
    f32 = jnp.float32

    # ---- conv1 + bias + ReLU + 2x2 maxpool -> h1_ref (VMEM scratch) --------
    # x_ref: (1, 4, 8, 128) = [_, row%4, row//4, w*3+ci (lane-padded)]
    # w1_ref[kh]: (128, 256) banded weight; output lanes = (jc, j2, c1pad8)
    for s in range(2):                       # parity of the pooled row i2
        acc = []
        for ri in range(2):                  # row inside the 2x2 pool window
            a = jnp.zeros((7, 256), f32)
            for kh in range(5):
                r = 2 * s + ri + kh          # static
                lhs = x_ref[0, r % 4, r // 4:r // 4 + 7, :]          # (7, 128)
                a = a + jnp.dot(lhs, w1_ref[kh], preferred_element_type=f32)
            acc.append(a)
        m = jnp.maximum(acc[0], acc[1])              # pool over the 2 rows
        m = jnp.maximum(m[:, :128], m[:, 128:])      # pool over the 2 cols
        h1_ref[s] = jnp.maximum(m + b1_ref[...], 0.0).astype(COMPUTE_DTYPE)

    # ---- conv2 + bias + ReLU + 2x2 maxpool (stays in vregs) ----------------
    # h1_ref: (2, 7, 128) = [i2%2, i2//2, j2*8+c1];  w2_ref[kh]: (128, 256)
    acc2 = []
    for ri in range(2):
        a = jnp.zeros((5, 256), f32)
        for kh in range(5):
            r = ri + kh
            lhs = h1_ref[r % 2, r // 2:r // 2 + 5, :]                # (5, 128)
            a = a + jnp.dot(lhs, w2_ref[kh], preferred_element_type=f32)
        acc2.append(a)
    m2 = jnp.maximum(acc2[0], acc2[1])
    m2 = jnp.maximum(m2[:, :128], m2[:, 128:])
    h2 = jnp.maximum(m2 + b2_ref[...], 0.0).astype(COMPUTE_DTYPE)    # (5, 128)

    # ---- fc1 (+ReLU): contract over the 5 spatial rows of h2 ---------------
    a = jnp.zeros((1, 128), f32)
    for i3 in range(5):
        a = a + jnp.dot(h2[i3:i3 + 1, :], f1_ref[i3],
                        preferred_element_type=f32)
    h = jnp.maximum(a + fb1_ref[...], 0.0).astype(COMPUTE_DTYPE)     # (1, 128)

    # ---- fc2 (+ReLU) -> fc3 -------------------------------------------------
    h = jnp.dot(h, f2_ref[...], preferred_element_type=f32) + fb2_ref[...]
    h = jnp.maximum(h, 0.0).astype(COMPUTE_DTYPE)
    out = jnp.dot(h, f3_ref[...], preferred_element_type=f32) + fb3_ref[...]
    o_ref[0] = out.astype(o_ref.dtype)                               # (1, 10)


# ---------------------------------------------------------------------------
# Pallas wrapper: single pallas_call, grid over samples (parallel)
# ---------------------------------------------------------------------------
def lenet_pallas(x4, pp):
    n = x4.shape[0]
    out = pl.pallas_call(
        _lenet_kernel,
        out_shape=jax.ShapeDtypeStruct((n, 1, 10), jnp.float32),
        grid=(n,),
        in_specs=[
            pl.BlockSpec((1, 4, 8, 128), lambda i: (i, 0, 0, 0)),  # x
            pl.BlockSpec((5, 128, 256), lambda i: (0, 0, 0)),      # conv1 band
            pl.BlockSpec((1, 128), lambda i: (0, 0)),              # conv1 bias
            pl.BlockSpec((5, 128, 256), lambda i: (0, 0, 0)),      # conv2 band
            pl.BlockSpec((1, 128), lambda i: (0, 0)),              # conv2 bias
            pl.BlockSpec((5, 128, 128), lambda i: (0, 0, 0)),      # fc1 parts
            pl.BlockSpec((1, 128), lambda i: (0, 0)),              # fc1 bias
            pl.BlockSpec((128, 128), lambda i: (0, 0)),            # fc2 w
            pl.BlockSpec((1, 128), lambda i: (0, 0)),              # fc2 bias
            pl.BlockSpec((128, 10), lambda i: (0, 0)),             # fc3 w
            pl.BlockSpec((1, 10), lambda i: (0, 0)),               # fc3 bias
        ],
        out_specs=pl.BlockSpec((1, 1, 10), lambda i: (i, 0, 0)),
        scratch_shapes=[pltpu.VMEM((2, 7, 128), COMPUTE_DTYPE)],
        compiler_params=pltpu.CompilerParams(
            dimension_semantics=("parallel",)),
    )(x4, pp["w1"], pp["b1"], pp["w2"], pp["b2"],
      pp["f1"], pp["fb1"], pp["f2"], pp["fb2"], pp["f3"], pp["fb3"])
    return out[:, 0, :]


def net_forward(x_nchw, pp):
    # Cheap layout plumbing on the raw input (no data duplication):
    # NCHW -> NHWC, split rows by (row%4, row//4), flatten (w,ci) onto lanes,
    # pad 96 -> 128 lanes.
    n = x_nchw.shape[0]
    x = jnp.transpose(x_nchw, (0, 2, 3, 1)).astype(COMPUTE_DTYPE)   # (N,32,32,3)
    x = x.reshape(n, 8, 4, 32 * 3)                                  # [n,r//4,r%4,w*3+ci]
    x = jnp.transpose(x, (0, 2, 1, 3))                              # (N,4,8,96)
    x = jnp.pad(x, ((0, 0), (0, 0), (0, 0), (0, 32)))               # (N,4,8,128)
    return lenet_pallas(x, pp)


# ---------------------------------------------------------------------------
# One-time parameter preparation: banded / 128-padded weights (numpy, hoisted
# out of the hot path).  Output lane order of each conv matmul is
# (pool-col jc, out-col j2/j3, channel), so pooling over columns is a max of
# the two contiguous 128-lane halves.
# ---------------------------------------------------------------------------
def prepare_params(p, dtype=COMPUTE_DTYPE):
    w1 = np.asarray(p["conv1_w"], np.float32)   # (6, 3, 5, 5)
    b1 = np.asarray(p["conv1_b"], np.float32)
    w2 = np.asarray(p["conv2_w"], np.float32)   # (16, 6, 5, 5)
    b2 = np.asarray(p["conv2_b"], np.float32)
    f1 = np.asarray(p["fc1_w"], np.float32)     # (120, 400)
    fb1 = np.asarray(p["fc1_b"], np.float32)
    f2 = np.asarray(p["fc2_w"], np.float32)     # (84, 120)
    fb2 = np.asarray(p["fc2_b"], np.float32)
    f3 = np.asarray(p["fc3_w"], np.float32)     # (10, 84)
    fb3 = np.asarray(p["fc3_b"], np.float32)

    # conv1 band: [kh, w*3+ci, jc, j2*8+c1] = W1[c1, ci, kh, kw], w = 2*j2+jc+kw
    w1b = np.zeros((5, 128, 2, 128), np.float32)
    for kh in range(5):
        for kw in range(5):
            for jc in range(2):
                for j2 in range(14):
                    w = 2 * j2 + jc + kw
                    for ci in range(3):
                        w1b[kh, w * 3 + ci, jc, j2 * 8:j2 * 8 + 6] = w1[:, ci, kh, kw]
    w1b = w1b.reshape(5, 128, 256)
    b1t = np.zeros((1, 128), np.float32)
    for j2 in range(14):
        b1t[0, j2 * 8:j2 * 8 + 6] = b1

    # conv2 band: [kh, j2*8+c1, jc, j3*16+c2] = W2[c2, c1, kh, kw], j2 = 2*j3+jc+kw
    w2b = np.zeros((5, 128, 2, 128), np.float32)
    for kh in range(5):
        for kw in range(5):
            for jc in range(2):
                for j3 in range(5):
                    j2 = 2 * j3 + jc + kw
                    for c1 in range(6):
                        w2b[kh, j2 * 8 + c1, jc, j3 * 16:j3 * 16 + 16] = w2[:, c1, kh, kw]
    w2b = w2b.reshape(5, 128, 256)
    b2t = np.zeros((1, 128), np.float32)
    for j3 in range(5):
        b2t[0, j3 * 16:j3 * 16 + 16] = b2

    # fc1 split over the 5 spatial rows; PyTorch flatten order is (c, h, w).
    f1p = np.zeros((5, 128, 128), np.float32)
    for i3 in range(5):
        for j3 in range(5):
            for c2 in range(16):
                f1p[i3, j3 * 16 + c2, :120] = f1[:, c2 * 25 + i3 * 5 + j3]
    fb1p = np.zeros((1, 128), np.float32)
    fb1p[0, :120] = fb1

    f2p = np.zeros((128, 128), np.float32)
    f2p[:120, :84] = f2.T
    fb2p = np.zeros((1, 128), np.float32)
    fb2p[0, :84] = fb2
    f3p = np.zeros((128, 10), np.float32)
    f3p[:84, :] = f3.T
    fb3p = fb3.reshape(1, 10)

    return {
        "w1": jnp.asarray(w1b, dtype), "b1": jnp.asarray(b1t),
        "w2": jnp.asarray(w2b, dtype), "b2": jnp.asarray(b2t),
        "f1": jnp.asarray(f1p, dtype), "fb1": jnp.asarray(fb1p),
        "f2": jnp.asarray(f2p, dtype), "fb2": jnp.asarray(fb2p),
        "f3": jnp.asarray(f3p, dtype), "fb3": jnp.asarray(fb3p),
    }


# ---------------------------------------------------------------------------
# Deterministic parameter init (PyTorch-default-style uniform)
# ---------------------------------------------------------------------------
def init_params(key):
    def uni(k, shape, fan_in):
        bound = 1.0 / jnp.sqrt(fan_in)
        return jax.random.uniform(k, shape, jnp.float32, -bound, bound)

    ks = jax.random.split(key, 10)
    return {
        "conv1_w": uni(ks[0], (6, 3, 5, 5), 3 * 5 * 5),
        "conv1_b": uni(ks[1], (6,), 3 * 5 * 5),
        "conv2_w": uni(ks[2], (16, 6, 5, 5), 6 * 5 * 5),
        "conv2_b": uni(ks[3], (16,), 6 * 5 * 5),
        "fc1_w": uni(ks[4], (120, 400), 400),
        "fc1_b": uni(ks[5], (120,), 400),
        "fc2_w": uni(ks[6], (84, 120), 120),
        "fc2_b": uni(ks[7], (84,), 120),
        "fc3_w": uni(ks[8], (10, 84), 84),
        "fc3_b": uni(ks[9], (10,), 84),
    }


# ---------------------------------------------------------------------------
# Pure-JAX f32 reference (PyTorch semantics, NCHW)
# ---------------------------------------------------------------------------
def ref_forward(x, p):
    def conv(x, w, b):
        y = jax.lax.conv_general_dilated(
            x, w, (1, 1), "VALID", dimension_numbers=("NCHW", "OIHW", "NCHW"))
        return y + b[None, :, None, None]

    def pool(x):
        n, c, h, w = x.shape
        return jnp.max(x.reshape(n, c, h // 2, 2, w // 2, 2), axis=(3, 5))

    x = pool(jax.nn.relu(conv(x, p["conv1_w"], p["conv1_b"])))
    x = pool(jax.nn.relu(conv(x, p["conv2_w"], p["conv2_b"])))
    x = x.reshape(x.shape[0], -1)
    x = jax.nn.relu(x @ p["fc1_w"].T + p["fc1_b"])
    x = jax.nn.relu(x @ p["fc2_w"].T + p["fc2_b"])
    return x @ p["fc3_w"].T + p["fc3_b"]


if __name__ == "__main__":
    key = jax.random.PRNGKey(0)
    pkey, xkey = jax.random.split(key)
    params = init_params(pkey)
    # LeNet geometry (fc1 expects 16*5*5) implies 32x32 spatial input.
    x = jax.random.normal(xkey, (2, 3, 32, 32), jnp.float32)

    prepped = prepare_params(params)          # one-time, outside the hot path
    fwd = jax.jit(net_forward)
    out = jax.block_until_ready(fwd(x, prepped))
    assert out.shape == (2, 10), out.shape

    ref = jax.block_until_ready(ref_forward(x, params))
    # bf16 MXU operands (f32 accumulation) -> loose tolerance vs f32 reference.
    assert jnp.allclose(out, ref, atol=5e-2, rtol=5e-2), "mismatch vs reference"

    print("KERNEL_OK")
</pallas_src>

<mosaic_0001>
module attributes {stable_mosaic.version = 11 : i64} {
  func.func @_lenet_kernel(%arg0: i32, %arg1: memref<1x4x8x128xbf16, #tpu.memory_space<vmem>>, %arg2: memref<5x128x256xbf16, #tpu.memory_space<vmem>>, %arg3: memref<1x128xf32, #tpu.memory_space<vmem>>, %arg4: memref<5x128x256xbf16, #tpu.memory_space<vmem>>, %arg5: memref<1x128xf32, #tpu.memory_space<vmem>>, %arg6: memref<5x128x128xbf16, #tpu.memory_space<vmem>>, %arg7: memref<1x128xf32, #tpu.memory_space<vmem>>, %arg8: memref<128x128xbf16, #tpu.memory_space<vmem>>, %arg9: memref<1x128xf32, #tpu.memory_space<vmem>>, %arg10: memref<128x10xbf16, #tpu.memory_space<vmem>>, %arg11: memref<1x10xf32, #tpu.memory_space<vmem>>, %arg12: memref<1x1x10xf32, #tpu.memory_space<vmem>>, %arg13: memref<2x7x128xbf16, #tpu.memory_space<vmem>>) attributes {dimension_semantics = [#tpu.dimension_semantics<parallel>], iteration_bounds = array<i64: 2>, scalar_prefetch = 0 : i64, scratch_operands = 1 : i64, tpu.core_type = #tpu.core_type<tc>, window_params = [{transform_indices = @transform_0, window_bounds = array<i64: 1, 4, 8, 128>}, {pipeline_mode = #tpu.pipeline_mode<synchronous>, transform_indices = @transform_1, window_bounds = array<i64: 5, 128, 256>}, {pipeline_mode = #tpu.pipeline_mode<synchronous>, transform_indices = @transform_2, window_bounds = array<i64: 1, 128>}, {pipeline_mode = #tpu.pipeline_mode<synchronous>, transform_indices = @transform_3, window_bounds = array<i64: 5, 128, 256>}, {pipeline_mode = #tpu.pipeline_mode<synchronous>, transform_indices = @transform_4, window_bounds = array<i64: 1, 128>}, {pipeline_mode = #tpu.pipeline_mode<synchronous>, transform_indices = @transform_5, window_bounds = array<i64: 5, 128, 128>}, {pipeline_mode = #tpu.pipeline_mode<synchronous>, transform_indices = @transform_6, window_bounds = array<i64: 1, 128>}, {pipeline_mode = #tpu.pipeline_mode<synchronous>, transform_indices = @transform_7, window_bounds = array<i64: 128, 128>}, {pipeline_mode = #tpu.pipeline_mode<synchronous>, transform_indices = @transform_8, window_bounds = array<i64: 1, 128>}, {pipeline_mode = #tpu.pipeline_mode<synchronous>, transform_indices = @transform_9, window_bounds = array<i64: 128, 10>}, {pipeline_mode = #tpu.pipeline_mode<synchronous>, transform_indices = @transform_10, window_bounds = array<i64: 1, 10>}, {transform_indices = @transform_11, window_bounds = array<i64: 1, 1, 10>}]} {
    %cst = arith.constant 0.000000e+00 : f32
    %0 = vector.broadcast %cst : f32 to vector<7x256xf32>
    %c0 = arith.constant 0 : index
    %c0_0 = arith.constant 0 : index
    %c0_1 = arith.constant 0 : index
    %c0_2 = arith.constant 0 : index
    %1 = vector.load %arg1[%c0, %c0_0, %c0_1, %c0_2] : memref<1x4x8x128xbf16, #tpu.memory_space<vmem>>, vector<1x1x7x128xbf16>
    %2 = vector.shape_cast %1 : vector<1x1x7x128xbf16> to vector<7x128xbf16>
    %c0_3 = arith.constant 0 : index
    %c0_4 = arith.constant 0 : index
    %c0_5 = arith.constant 0 : index
    %3 = vector.load %arg2[%c0_3, %c0_4, %c0_5] : memref<5x128x256xbf16, #tpu.memory_space<vmem>>, vector<1x128x256xbf16>
    %4 = vector.shape_cast %3 : vector<1x128x256xbf16> to vector<128x256xbf16>
    %cst_6 = arith.constant dense<0.000000e+00> : vector<7x256xf32>
    %5 = tpu.matmul %2, %4, %cst_6 {dimension_numbers = #tpu.dot_dimension_numbers<[1], [0], [0], [1], [0, 0, 1, 1], [], []>} : vector<7x128xbf16>, vector<128x256xbf16>, vector<7x256xf32> -> vector<7x256xf32>
    %6 = arith.addf %0, %5 : vector<7x256xf32>
    %c0_7 = arith.constant 0 : index
    %c1 = arith.constant 1 : index
    %c0_8 = arith.constant 0 : index
    %c0_9 = arith.constant 0 : index
    %7 = vector.load %arg1[%c0_7, %c1, %c0_8, %c0_9] : memref<1x4x8x128xbf16, #tpu.memory_space<vmem>>, vector<1x1x7x128xbf16>
    %8 = vector.shape_cast %7 : vector<1x1x7x128xbf16> to vector<7x128xbf16>
    %c1_10 = arith.constant 1 : index
    %c0_11 = arith.constant 0 : index
    %c0_12 = arith.constant 0 : index
    %9 = vector.load %arg2[%c1_10, %c0_11, %c0_12] : memref<5x128x256xbf16, #tpu.memory_space<vmem>>, vector<1x128x256xbf16>
    %10 = vector.shape_cast %9 : vector<1x128x256xbf16> to vector<128x256xbf16>
    %cst_13 = arith.constant dense<0.000000e+00> : vector<7x256xf32>
    %11 = tpu.matmul %8, %10, %cst_13 {dimension_numbers = #tpu.dot_dimension_numbers<[1], [0], [0], [1], [0, 0, 1, 1], [], []>} : vector<7x128xbf16>, vector<128x256xbf16>, vector<7x256xf32> -> vector<7x256xf32>
    %12 = arith.addf %6, %11 : vector<7x256xf32>
    %c0_14 = arith.constant 0 : index
    %c2 = arith.constant 2 : index
    %c0_15 = arith.constant 0 : index
    %c0_16 = arith.constant 0 : index
    %13 = vector.load %arg1[%c0_14, %c2, %c0_15, %c0_16] : memref<1x4x8x128xbf16, #tpu.memory_space<vmem>>, vector<1x1x7x128xbf16>
    %14 = vector.shape_cast %13 : vector<1x1x7x128xbf16> to vector<7x128xbf16>
    %c2_17 = arith.constant 2 : index
    %c0_18 = arith.constant 0 : index
    %c0_19 = arith.constant 0 : index
    %15 = vector.load %arg2[%c2_17, %c0_18, %c0_19] : memref<5x128x256xbf16, #tpu.memory_space<vmem>>, vector<1x128x256xbf16>
    %16 = vector.shape_cast %15 : vector<1x128x256xbf16> to vector<128x256xbf16>
    %cst_20 = arith.constant dense<0.000000e+00> : vector<7x256xf32>
    %17 = tpu.matmul %14, %16, %cst_20 {dimension_numbers = #tpu.dot_dimension_numbers<[1], [0], [0], [1], [0, 0, 1, 1], [], []>} : vector<7x128xbf16>, vector<128x256xbf16>, vector<7x256xf32> -> vector<7x256xf32>
    %18 = arith.addf %12, %17 : vector<7x256xf32>
    %c0_21 = arith.constant 0 : index
    %c3 = arith.constant 3 : index
    %c0_22 = arith.constant 0 : index
    %c0_23 = arith.constant 0 : index
    %19 = vector.load %arg1[%c0_21, %c3, %c0_22, %c0_23] : memref<1x4x8x128xbf16, #tpu.memory_space<vmem>>, vector<1x1x7x128xbf16>
    %20 = vector.shape_cast %19 : vector<1x1x7x128xbf16> to vector<7x128xbf16>
    %c3_24 = arith.constant 3 : index
    %c0_25 = arith.constant 0 : index
    %c0_26 = arith.constant 0 : index
    %21 = vector.load %arg2[%c3_24, %c0_25, %c0_26] : memref<5x128x256xbf16, #tpu.memory_space<vmem>>, vector<1x128x256xbf16>
    %22 = vector.shape_cast %21 : vector<1x128x256xbf16> to vector<128x256xbf16>
    %cst_27 = arith.constant dense<0.000000e+00> : vector<7x256xf32>
    %23 = tpu.matmul %20, %22, %cst_27 {dimension_numbers = #tpu.dot_dimension_numbers<[1], [0], [0], [1], [0, 0, 1, 1], [], []>} : vector<7x128xbf16>, vector<128x256xbf16>, vector<7x256xf32> -> vector<7x256xf32>
    %24 = arith.addf %18, %23 : vector<7x256xf32>
    %c0_28 = arith.constant 0 : index
    %c0_29 = arith.constant 0 : index
    %c1_30 = arith.constant 1 : index
    %c0_31 = arith.constant 0 : index
    %25 = vector.load %arg1[%c0_28, %c0_29, %c1_30, %c0_31] : memref<1x4x8x128xbf16, #tpu.memory_space<vmem>>, vector<1x1x7x128xbf16>
    %26 = vector.shape_cast %25 : vector<1x1x7x128xbf16> to vector<7x128xbf16>
    %c4 = arith.constant 4 : index
    %c0_32 = arith.constant 0 : index
    %c0_33 = arith.constant 0 : index
    %27 = vector.load %arg2[%c4, %c0_32, %c0_33] : memref<5x128x256xbf16, #tpu.memory_space<vmem>>, vector<1x128x256xbf16>
    %28 = vector.shape_cast %27 : vector<1x128x256xbf16> to vector<128x256xbf16>
    %cst_34 = arith.constant dense<0.000000e+00> : vector<7x256xf32>
    %29 = tpu.matmul %26, %28, %cst_34 {dimension_numbers = #tpu.dot_dimension_numbers<[1], [0], [0], [1], [0, 0, 1, 1], [], []>} : vector<7x128xbf16>, vector<128x256xbf16>, vector<7x256xf32> -> vector<7x256xf32>
    %30 = arith.addf %24, %29 : vector<7x256xf32>
    %cst_35 = arith.constant 0.000000e+00 : f32
    %31 = vector.broadcast %cst_35 : f32 to vector<7x256xf32>
    %c0_36 = arith.constant 0 : index
    %c1_37 = arith.constant 1 : index
    %c0_38 = arith.constant 0 : index
    %c0_39 = arith.constant 0 : index
    %32 = vector.load %arg1[%c0_36, %c1_37, %c0_38, %c0_39] : memref<1x4x8x128xbf16, #tpu.memory_space<vmem>>, vector<1x1x7x128xbf16>
    %33 = vector.shape_cast %32 : vector<1x1x7x128xbf16> to vector<7x128xbf16>
    %c0_40 = arith.constant 0 : index
    %c0_41 = arith.constant 0 : index
    %c0_42 = arith.constant 0 : index
    %34 = vector.load %arg2[%c0_40, %c0_41, %c0_42] : memref<5x128x256xbf16, #tpu.memory_space<vmem>>, vector<1x128x256xbf16>
    %35 = vector.shape_cast %34 : vector<1x128x256xbf16> to vector<128x256xbf16>
    %cst_43 = arith.constant dense<0.000000e+00> : vector<7x256xf32>
    %36 = tpu.matmul %33, %35, %cst_43 {dimension_numbers = #tpu.dot_dimension_numbers<[1], [0], [0], [1], [0, 0, 1, 1], [], []>} : vector<7x128xbf16>, vector<128x256xbf16>, vector<7x256xf32> -> vector<7x256xf32>
    %37 = arith.addf %31, %36 : vector<7x256xf32>
    %c0_44 = arith.constant 0 : index
    %c2_45 = arith.constant 2 : index
    %c0_46 = arith.constant 0 : index
    %c0_47 = arith.constant 0 : index
    %38 = vector.load %arg1[%c0_44, %c2_45, %c0_46, %c0_47] : memref<1x4x8x128xbf16, #tpu.memory_space<vmem>>, vector<1x1x7x128xbf16>
    %39 = vector.shape_cast %38 : vector<1x1x7x128xbf16> to vector<7x128xbf16>
    %c1_48 = arith.constant 1 : index
    %c0_49 = arith.constant 0 : index
    %c0_50 = arith.constant 0 : index
    %40 = vector.load %arg2[%c1_48, %c0_49, %c0_50] : memref<5x128x256xbf16, #tpu.memory_space<vmem>>, vector<1x128x256xbf16>
    %41 = vector.shape_cast %40 : vector<1x128x256xbf16> to vector<128x256xbf16>
    %cst_51 = arith.constant dense<0.000000e+00> : vector<7x256xf32>
    %42 = tpu.matmul %39, %41, %cst_51 {dimension_numbers = #tpu.dot_dimension_numbers<[1], [0], [0], [1], [0, 0, 1, 1], [], []>} : vector<7x128xbf16>, vector<128x256xbf16>, vector<7x256xf32> -> vector<7x256xf32>
    %43 = arith.addf %37, %42 : vector<7x256xf32>
    %c0_52 = arith.constant 0 : index
    %c3_53 = arith.constant 3 : index
    %c0_54 = arith.constant 0 : index
    %c0_55 = arith.constant 0 : index
    %44 = vector.load %arg1[%c0_52, %c3_53, %c0_54, %c0_55] : memref<1x4x8x128xbf16, #tpu.memory_space<vmem>>, vector<1x1x7x128xbf16>
    %45 = vector.shape_cast %44 : vector<1x1x7x128xbf16> to vector<7x128xbf16>
    %c2_56 = arith.constant 2 : index
    %c0_57 = arith.constant 0 : index
    %c0_58 = arith.constant 0 : index
    %46 = vector.load %arg2[%c2_56, %c0_57, %c0_58] : memref<5x128x256xbf16, #tpu.memory_space<vmem>>, vector<1x128x256xbf16>
    %47 = vector.shape_cast %46 : vector<1x128x256xbf16> to vector<128x256xbf16>
    %cst_59 = arith.constant dense<0.000000e+00> : vector<7x256xf32>
    %48 = tpu.matmul %45, %47, %cst_59 {dimension_numbers = #tpu.dot_dimension_numbers<[1], [0], [0], [1], [0, 0, 1, 1], [], []>} : vector<7x128xbf16>, vector<128x256xbf16>, vector<7x256xf32> -> vector<7x256xf32>
    %49 = arith.addf %43, %48 : vector<7x256xf32>
    %c0_60 = arith.constant 0 : index
    %c0_61 = arith.constant 0 : index
    %c1_62 = arith.constant 1 : index
    %c0_63 = arith.constant 0 : index
    %50 = vector.load %arg1[%c0_60, %c0_61, %c1_62, %c0_63] : memref<1x4x8x128xbf16, #tpu.memory_space<vmem>>, vector<1x1x7x128xbf16>
    %51 = vector.shape_cast %50 : vector<1x1x7x128xbf16> to vector<7x128xbf16>
    %c3_64 = arith.constant 3 : index
    %c0_65 = arith.constant 0 : index
    %c0_66 = arith.constant 0 : index
    %52 = vector.load %arg2[%c3_64, %c0_65, %c0_66] : memref<5x128x256xbf16, #tpu.memory_space<vmem>>, vector<1x128x256xbf16>
    %53 = vector.shape_cast %52 : vector<1x128x256xbf16> to vector<128x256xbf16>
    %cst_67 = arith.constant dense<0.000000e+00> : vector<7x256xf32>
    %54 = tpu.matmul %51, %53, %cst_67 {dimension_numbers = #tpu.dot_dimension_numbers<[1], [0], [0], [1], [0, 0, 1, 1], [], []>} : vector<7x128xbf16>, vector<128x256xbf16>, vector<7x256xf32> -> vector<7x256xf32>
    %55 = arith.addf %49, %54 : vector<7x256xf32>
    %c0_68 = arith.constant 0 : index
    %c1_69 = arith.constant 1 : index
    %c1_70 = arith.constant 1 : index
    %c0_71 = arith.constant 0 : index
    %56 = vector.load %arg1[%c0_68, %c1_69, %c1_70, %c0_71] : memref<1x4x8x128xbf16, #tpu.memory_space<vmem>>, vector<1x1x7x128xbf16>
    %57 = vector.shape_cast %56 : vector<1x1x7x128xbf16> to vector<7x128xbf16>
    %c4_72 = arith.constant 4 : index
    %c0_73 = arith.constant 0 : index
    %c0_74 = arith.constant 0 : index
    %58 = vector.load %arg2[%c4_72, %c0_73, %c0_74] : memref<5x128x256xbf16, #tpu.memory_space<vmem>>, vector<1x128x256xbf16>
    %59 = vector.shape_cast %58 : vector<1x128x256xbf16> to vector<128x256xbf16>
    %cst_75 = arith.constant dense<0.000000e+00> : vector<7x256xf32>
    %60 = tpu.matmul %57, %59, %cst_75 {dimension_numbers = #tpu.dot_dimension_numbers<[1], [0], [0], [1], [0, 0, 1, 1], [], []>} : vector<7x128xbf16>, vector<128x256xbf16>, vector<7x256xf32> -> vector<7x256xf32>
    %61 = arith.addf %55, %60 : vector<7x256xf32>
    %62 = arith.maximumf %30, %61 : vector<7x256xf32>
    %63 = vector.extract_strided_slice %62 {offsets = [0, 0], sizes = [7, 128], strides = [1, 1]} : vector<7x256xf32> to vector<7x128xf32>
    %64 = vector.extract_strided_slice %62 {offsets = [0, 128], sizes = [7, 128], strides = [1, 1]} : vector<7x256xf32> to vector<7x128xf32>
    %65 = arith.maximumf %63, %64 : vector<7x128xf32>
    %c0_76 = arith.constant 0 : index
    %c0_77 = arith.constant 0 : index
    %66 = vector.load %arg3[%c0_76, %c0_77] : memref<1x128xf32, #tpu.memory_space<vmem>>, vector<1x128xf32>
    %67 = vector.broadcast %66 : vector<1x128xf32> to vector<7x128xf32>
    %68 = arith.addf %65, %67 : vector<7x128xf32>
    %cst_78 = arith.constant 0.000000e+00 : f32
    %69 = vector.broadcast %cst_78 : f32 to vector<7x128xf32>
    %70 = arith.maximumf %68, %69 : vector<7x128xf32>
    %71 = arith.truncf %70 : vector<7x128xf32> to vector<7x128xbf16>
    %c0_79 = arith.constant 0 : index
    %c0_80 = arith.constant 0 : index
    %c0_81 = arith.constant 0 : index
    %72 = vector.load %arg13[%c0_79, %c0_80, %c0_81] : memref<2x7x128xbf16, #tpu.memory_space<vmem>>, vector<1x7x128xbf16>
    %73 = vector.shape_cast %72 : vector<1x7x128xbf16> to vector<7x128xbf16>
    %74 = vector.shape_cast %71 : vector<7x128xbf16> to vector<1x7x128xbf16>
    tpu.vector_store %arg13[%c0_79, %c0_80, %c0_81], %74 {strides = array<i32>} : memref<2x7x128xbf16, #tpu.memory_space<vmem>>, vector<1x7x128xbf16>,
    %cst_82 = arith.constant 0.000000e+00 : f32
    %75 = vector.broadcast %cst_82 : f32 to vector<7x256xf32>
    %c0_83 = arith.constant 0 : index
    %c2_84 = arith.constant 2 : index
    %c0_85 = arith.constant 0 : index
    %c0_86 = arith.constant 0 : index
    %76 = vector.load %arg1[%c0_83, %c2_84, %c0_85, %c0_86] : memref<1x4x8x128xbf16, #tpu.memory_space<vmem>>, vector<1x1x7x128xbf16>
    %77 = vector.shape_cast %76 : vector<1x1x7x128xbf16> to vector<7x128xbf16>
    %c0_87 = arith.constant 0 : index
    %c0_88 = arith.constant 0 : index
    %c0_89 = arith.constant 0 : index
    %78 = vector.load %arg2[%c0_87, %c0_88, %c0_89] : memref<5x128x256xbf16, #tpu.memory_space<vmem>>, vector<1x128x256xbf16>
    %79 = vector.shape_cast %78 : vector<1x128x256xbf16> to vector<128x256xbf16>
    %cst_90 = arith.constant dense<0.000000e+00> : vector<7x256xf32>
    %80 = tpu.matmul %77, %79, %cst_90 {dimension_numbers = #tpu.dot_dimension_numbers<[1], [0], [0], [1], [0, 0, 1, 1], [], []>} : vector<7x128xbf16>, vector<128x256xbf16>, vector<7x256xf32> -> vector<7x256xf32>
    %81 = arith.addf %75, %80 : vector<7x256xf32>
    %c0_91 = arith.constant 0 : index
    %c3_92 = arith.constant 3 : index
    %c0_93 = arith.constant 0 : index
    %c0_94 = arith.constant 0 : index
    %82 = vector.load %arg1[%c0_91, %c3_92, %c0_93, %c0_94] : memref<1x4x8x128xbf16, #tpu.memory_space<vmem>>, vector<1x1x7x128xbf16>
    %83 = vector.shape_cast %82 : vector<1x1x7x128xbf16> to vector<7x128xbf16>
    %c1_95 = arith.constant 1 : index
    %c0_96 = arith.constant 0 : index
    %c0_97 = arith.constant 0 : index
    %84 = vector.load %arg2[%c1_95, %c0_96, %c0_97] : memref<5x128x256xbf16, #tpu.memory_space<vmem>>, vector<1x128x256xbf16>
    %85 = vector.shape_cast %84 : vector<1x128x256xbf16> to vector<128x256xbf16>
    %cst_98 = arith.constant dense<0.000000e+00> : vector<7x256xf32>
    %86 = tpu.matmul %83, %85, %cst_98 {dimension_numbers = #tpu.dot_dimension_numbers<[1], [0], [0], [1], [0, 0, 1, 1], [], []>} : vector<7x128xbf16>, vector<128x256xbf16>, vector<7x256xf32> -> vector<7x256xf32>
    %87 = arith.addf %81, %86 : vector<7x256xf32>
    %c0_99 = arith.constant 0 : index
    %c0_100 = arith.constant 0 : index
    %c1_101 = arith.constant 1 : index
    %c0_102 = arith.constant 0 : index
    %88 = vector.load %arg1[%c0_99, %c0_100, %c1_101, %c0_102] : memref<1x4x8x128xbf16, #tpu.memory_space<vmem>>, vector<1x1x7x128xbf16>
    %89 = vector.shape_cast %88 : vector<1x1x7x128xbf16> to vector<7x128xbf16>
    %c2_103 = arith.constant 2 : index
    %c0_104 = arith.constant 0 : index
    %c0_105 = arith.constant 0 : index
    %90 = vector.load %arg2[%c2_103, %c0_104, %c0_105] : memref<5x128x256xbf16, #tpu.memory_space<vmem>>, vector<1x128x256xbf16>
    %91 = vector.shape_cast %90 : vector<1x128x256xbf16> to vector<128x256xbf16>
    %cst_106 = arith.constant dense<0.000000e+00> : vector<7x256xf32>
    %92 = tpu.matmul %89, %91, %cst_106 {dimension_numbers = #tpu.dot_dimension_numbers<[1], [0], [0], [1], [0, 0, 1, 1], [], []>} : vector<7x128xbf16>, vector<128x256xbf16>, vector<7x256xf32> -> vector<7x256xf32>
    %93 = arith.addf %87, %92 : vector<7x256xf32>
    %c0_107 = arith.constant 0 : index
    %c1_108 = arith.constant 1 : index
    %c1_109 = arith.constant 1 : index
    %c0_110 = arith.constant 0 : index
    %94 = vector.load %arg1[%c0_107, %c1_108, %c1_109, %c0_110] : memref<1x4x8x128xbf16, #tpu.memory_space<vmem>>, vector<1x1x7x128xbf16>
    %95 = vector.shape_cast %94 : vector<1x1x7x128xbf16> to vector<7x128xbf16>
    %c3_111 = arith.constant 3 : index
    %c0_112 = arith.constant 0 : index
    %c0_113 = arith.constant 0 : index
    %96 = vector.load %arg2[%c3_111, %c0_112, %c0_113] : memref<5x128x256xbf16, #tpu.memory_space<vmem>>, vector<1x128x256xbf16>
    %97 = vector.shape_cast %96 : vector<1x128x256xbf16> to vector<128x256xbf16>
    %cst_114 = arith.constant dense<0.000000e+00> : vector<7x256xf32>
    %98 = tpu.matmul %95, %97, %cst_114 {dimension_numbers = #tpu.dot_dimension_numbers<[1], [0], [0], [1], [0, 0, 1, 1], [], []>} : vector<7x128xbf16>, vector<128x256xbf16>, vector<7x256xf32> -> vector<7x256xf32>
    %99 = arith.addf %93, %98 : vector<7x256xf32>
    %c0_115 = arith.constant 0 : index
    %c2_116 = arith.constant 2 : index
    %c1_117 = arith.constant 1 : index
    %c0_118 = arith.constant 0 : index
    %100 = vector.load %arg1[%c0_115, %c2_116, %c1_117, %c0_118] : memref<1x4x8x128xbf16, #tpu.memory_space<vmem>>, vector<1x1x7x128xbf16>
    %101 = vector.shape_cast %100 : vector<1x1x7x128xbf16> to vector<7x128xbf16>
    %c4_119 = arith.constant 4 : index
    %c0_120 = arith.constant 0 : index
    %c0_121 = arith.constant 0 : index
    %102 = vector.load %arg2[%c4_119, %c0_120, %c0_121] : memref<5x128x256xbf16, #tpu.memory_space<vmem>>, vector<1x128x256xbf16>
    %103 = vector.shape_cast %102 : vector<1x128x256xbf16> to vector<128x256xbf16>
    %cst_122 = arith.constant dense<0.000000e+00> : vector<7x256xf32>
    %104 = tpu.matmul %101, %103, %cst_122 {dimension_numbers = #tpu.dot_dimension_numbers<[1], [0], [0], [1], [0, 0, 1, 1], [], []>} : vector<7x128xbf16>, vector<128x256xbf16>, vector<7x256xf32> -> vector<7x256xf32>
    %105 = arith.addf %99, %104 : vector<7x256xf32>
    %cst_123 = arith.constant 0.000000e+00 : f32
    %106 = vector.broadcast %cst_123 : f32 to vector<7x256xf32>
    %c0_124 = arith.constant 0 : index
    %c3_125 = arith.constant 3 : index
    %c0_126 = arith.constant 0 : index
    %c0_127 = arith.constant 0 : index
    %107 = vector.load %arg1[%c0_124, %c3_125, %c0_126, %c0_127] : memref<1x4x8x128xbf16, #tpu.memory_space<vmem>>, vector<1x1x7x128xbf16>
    %108 = vector.shape_cast %107 : vector<1x1x7x128xbf16> to vector<7x128xbf16>
    %c0_128 = arith.constant 0 : index
    %c0_129 = arith.constant 0 : index
    %c0_130 = arith.constant 0 : index
    %109 = vector.load %arg2[%c0_128, %c0_129, %c0_130] : memref<5x128x256xbf16, #tpu.memory_space<vmem>>, vector<1x128x256xbf16>
    %110 = vector.shape_cast %109 : vector<1x128x256xbf16> to vector<128x256xbf16>
    %cst_131 = arith.constant dense<0.000000e+00> : vector<7x256xf32>
    %111 = tpu.matmul %108, %110, %cst_131 {dimension_numbers = #tpu.dot_dimension_numbers<[1], [0], [0], [1], [0, 0, 1, 1], [], []>} : vector<7x128xbf16>, vector<128x256xbf16>, vector<7x256xf32> -> vector<7x256xf32>
    %112 = arith.addf %106, %111 : vector<7x256xf32>
    %c0_132 = arith.constant 0 : index
    %c0_133 = arith.constant 0 : index
    %c1_134 = arith.constant 1 : index
    %c0_135 = arith.constant 0 : index
    %113 = vector.load %arg1[%c0_132, %c0_133, %c1_134, %c0_135] : memref<1x4x8x128xbf16, #tpu.memory_space<vmem>>, vector<1x1x7x128xbf16>
    %114 = vector.shape_cast %113 : vector<1x1x7x128xbf16> to vector<7x128xbf16>
    %c1_136 = arith.constant 1 : index
    %c0_137 = arith.constant 0 : index
    %c0_138 = arith.constant 0 : index
    %115 = vector.load %arg2[%c1_136, %c0_137, %c0_138] : memref<5x128x256xbf16, #tpu.memory_space<vmem>>, vector<1x128x256xbf16>
    %116 = vector.shape_cast %115 : vector<1x128x256xbf16> to vector<128x256xbf16>
    %cst_139 = arith.constant dense<0.000000e+00> : vector<7x256xf32>
    %117 = tpu.matmul %114, %116, %cst_139 {dimension_numbers = #tpu.dot_dimension_numbers<[1], [0], [0], [1], [0, 0, 1, 1], [], []>} : vector<7x128xbf16>, vector<128x256xbf16>, vector<7x256xf32> -> vector<7x256xf32>
    %118 = arith.addf %112, %117 : vector<7x256xf32>
    %c0_140 = arith.constant 0 : index
    %c1_141 = arith.constant 1 : index
    %c1_142 = arith.constant 1 : index
    %c0_143 = arith.constant 0 : index
    %119 = vector.load %arg1[%c0_140, %c1_141, %c1_142, %c0_143] : memref<1x4x8x128xbf16, #tpu.memory_space<vmem>>, vector<1x1x7x128xbf16>
    %120 = vector.shape_cast %119 : vector<1x1x7x128xbf16> to vector<7x128xbf16>
    %c2_144 = arith.constant 2 : index
    %c0_145 = arith.constant 0 : index
    %c0_146 = arith.constant 0 : index
    %121 = vector.load %arg2[%c2_144, %c0_145, %c0_146] : memref<5x128x256xbf16, #tpu.memory_space<vmem>>, vector<1x128x256xbf16>
    %122 = vector.shape_cast %121 : vector<1x128x256xbf16> to vector<128x256xbf16>
    %cst_147 = arith.constant dense<0.000000e+00> : vector<7x256xf32>
    %123 = tpu.matmul %120, %122, %cst_147 {dimension_numbers = #tpu.dot_dimension_numbers<[1], [0], [0], [1], [0, 0, 1, 1], [], []>} : vector<7x128xbf16>, vector<128x256xbf16>, vector<7x256xf32> -> vector<7x256xf32>
    %124 = arith.addf %118, %123 : vector<7x256xf32>
    %c0_148 = arith.constant 0 : index
    %c2_149 = arith.constant 2 : index
    %c1_150 = arith.constant 1 : index
    %c0_151 = arith.constant 0 : index
    %125 = vector.load %arg1[%c0_148, %c2_149, %c1_150, %c0_151] : memref<1x4x8x128xbf16, #tpu.memory_space<vmem>>, vector<1x1x7x128xbf16>
    %126 = vector.shape_cast %125 : vector<1x1x7x128xbf16> to vector<7x128xbf16>
    %c3_152 = arith.constant 3 : index
    %c0_153 = arith.constant 0 : index
    %c0_154 = arith.constant 0 : index
    %127 = vector.load %arg2[%c3_152, %c0_153, %c0_154] : memref<5x128x256xbf16, #tpu.memory_space<vmem>>, vector<1x128x256xbf16>
    %128 = vector.shape_cast %127 : vector<1x128x256xbf16> to vector<128x256xbf16>
    %cst_155 = arith.constant dense<0.000000e+00> : vector<7x256xf32>
    %129 = tpu.matmul %126, %128, %cst_155 {dimension_numbers = #tpu.dot_dimension_numbers<[1], [0], [0], [1], [0, 0, 1, 1], [], []>} : vector<7x128xbf16>, vector<128x256xbf16>, vector<7x256xf32> -> vector<7x256xf32>
    %130 = arith.addf %124, %129 : vector<7x256xf32>
    %c0_156 = arith.constant 0 : index
    %c3_157 = arith.constant 3 : index
    %c1_158 = arith.constant 1 : index
    %c0_159 = arith.constant 0 : index
    %131 = vector.load %arg1[%c0_156, %c3_157, %c1_158, %c0_159] : memref<1x4x8x128xbf16, #tpu.memory_space<vmem>>, vector<1x1x7x128xbf16>
    %132 = vector.shape_cast %131 : vector<1x1x7x128xbf16> to vector<7x128xbf16>
    %c4_160 = arith.constant 4 : index
    %c0_161 = arith.constant 0 : index
    %c0_162 = arith.constant 0 : index
    %133 = vector.load %arg2[%c4_160, %c0_161, %c0_162] : memref<5x128x256xbf16, #tpu.memory_space<vmem>>, vector<1x128x256xbf16>
    %134 = vector.shape_cast %133 : vector<1x128x256xbf16> to vector<128x256xbf16>
    %cst_163 = arith.constant dense<0.000000e+00> : vector<7x256xf32>
    %135 = tpu.matmul %132, %134, %cst_163 {dimension_numbers = #tpu.dot_dimension_numbers<[1], [0], [0], [1], [0, 0, 1, 1], [], []>} : vector<7x128xbf16>, vector<128x256xbf16>, vector<7x256xf32> -> vector<7x256xf32>
    %136 = arith.addf %130, %135 : vector<7x256xf32>
    %137 = arith.maximumf %105, %136 : vector<7x256xf32>
    %138 = vector.extract_strided_slice %137 {offsets = [0, 0], sizes = [7, 128], strides = [1, 1]} : vector<7x256xf32> to vector<7x128xf32>
    %139 = vector.extract_strided_slice %137 {offsets = [0, 128], sizes = [7, 128], strides = [1, 1]} : vector<7x256xf32> to vector<7x128xf32>
    %140 = arith.maximumf %138, %139 : vector<7x128xf32>
    %c0_164 = arith.constant 0 : index
    %c0_165 = arith.constant 0 : index
    %141 = vector.load %arg3[%c0_164, %c0_165] : memref<1x128xf32, #tpu.memory_space<vmem>>, vector<1x128xf32>
    %142 = vector.broadcast %141 : vector<1x128xf32> to vector<7x128xf32>
    %143 = arith.addf %140, %142 : vector<7x128xf32>
    %cst_166 = arith.constant 0.000000e+00 : f32
    %144 = vector.broadcast %cst_166 : f32 to vector<7x128xf32>
    %145 = arith.maximumf %143, %144 : vector<7x128xf32>
    %146 = arith.truncf %145 : vector<7x128xf32> to vector<7x128xbf16>
    %c1_167 = arith.constant 1 : index
    %c0_168 = arith.constant 0 : index
    %c0_169 = arith.constant 0 : index
    %147 = vector.load %arg13[%c1_167, %c0_168, %c0_169] : memref<2x7x128xbf16, #tpu.memory_space<vmem>>, vector<1x7x128xbf16>
    %148 = vector.shape_cast %147 : vector<1x7x128xbf16> to vector<7x128xbf16>
    %149 = vector.shape_cast %146 : vector<7x128xbf16> to vector<1x7x128xbf16>
    tpu.vector_store %arg13[%c1_167, %c0_168, %c0_169], %149 {strides = array<i32>} : memref<2x7x128xbf16, #tpu.memory_space<vmem>>, vector<1x7x128xbf16>,
    %cst_170 = arith.constant 0.000000e+00 : f32
    %150 = vector.broadcast %cst_170 : f32 to vector<5x256xf32>
    %c0_171 = arith.constant 0 : index
    %c0_172 = arith.constant 0 : index
    %c0_173 = arith.constant 0 : index
    %151 = vector.load %arg13[%c0_171, %c0_172, %c0_173] : memref<2x7x128xbf16, #tpu.memory_space<vmem>>, vector<1x5x128xbf16>
    %152 = vector.shape_cast %151 : vector<1x5x128xbf16> to vector<5x128xbf16>
    %c0_174 = arith.constant 0 : index
    %c0_175 = arith.constant 0 : index
    %c0_176 = arith.constant 0 : index
    %153 = vector.load %arg4[%c0_174, %c0_175, %c0_176] : memref<5x128x256xbf16, #tpu.memory_space<vmem>>, vector<1x128x256xbf16>
    %154 = vector.shape_cast %153 : vector<1x128x256xbf16> to vector<128x256xbf16>
    %cst_177 = arith.constant dense<0.000000e+00> : vector<5x256xf32>
    %155 = tpu.matmul %152, %154, %cst_177 {dimension_numbers = #tpu.dot_dimension_numbers<[1], [0], [0], [1], [0, 0, 1, 1], [], []>} : vector<5x128xbf16>, vector<128x256xbf16>, vector<5x256xf32> -> vector<5x256xf32>
    %156 = arith.addf %150, %155 : vector<5x256xf32>
    %c1_178 = arith.constant 1 : index
    %c0_179 = arith.constant 0 : index
    %c0_180 = arith.constant 0 : index
    %157 = vector.load %arg13[%c1_178, %c0_179, %c0_180] : memref<2x7x128xbf16, #tpu.memory_space<vmem>>, vector<1x5x128xbf16>
    %158 = vector.shape_cast %157 : vector<1x5x128xbf16> to vector<5x128xbf16>
    %c1_181 = arith.constant 1 : index
    %c0_182 = arith.constant 0 : index
    %c0_183 = arith.constant 0 : index
    %159 = vector.load %arg4[%c1_181, %c0_182, %c0_183] : memref<5x128x256xbf16, #tpu.memory_space<vmem>>, vector<1x128x256xbf16>
    %160 = vector.shape_cast %159 : vector<1x128x256xbf16> to vector<128x256xbf16>
    %cst_184 = arith.constant dense<0.000000e+00> : vector<5x256xf32>
    %161 = tpu.matmul %158, %160, %cst_184 {dimension_numbers = #tpu.dot_dimension_numbers<[1], [0], [0], [1], [0, 0, 1, 1], [], []>} : vector<5x128xbf16>, vector<128x256xbf16>, vector<5x256xf32> -> vector<5x256xf32>
    %162 = arith.addf %156, %161 : vector<5x256xf32>
    %c0_185 = arith.constant 0 : index
    %c1_186 = arith.constant 1 : index
    %c0_187 = arith.constant 0 : index
    %163 = vector.load %arg13[%c0_185, %c1_186, %c0_187] : memref<2x7x128xbf16, #tpu.memory_space<vmem>>, vector<1x5x128xbf16>
    %164 = vector.shape_cast %163 : vector<1x5x128xbf16> to vector<5x128xbf16>
    %c2_188 = arith.constant 2 : index
    %c0_189 = arith.constant 0 : index
    %c0_190 = arith.constant 0 : index
    %165 = vector.load %arg4[%c2_188, %c0_189, %c0_190] : memref<5x128x256xbf16, #tpu.memory_space<vmem>>, vector<1x128x256xbf16>
    %166 = vector.shape_cast %165 : vector<1x128x256xbf16> to vector<128x256xbf16>
    %cst_191 = arith.constant dense<0.000000e+00> : vector<5x256xf32>
    %167 = tpu.matmul %164, %166, %cst_191 {dimension_numbers = #tpu.dot_dimension_numbers<[1], [0], [0], [1], [0, 0, 1, 1], [], []>} : vector<5x128xbf16>, vector<128x256xbf16>, vector<5x256xf32> -> vector<5x256xf32>
    %168 = arith.addf %162, %167 : vector<5x256xf32>
    %c1_192 = arith.constant 1 : index
    %c1_193 = arith.constant 1 : index
    %c0_194 = arith.constant 0 : index
    %169 = vector.load %arg13[%c1_192, %c1_193, %c0_194] : memref<2x7x128xbf16, #tpu.memory_space<vmem>>, vector<1x5x128xbf16>
    %170 = vector.shape_cast %169 : vector<1x5x128xbf16> to vector<5x128xbf16>
    %c3_195 = arith.constant 3 : index
    %c0_196 = arith.constant 0 : index
    %c0_197 = arith.constant 0 : index
    %171 = vector.load %arg4[%c3_195, %c0_196, %c0_197] : memref<5x128x256xbf16, #tpu.memory_space<vmem>>, vector<1x128x256xbf16>
    %172 = vector.shape_cast %171 : vector<1x128x256xbf16> to vector<128x256xbf16>
    %cst_198 = arith.constant dense<0.000000e+00> : vector<5x256xf32>
    %173 = tpu.matmul %170, %172, %cst_198 {dimension_numbers = #tpu.dot_dimension_numbers<[1], [0], [0], [1], [0, 0, 1, 1], [], []>} : vector<5x128xbf16>, vector<128x256xbf16>, vector<5x256xf32> -> vector<5x256xf32>
    %174 = arith.addf %168, %173 : vector<5x256xf32>
    %c0_199 = arith.constant 0 : index
    %c2_200 = arith.constant 2 : index
    %c0_201 = arith.constant 0 : index
    %175 = vector.load %arg13[%c0_199, %c2_200, %c0_201] : memref<2x7x128xbf16, #tpu.memory_space<vmem>>, vector<1x5x128xbf16>
    %176 = vector.shape_cast %175 : vector<1x5x128xbf16> to vector<5x128xbf16>
    %c4_202 = arith.constant 4 : index
    %c0_203 = arith.constant 0 : index
    %c0_204 = arith.constant 0 : index
    %177 = vector.load %arg4[%c4_202, %c0_203, %c0_204] : memref<5x128x256xbf16, #tpu.memory_space<vmem>>, vector<1x128x256xbf16>
    %178 = vector.shape_cast %177 : vector<1x128x256xbf16> to vector<128x256xbf16>
    %cst_205 = arith.constant dense<0.000000e+00> : vector<5x256xf32>
    %179 = tpu.matmul %176, %178, %cst_205 {dimension_numbers = #tpu.dot_dimension_numbers<[1], [0], [0], [1], [0, 0, 1, 1], [], []>} : vector<5x128xbf16>, vector<128x256xbf16>, vector<5x256xf32> -> vector<5x256xf32>
    %180 = arith.addf %174, %179 : vector<5x256xf32>
    %cst_206 = arith.constant 0.000000e+00 : f32
    %181 = vector.broadcast %cst_206 : f32 to vector<5x256xf32>
    %c1_207 = arith.constant 1 : index
    %c0_208 = arith.constant 0 : index
    %c0_209 = arith.constant 0 : index
    %182 = vector.load %arg13[%c1_207, %c0_208, %c0_209] : memref<2x7x128xbf16, #tpu.memory_space<vmem>>, vector<1x5x128xbf16>
    %183 = vector.shape_cast %182 : vector<1x5x128xbf16> to vector<5x128xbf16>
    %c0_210 = arith.constant 0 : index
    %c0_211 = arith.constant 0 : index
    %c0_212 = arith.constant 0 : index
    %184 = vector.load %arg4[%c0_210, %c0_211, %c0_212] : memref<5x128x256xbf16, #tpu.memory_space<vmem>>, vector<1x128x256xbf16>
    %185 = vector.shape_cast %184 : vector<1x128x256xbf16> to vector<128x256xbf16>
    %cst_213 = arith.constant dense<0.000000e+00> : vector<5x256xf32>
    %186 = tpu.matmul %183, %185, %cst_213 {dimension_numbers = #tpu.dot_dimension_numbers<[1], [0], [0], [1], [0, 0, 1, 1], [], []>} : vector<5x128xbf16>, vector<128x256xbf16>, vector<5x256xf32> -> vector<5x256xf32>
    %187 = arith.addf %181, %186 : vector<5x256xf32>
    %c0_214 = arith.constant 0 : index
    %c1_215 = arith.constant 1 : index
    %c0_216 = arith.constant 0 : index
    %188 = vector.load %arg13[%c0_214, %c1_215, %c0_216] : memref<2x7x128xbf16, #tpu.memory_space<vmem>>, vector<1x5x128xbf16>
    %189 = vector.shape_cast %188 : vector<1x5x128xbf16> to vector<5x128xbf16>
    %c1_217 = arith.constant 1 : index
    %c0_218 = arith.constant 0 : index
    %c0_219 = arith.constant 0 : index
    %190 = vector.load %arg4[%c1_217, %c0_218, %c0_219] : memref<5x128x256xbf16, #tpu.memory_space<vmem>>, vector<1x128x256xbf16>
    %191 = vector.shape_cast %190 : vector<1x128x256xbf16> to vector<128x256xbf16>
    %cst_220 = arith.constant dense<0.000000e+00> : vector<5x256xf32>
    %192 = tpu.matmul %189, %191, %cst_220 {dimension_numbers = #tpu.dot_dimension_numbers<[1], [0], [0], [1], [0, 0, 1, 1], [], []>} : vector<5x128xbf16>, vector<128x256xbf16>, vector<5x256xf32> -> vector<5x256xf32>
    %193 = arith.addf %187, %192 : vector<5x256xf32>
    %c1_221 = arith.constant 1 : index
    %c1_222 = arith.constant 1 : index
    %c0_223 = arith.constant 0 : index
    %194 = vector.load %arg13[%c1_221, %c1_222, %c0_223] : memref<2x7x128xbf16, #tpu.memory_space<vmem>>, vector<1x5x128xbf16>
    %195 = vector.shape_cast %194 : vector<1x5x128xbf16> to vector<5x128xbf16>
    %c2_224 = arith.constant 2 : index
    %c0_225 = arith.constant 0 : index
    %c0_226 = arith.constant 0 : index
    %196 = vector.load %arg4[%c2_224, %c0_225, %c0_226] : memref<5x128x256xbf16, #tpu.memory_space<vmem>>, vector<1x128x256xbf16>
    %197 = vector.shape_cast %196 : vector<1x128x256xbf16> to vector<128x256xbf16>
    %cst_227 = arith.constant dense<0.000000e+00> : vector<5x256xf32>
    %198 = tpu.matmul %195, %197, %cst_227 {dimension_numbers = #tpu.dot_dimension_numbers<[1], [0], [0], [1], [0, 0, 1, 1], [], []>} : vector<5x128xbf16>, vector<128x256xbf16>, vector<5x256xf32> -> vector<5x256xf32>
    %199 = arith.addf %193, %198 : vector<5x256xf32>
    %c0_228 = arith.constant 0 : index
    %c2_229 = arith.constant 2 : index
    %c0_230 = arith.constant 0 : index
    %200 = vector.load %arg13[%c0_228, %c2_229, %c0_230] : memref<2x7x128xbf16, #tpu.memory_space<vmem>>, vector<1x5x128xbf16>
    %201 = vector.shape_cast %200 : vector<1x5x128xbf16> to vector<5x128xbf16>
    %c3_231 = arith.constant 3 : index
    %c0_232 = arith.constant 0 : index
    %c0_233 = arith.constant 0 : index
    %202 = vector.load %arg4[%c3_231, %c0_232, %c0_233] : memref<5x128x256xbf16, #tpu.memory_space<vmem>>, vector<1x128x256xbf16>
    %203 = vector.shape_cast %202 : vector<1x128x256xbf16> to vector<128x256xbf16>
    %cst_234 = arith.constant dense<0.000000e+00> : vector<5x256xf32>
    %204 = tpu.matmul %201, %203, %cst_234 {dimension_numbers = #tpu.dot_dimension_numbers<[1], [0], [0], [1], [0, 0, 1, 1], [], []>} : vector<5x128xbf16>, vector<128x256xbf16>, vector<5x256xf32> -> vector<5x256xf32>
    %205 = arith.addf %199, %204 : vector<5x256xf32>
    %c1_235 = arith.constant 1 : index
    %c2_236 = arith.constant 2 : index
    %c0_237 = arith.constant 0 : index
    %206 = vector.load %arg13[%c1_235, %c2_236, %c0_237] : memref<2x7x128xbf16, #tpu.memory_space<vmem>>, vector<1x5x128xbf16>
    %207 = vector.shape_cast %206 : vector<1x5x128xbf16> to vector<5x128xbf16>
    %c4_238 = arith.constant 4 : index
    %c0_239 = arith.constant 0 : index
    %c0_240 = arith.constant 0 : index
    %208 = vector.load %arg4[%c4_238, %c0_239, %c0_240] : memref<5x128x256xbf16, #tpu.memory_space<vmem>>, vector<1x128x256xbf16>
    %209 = vector.shape_cast %208 : vector<1x128x256xbf16> to vector<128x256xbf16>
    %cst_241 = arith.constant dense<0.000000e+00> : vector<5x256xf32>
    %210 = tpu.matmul %207, %209, %cst_241 {dimension_numbers = #tpu.dot_dimension_numbers<[1], [0], [0], [1], [0, 0, 1, 1], [], []>} : vector<5x128xbf16>, vector<128x256xbf16>, vector<5x256xf32> -> vector<5x256xf32>
    %211 = arith.addf %205, %210 : vector<5x256xf32>
    %212 = arith.maximumf %180, %211 : vector<5x256xf32>
    %213 = vector.extract_strided_slice %212 {offsets = [0, 0], sizes = [5, 128], strides = [1, 1]} : vector<5x256xf32> to vector<5x128xf32>
    %214 = vector.extract_strided_slice %212 {offsets = [0, 128], sizes = [5, 128], strides = [1, 1]} : vector<5x256xf32> to vector<5x128xf32>
    %215 = arith.maximumf %213, %214 : vector<5x128xf32>
    %c0_242 = arith.constant 0 : index
    %c0_243 = arith.constant 0 : index
    %216 = vector.load %arg5[%c0_242, %c0_243] : memref<1x128xf32, #tpu.memory_space<vmem>>, vector<1x128xf32>
    %217 = vector.broadcast %216 : vector<1x128xf32> to vector<5x128xf32>
    %218 = arith.addf %215, %217 : vector<5x128xf32>
    %cst_244 = arith.constant 0.000000e+00 : f32
    %219 = vector.broadcast %cst_244 : f32 to vector<5x128xf32>
    %220 = arith.maximumf %218, %219 : vector<5x128xf32>
    %221 = arith.truncf %220 : vector<5x128xf32> to vector<5x128xbf16>
    %cst_245 = arith.constant 0.000000e+00 : f32
    %222 = vector.broadcast %cst_245 : f32 to vector<1x128xf32>
    %223 = vector.extract_strided_slice %221 {offsets = [0, 0], sizes = [1, 128], strides = [1, 1]} : vector<5x128xbf16> to vector<1x128xbf16>
    %c0_246 = arith.constant 0 : index
    %c0_247 = arith.constant 0 : index
    %c0_248 = arith.constant 0 : index
    %224 = vector.load %arg6[%c0_246, %c0_247, %c0_248] : memref<5x128x128xbf16, #tpu.memory_space<vmem>>, vector<1x128x128xbf16>
    %225 = vector.shape_cast %224 : vector<1x128x128xbf16> to vector<128x128xbf16>
    %cst_249 = arith.constant dense<0.000000e+00> : vector<1x128xf32>
    %226 = tpu.matmul %223, %225, %cst_249 {dimension_numbers = #tpu.dot_dimension_numbers<[1], [0], [0], [1], [0, 0, 1, 1], [], []>} : vector<1x128xbf16>, vector<128x128xbf16>, vector<1x128xf32> -> vector<1x128xf32>
    %227 = arith.addf %222, %226 : vector<1x128xf32>
    %228 = vector.extract_strided_slice %221 {offsets = [1, 0], sizes = [1, 128], strides = [1, 1]} : vector<5x128xbf16> to vector<1x128xbf16>
    %c1_250 = arith.constant 1 : index
    %c0_251 = arith.constant 0 : index
    %c0_252 = arith.constant 0 : index
    %229 = vector.load %arg6[%c1_250, %c0_251, %c0_252] : memref<5x128x128xbf16, #tpu.memory_space<vmem>>, vector<1x128x128xbf16>
    %230 = vector.shape_cast %229 : vector<1x128x128xbf16> to vector<128x128xbf16>
    %cst_253 = arith.constant dense<0.000000e+00> : vector<1x128xf32>
    %231 = tpu.matmul %228, %230, %cst_253 {dimension_numbers = #tpu.dot_dimension_numbers<[1], [0], [0], [1], [0, 0, 1, 1], [], []>} : vector<1x128xbf16>, vector<128x128xbf16>, vector<1x128xf32> -> vector<1x128xf32>
    %232 = arith.addf %227, %231 : vector<1x128xf32>
    %233 = vector.extract_strided_slice %221 {offsets = [2, 0], sizes = [1, 128], strides = [1, 1]} : vector<5x128xbf16> to vector<1x128xbf16>
    %c2_254 = arith.constant 2 : index
    %c0_255 = arith.constant 0 : index
    %c0_256 = arith.constant 0 : index
    %234 = vector.load %arg6[%c2_254, %c0_255, %c0_256] : memref<5x128x128xbf16, #tpu.memory_space<vmem>>, vector<1x128x128xbf16>
    %235 = vector.shape_cast %234 : vector<1x128x128xbf16> to vector<128x128xbf16>
    %cst_257 = arith.constant dense<0.000000e+00> : vector<1x128xf32>
    %236 = tpu.matmul %233, %235, %cst_257 {dimension_numbers = #tpu.dot_dimension_numbers<[1], [0], [0], [1], [0, 0, 1, 1], [], []>} : vector<1x128xbf16>, vector<128x128xbf16>, vector<1x128xf32> -> vector<1x128xf32>
    %237 = arith.addf %232, %236 : vector<1x128xf32>
    %238 = vector.extract_strided_slice %221 {offsets = [3, 0], sizes = [1, 128], strides = [1, 1]} : vector<5x128xbf16> to vector<1x128xbf16>
    %c3_258 = arith.constant 3 : index
    %c0_259 = arith.constant 0 : index
    %c0_260 = arith.constant 0 : index
    %239 = vector.load %arg6[%c3_258, %c0_259, %c0_260] : memref<5x128x128xbf16, #tpu.memory_space<vmem>>, vector<1x128x128xbf16>
    %240 = vector.shape_cast %239 : vector<1x128x128xbf16> to vector<128x128xbf16>
    %cst_261 = arith.constant dense<0.000000e+00> : vector<1x128xf32>
    %241 = tpu.matmul %238, %240, %cst_261 {dimension_numbers = #tpu.dot_dimension_numbers<[1], [0], [0], [1], [0, 0, 1, 1], [], []>} : vector<1x128xbf16>, vector<128x128xbf16>, vector<1x128xf32> -> vector<1x128xf32>
    %242 = arith.addf %237, %241 : vector<1x128xf32>
    %243 = vector.extract_strided_slice %221 {offsets = [4, 0], sizes = [1, 128], strides = [1, 1]} : vector<5x128xbf16> to vector<1x128xbf16>
    %c4_262 = arith.constant 4 : index
    %c0_263 = arith.constant 0 : index
    %c0_264 = arith.constant 0 : index
    %244 = vector.load %arg6[%c4_262, %c0_263, %c0_264] : memref<5x128x128xbf16, #tpu.memory_space<vmem>>, vector<1x128x128xbf16>
    %245 = vector.shape_cast %244 : vector<1x128x128xbf16> to vector<128x128xbf16>
    %cst_265 = arith.constant dense<0.000000e+00> : vector<1x128xf32>
    %246 = tpu.matmul %243, %245, %cst_265 {dimension_numbers = #tpu.dot_dimension_numbers<[1], [0], [0], [1], [0, 0, 1, 1], [], []>} : vector<1x128xbf16>, vector<128x128xbf16>, vector<1x128xf32> -> vector<1x128xf32>
    %247 = arith.addf %242, %246 : vector<1x128xf32>
    %c0_266 = arith.constant 0 : index
    %c0_267 = arith.constant 0 : index
    %248 = vector.load %arg7[%c0_266, %c0_267] : memref<1x128xf32, #tpu.memory_space<vmem>>, vector<1x128xf32>
    %249 = arith.addf %247, %248 : vector<1x128xf32>
    %cst_268 = arith.constant 0.000000e+00 : f32
    %250 = vector.broadcast %cst_268 : f32 to vector<1x128xf32>
    %251 = arith.maximumf %249, %250 : vector<1x128xf32>
    %252 = arith.truncf %251 : vector<1x128xf32> to vector<1x128xbf16>
    %c0_269 = arith.constant 0 : index
    %c0_270 = arith.constant 0 : index
    %253 = vector.load %arg8[%c0_269, %c0_270] : memref<128x128xbf16, #tpu.memory_space<vmem>>, vector<128x128xbf16>
    %cst_271 = arith.constant dense<0.000000e+00> : vector<1x128xf32>
    %254 = tpu.matmul %252, %253, %cst_271 {dimension_numbers = #tpu.dot_dimension_numbers<[1], [0], [0], [1], [0, 0, 1, 1], [], []>} : vector<1x128xbf16>, vector<128x128xbf16>, vector<1x128xf32> -> vector<1x128xf32>
    %c0_272 = arith.constant 0 : index
    %c0_273 = arith.constant 0 : index
    %255 = vector.load %arg9[%c0_272, %c0_273] : memref<1x128xf32, #tpu.memory_space<vmem>>, vector<1x128xf32>
    %256 = arith.addf %254, %255 : vector<1x128xf32>
    %cst_274 = arith.constant 0.000000e+00 : f32
    %257 = vector.broadcast %cst_274 : f32 to vector<1x128xf32>
    %258 = arith.maximumf %256, %257 : vector<1x128xf32>
    %259 = arith.truncf %258 : vector<1x128xf32> to vector<1x128xbf16>
    %c0_275 = arith.constant 0 : index
    %c0_276 = arith.constant 0 : index
    %260 = vector.load %arg10[%c0_275, %c0_276] : memref<128x10xbf16, #tpu.memory_space<vmem>>, vector<128x10xbf16>
    %cst_277 = arith.constant dense<0.000000e+00> : vector<1x10xf32>
    %261 = tpu.matmul %259, %260, %cst_277 {dimension_numbers = #tpu.dot_dimension_numbers<[1], [0], [0], [1], [0, 0, 1, 1], [], []>} : vector<1x128xbf16>, vector<128x10xbf16>, vector<1x10xf32> -> vector<1x10xf32>
    %c0_278 = arith.constant 0 : index
    %c0_279 = arith.constant 0 : index
    %262 = vector.load %arg11[%c0_278, %c0_279] : memref<1x10xf32, #tpu.memory_space<vmem>>, vector<1x10xf32>
    %263 = arith.addf %261, %262 : vector<1x10xf32>
    %c0_280 = arith.constant 0 : index
    %c0_281 = arith.constant 0 : index
    %c0_282 = arith.constant 0 : index
    %264 = vector.load %arg12[%c0_280, %c0_281, %c0_282] : memref<1x1x10xf32, #tpu.memory_space<vmem>>, vector<1x1x10xf32>
    %265 = vector.shape_cast %264 : vector<1x1x10xf32> to vector<1x10xf32>
    %266 = vector.shape_cast %263 : vector<1x10xf32> to vector<1x1x10xf32>
    tpu.vector_store %arg12[%c0_280, %c0_281, %c0_282], %266 {strides = array<i32>} : memref<1x1x10xf32, #tpu.memory_space<vmem>>, vector<1x1x10xf32>,
    return
  }
  func.func @transform_0(%arg0: i32) -> (i32, i32, i32, i32) {
    %c0_i32 = arith.constant 0 : i32
    %c0_i32_0 = arith.constant 0 : i32
    %c0_i32_1 = arith.constant 0 : i32
    %c0_i32_2 = arith.constant 0 : i32
    return %arg0, %c0_i32, %c0_i32_0, %c0_i32_1 : i32, i32, i32, i32
  }
  func.func @transform_1(%arg0: i32) -> (i32, i32, i32) {
    %c0_i32 = arith.constant 0 : i32
    %c0_i32_0 = arith.constant 0 : i32
    %c0_i32_1 = arith.constant 0 : i32
    %c0_i32_2 = arith.constant 0 : i32
    return %c0_i32, %c0_i32_0, %c0_i32_1 : i32, i32, i32
  }
  func.func @transform_2(%arg0: i32) -> (i32, i32) {
    %c0_i32 = arith.constant 0 : i32
    %c0_i32_0 = arith.constant 0 : i32
    %c0_i32_1 = arith.constant 0 : i32
    return %c0_i32, %c0_i32_0 : i32, i32
  }
  func.func @transform_3(%arg0: i32) -> (i32, i32, i32) {
    %c0_i32 = arith.constant 0 : i32
    %c0_i32_0 = arith.constant 0 : i32
    %c0_i32_1 = arith.constant 0 : i32
    %c0_i32_2 = arith.constant 0 : i32
    return %c0_i32, %c0_i32_0, %c0_i32_1 : i32, i32, i32
  }
  func.func @transform_4(%arg0: i32) -> (i32, i32) {
    %c0_i32 = arith.constant 0 : i32
    %c0_i32_0 = arith.constant 0 : i32
    %c0_i32_1 = arith.constant 0 : i32
    return %c0_i32, %c0_i32_0 : i32, i32
  }
  func.func @transform_5(%arg0: i32) -> (i32, i32, i32) {
    %c0_i32 = arith.constant 0 : i32
    %c0_i32_0 = arith.constant 0 : i32
    %c0_i32_1 = arith.constant 0 : i32
    %c0_i32_2 = arith.constant 0 : i32
    return %c0_i32, %c0_i32_0, %c0_i32_1 : i32, i32, i32
  }
  func.func @transform_6(%arg0: i32) -> (i32, i32) {
    %c0_i32 = arith.constant 0 : i32
    %c0_i32_0 = arith.constant 0 : i32
    %c0_i32_1 = arith.constant 0 : i32
    return %c0_i32, %c0_i32_0 : i32, i32
  }
  func.func @transform_7(%arg0: i32) -> (i32, i32) {
    %c0_i32 = arith.constant 0 : i32
    %c0_i32_0 = arith.constant 0 : i32
    %c0_i32_1 = arith.constant 0 : i32
    return %c0_i32, %c0_i32_0 : i32, i32
  }
  func.func @transform_8(%arg0: i32) -> (i32, i32) {
    %c0_i32 = arith.constant 0 : i32
    %c0_i32_0 = arith.constant 0 : i32
    %c0_i32_1 = arith.constant 0 : i32
    return %c0_i32, %c0_i32_0 : i32, i32
  }
  func.func @transform_9(%arg0: i32) -> (i32, i32) {
    %c0_i32 = arith.constant 0 : i32
    %c0_i32_0 = arith.constant 0 : i32
    %c0_i32_1 = arith.constant 0 : i32
    return %c0_i32, %c0_i32_0 : i32, i32
  }
  func.func @transform_10(%arg0: i32) -> (i32, i32) {
    %c0_i32 = arith.constant 0 : i32
    %c0_i32_0 = arith.constant 0 : i32
    %c0_i32_1 = arith.constant 0 : i32
    return %c0_i32, %c0_i32_0 : i32, i32
  }
  func.func @transform_11(%arg0: i32) -> (i32, i32, i32) {
    %c0_i32 = arith.constant 0 : i32
    %c0_i32_0 = arith.constant 0 : i32
    %c0_i32_1 = arith.constant 0 : i32
    return %arg0, %c0_i32, %c0_i32_0 : i32, i32, i32
  }
}

</mosaic_0001>

<bundles_post_ra>
// kernel: net_forward.1
= control target key start
LH: loop header
LB: loop body
LE: loop exit
PB: predicated region body
PF: predicated region fallthrough
CT: control target
= control target key end

     0   :  { %s8197_s0 = inlined_call_operand.vmem [shape: bf16[2,4,8,128], index: 0, kind: input, shape index: {}]   ;;  %s8198_s1 = inlined_call_operand.vmem [shape: bf16[5,128,256], index: 1, kind: input, shape index: {}]   ;;  %s8199_s2 = inlined_call_operand.vmem [shape: f32[1,128], index: 2, kind: input, shape index: {}]   ;;  %s8200_s3 = inlined_call_operand.vmem [shape: bf16[5,128,256], index: 3, kind: input, shape index: {}]   ;;  %s8201_s4 = inlined_call_operand.vmem [shape: f32[1,128], index: 4, kind: input, shape index: {}]   ;;  %s8202_s5 = inlined_call_operand.vmem [shape: bf16[5,128,128], index: 5, kind: input, shape index: {}]   ;;  %s8203_s6 = inlined_call_operand.vmem [shape: f32[1,128], index: 6, kind: input, shape index: {}]   ;;  %s8204_s7 = inlined_call_operand.vmem [shape: bf16[128,128], index: 7, kind: input, shape index: {}]   ;;  %s8205_s8 = inlined_call_operand.vmem [shape: f32[1,128], index: 8, kind: input, shape index: {}]   ;;  %s8206_s9 = inlined_call_operand.vmem [shape: bf16[128,10], index: 9, kind: input, shape index: {}]   ;;  %s8207_s10 = inlined_call_operand.vmem [shape: f32[1,10], index: 10, kind: input, shape index: {}]   ;;  %s8208_s11 = inlined_call_operand.hbm [shape: f32[2,1,10], index: 11, kind: output, shape index: {}]  }
   0x1   :  { %8261 = sst [smem:[#allocation32_spill]] %s8197_s0 }
   0x2   :  { %16 = vsyncpa [#allocation4], 0 }
   0x3   :  { %18 = vsyncpa [#allocation4 + $0x1], 0  ;;  %s5355_s17 = smov 0   ;;  %s5357_s18 = smov 0  }
   0x4   :  { %s5359_s19 = smov 0   ;;  %s5361_s20 = smov 0  }
   0x5 LB: > { %8262 = sst [smem:[#allocation6_spill]] %s5289_s19  ;;  %s5376_s21 = sadd.s32 4294967295, %s5293_s20   ;;  %s5293_s20 = sphi %s5361_s20, %s8372_s20   ;;  %s5289_s19 = sphi %s5359_s19, %s8371_s19   ;;  %s5285_s18 = sphi %s5357_s18, %s8370_s18   ;;  %s5281_s17 = sphi %s5355_s17, %s8369_s17  }
   0x6   : > { %s3438_s22 = sadd.s32 4294967294, %s5293_s20   ;;  %s5380_s23 = sadd.s32 1, %s5293_s20  }
   0x7   : > { %s267_s24 = sadd.s32 1, %s5289_s19  ;;  %s264_s25 = ssub.s32 %s5293_s20, %s5380_s23 }
   0x8   : > { %p277_p0 = scmp.ne.s32.totalorder %s5289_s19, %s5285_s18  ;;  %p265_p1 = scmp.eq.s32.totalorder %s264_s25, 0 }
   0x9   : > { %p278_p2 = scmp.eq.s32.totalorder %s5376_s21, 1  ;;  %p283_p3 = scmp.ne.s32.totalorder %s5285_s18, %s5281_s17 }
   0xa   : > { %p284_p4 = scmp.eq.s32.totalorder %s3438_s22, 1  ;;  %p3441_p7 = scmp.ge.s32.totalorder %s5293_s20, 1 }
   0xb   : > { %s5391_s26 = scalar_select %p265_p1, %s5289_s19, %s267_s24  }
   0xc   : > { %p5393_p5 = por %p278_p2, %p277_p0  ;;  %p5397_p6 = por %p284_p4, %p283_p3 }
   0xd   : > { %8263 = sst [smem:[#allocation7_spill]] %s5391_s26  ;;  %p340_p8 = scmp.lt.s32.totalorder %s5293_s20, 3 }
   0xf   : > { %p341_p9 = pnand %p3441_p7, %p340_p8 }
  0x11   : > { %344 = sbr.rel (%p341_p9) target bundleno = 1163 (0x48b), region = 64 }
  0x16   : > { %v3519_v0 = vld [vmem:[%s8198_s1 + $0xf0] sm:$0xf]  ;;  %v4924_v1 = vld [vmem:[%s8198_s1 + $0xf4] sm:$0xf0]  ;;  %v4923_v2 = vld [vmem:[%s8198_s1 + $0xf4] sm:$0xf]  ;;  %s3379_s16 = scalar_lea.hbm %s8208_s11, %s5376_s21 }
  0x17   : > { %v5412_v3 = vor.u32 %v4924_v1, %v3519_v0  ;;  %v3521_v4 = vld [vmem:[%s8198_s1 + $0xf8] sm:$0xf0]  ;;  %v3583_v5 = vld [vmem:[%s8198_s1 + $0x70] sm:$0xf]  ;;  %v4908_v6 = vld [vmem:[%s8198_s1 + $0x74] sm:$0xf0] }
  0x18   : > { %v5423_v7 = vor.u32 %v4923_v2, %v3521_v4  ;;  %v5425_v8 = vor.u32 %v4908_v6, %v3583_v5  ;;  %v4907_v9 = vld [vmem:[%s8198_s1 + $0x74] sm:$0xf]  ;;  %v3585_v10 = vld [vmem:[%s8198_s1 + $0x78] sm:$0xf0]  ;;  %v3511_v11 = vld [vmem:[%s8198_s1 + $0xe0] sm:$0xf] }
  0x19   : > { %500 = vmatpush.bf16.msra.mxu0 %v5412_v3  ;;  %v5437_v12 = vor.u32 %v4907_v9, %v3585_v10  ;;  %v4922_v13 = vld [vmem:[%s8198_s1 + $0xe4] sm:$0xf0]  ;;  %v4921_v14 = vld [vmem:[%s8198_s1 + $0xe4] sm:$0xf]  ;;  %v3513_v15 = vld [vmem:[%s8198_s1 + $0xe8] sm:$0xf0] }
  0x1a   : > { %513 = vmatpush.bf16.msra.mxu1 %v5423_v7  ;;  %606 = vmatpush.bf16.msra.mxu2 %v5425_v8  ;;  %v5450_v16 = vor.u32 %v4922_v13, %v3511_v11  ;;  %v5452_v17 = vor.u32 %v4921_v14, %v3513_v15  ;;  %v3575_v18 = vld [vmem:[%s8198_s1 + $0x60] sm:$0xf]  ;;  %v4906_v19 = vld [vmem:[%s8198_s1 + $0x64] sm:$0xf0]  ;;  %v4905_v20 = vld [vmem:[%s8198_s1 + $0x64] sm:$0xf] }
  0x1b   : > { %619 = vmatpush.bf16.msra.mxu3 %v5437_v12  ;;  %v5464_v21 = vor.u32 %v4906_v19, %v3575_v18  ;;  %v3577_v22 = vld [vmem:[%s8198_s1 + $0x68] sm:$0xf0]  ;;  %v3503_v23 = vld [vmem:[%s8198_s1 + $0xd0] sm:$0xf]  ;;  %v4920_v24 = vld [vmem:[%s8198_s1 + $0xd4] sm:$0xf0] }
  0x1c   : > { %v5475_v25 = vor.u32 %v4905_v20, %v3577_v22  ;;  %v4919_v26 = vld [vmem:[%s8198_s1 + $0xd4] sm:$0xf]  ;;  %v3505_v27 = vld [vmem:[%s8198_s1 + $0xd8] sm:$0xf0]  ;;  %v3567_v28 = vld [vmem:[%s8198_s1 + $0x50] sm:$0xf]  ;;  %v5487_v29 = vor.u32 %v4920_v24, %v3503_v23 }
  0x1d   : > { %501 = vmatpush.bf16.msra.mxu0 %v5450_v16  ;;  %v4904_v30 = vld [vmem:[%s8198_s1 + $0x54] sm:$0xf0]  ;;  %v4903_v31 = vld [vmem:[%s8198_s1 + $0x54] sm:$0xf]  ;;  %v3569_v32 = vld [vmem:[%s8198_s1 + $0x58] sm:$0xf0]  ;;  %v5500_v33 = vor.u32 %v4919_v26, %v3505_v27 }
  0x1e   : > { %514 = vmatpush.bf16.msra.mxu1 %v5452_v17  ;;  %607 = vmatpush.bf16.msra.mxu2 %v5464_v21  ;;  %v5502_v34 = vor.u32 %v4904_v30, %v3567_v28  ;;  %v3495_v35 = vld [vmem:[%s8198_s1 + $0xc0] sm:$0xf]  ;;  %v4918_v36 = vld [vmem:[%s8198_s1 + $0xc4] sm:$0xf0]  ;;  %v4917_v37 = vld [vmem:[%s8198_s1 + $0xc4] sm:$0xf]  ;;  %v5514_v38 = vor.u32 %v4903_v31, %v3569_v32 }
  0x1f   : > { %620 = vmatpush.bf16.msra.mxu3 %v5475_v25  ;;  %v3497_v39 = vld [vmem:[%s8198_s1 + $0xc8] sm:$0xf0]  ;;  %v3559_v40 = vld [vmem:[%s8198_s1 + $0x40] sm:$0xf]  ;;  %v4902_v41 = vld [vmem:[%s8198_s1 + $0x44] sm:$0xf0]  ;;  %v5532_v44 = vor.u32 %v4918_v36, %v3495_v35 }
  0x20   : > { %v4901_v42 = vld [vmem:[%s8198_s1 + $0x44] sm:$0xf]  ;;  %v3561_v43 = vld [vmem:[%s8198_s1 + $0x48] sm:$0xf0]  ;;  %v5536_v45 = vor.u32 %v4917_v37, %v3497_v39  ;;  %v5538_v46 = vor.u32 %v4902_v41, %v3559_v40  ;;  %v3487_v47 = vld [vmem:[%s8198_s1 + $0xb0] sm:$0xf] }
  0x21   : > { %502 = vmatpush.bf16.msra.mxu0 %v5487_v29  ;;  %v4916_v48 = vld [vmem:[%s8198_s1 + $0xb4] sm:$0xf0]  ;;  %v4915_v49 = vld [vmem:[%s8198_s1 + $0xb4] sm:$0xf]  ;;  %v5550_v50 = vor.u32 %v4901_v42, %v3561_v43  ;;  %v3489_v51 = vld [vmem:[%s8198_s1 + $0xb8] sm:$0xf0] }
  0x22   : > { %515 = vmatpush.bf16.msra.mxu1 %v5500_v33  ;;  %608 = vmatpush.bf16.msra.mxu2 %v5502_v34  ;;  %v3551_v52 = vld [vmem:[%s8198_s1 + $0x30] sm:$0xf]  ;;  %v4900_v53 = vld [vmem:[%s8198_s1 + $0x34] sm:$0xf0]  ;;  %v4899_v54 = vld [vmem:[%s8198_s1 + $0x34] sm:$0xf]  ;;  %v5568_v56 = vor.u32 %v4916_v48, %v3487_v47  ;;  %v5572_v57 = vor.u32 %v4915_v49, %v3489_v51 }
  0x23   : > { %621 = vmatpush.bf16.msra.mxu3 %v5514_v38  ;;  %v3553_v55 = vld [vmem:[%s8198_s1 + $0x38] sm:$0xf0]  ;;  %v5574_v58 = vor.u32 %v4900_v53, %v3551_v52  ;;  %v3479_v59 = vld [vmem:[%s8198_s1 + $0xa0] sm:$0xf]  ;;  %v4914_v60 = vld [vmem:[%s8198_s1 + $0xa4] sm:$0xf0] }
  0x24   : > { %v4913_v61 = vld [vmem:[%s8198_s1 + $0xa4] sm:$0xf]  ;;  %v5586_v62 = vor.u32 %v4899_v54, %v3553_v55  ;;  %v3481_v63 = vld [vmem:[%s8198_s1 + $0xa8] sm:$0xf0]  ;;  %v3543_v0 = vld [vmem:[%s8198_s1 + $0x20] sm:$0xf]  ;;  %v5604_v5 = vor.u32 %v4914_v60, %v3479_v59 }
  0x25   : > { %503 = vmatpush.bf16.msra.mxu0 %v5532_v44  ;;  %v4898_v1 = vld [vmem:[%s8198_s1 + $0x24] sm:$0xf0]  ;;  %v4897_v2 = vld [vmem:[%s8198_s1 + $0x24] sm:$0xf]  ;;  %v3545_v4 = vld [vmem:[%s8198_s1 + $0x28] sm:$0xf0]  ;;  %v5608_v6 = vor.u32 %v4913_v61, %v3481_v63 }
  0x26   : > { %516 = vmatpush.bf16.msra.mxu1 %v5536_v45  ;;  %609 = vmatpush.bf16.msra.mxu2 %v5538_v46  ;;  %v5610_v9 = vor.u32 %v4898_v1, %v3543_v0  ;;  %v3471_v10 = vld [vmem:[%s8198_s1 + $0x90] sm:$0xf]  ;;  %v4912_v11 = vld [vmem:[%s8198_s1 + $0x94] sm:$0xf0]  ;;  %v4911_v13 = vld [vmem:[%s8198_s1 + $0x94] sm:$0xf]  ;;  %v5622_v14 = vor.u32 %v4897_v2, %v3545_v4 }
  0x27   : > { %622 = vmatpush.bf16.msra.mxu3 %v5550_v50  ;;  %v3473_v15 = vld [vmem:[%s8198_s1 + $0x98] sm:$0xf0]  ;;  %v3535_v18 = vld [vmem:[%s8198_s1 + $0x10] sm:$0xf]  ;;  %v4896_v19 = vld [vmem:[%s8198_s1 + $0x14] sm:$0xf0]  ;;  %v5640_v23 = vor.u32 %v4912_v11, %v3471_v10 }
  0x28   : > { %v4895_v20 = vld [vmem:[%s8198_s1 + $0x14] sm:$0xf]  ;;  %v3537_v22 = vld [vmem:[%s8198_s1 + $0x18] sm:$0xf0]  ;;  %v3463_v24 = vld [vmem:[%s8198_s1 + $0x80] sm:$0xf]  ;;  %v5650_v27 = vor.u32 %v4911_v13, %v3473_v15  ;;  %v5652_v28 = vor.u32 %v4896_v19, %v3535_v18 }
  0x29   : > { %504 = vmatpush.bf16.msra.mxu0 %v5568_v56  ;;  %v4910_v26 = vld [vmem:[%s8198_s1 + $0x84] sm:$0xf0]  ;;  %v4909_v30 = vld [vmem:[%s8198_s1 + $0x84] sm:$0xf]  ;;  %v3465_v31 = vld [vmem:[%s8198_s1 + $0x88] sm:$0xf0]  ;;  %v5664_v35 = vor.u32 %v4895_v20, %v3537_v22 }
  0x2a   : > { %517 = vmatpush.bf16.msra.mxu1 %v5572_v57  ;;  %610 = vmatpush.bf16.msra.mxu2 %v5574_v58  ;;  %v3527_v32 = vld [vmem:[%s8198_s1] sm:$0xf]  ;;  %v4894_v36 = vld [vmem:[%s8198_s1 + $0x4] sm:$0xf0]  ;;  %v4893_v37 = vld [vmem:[%s8198_s1 + $0x4] sm:$0xf]  ;;  %v5685_v43 = vor.u32 %v4910_v26, %v3463_v24  ;;  %v5698_v51 = vor.u32 %v4909_v30, %v3465_v31 }
  0x2b   : > { %623 = vmatpush.bf16.msra.mxu3 %v5586_v62  ;;  %v3529_v39 = vld [vmem:[%s8198_s1 + $0x8] sm:$0xf0]  ;;  %v3664_v40 = vld [vmem:[%s8198_s1 + $0x170] sm:$0xf]  ;;  %v4940_v41 = vld [vmem:[%s8198_s1 + $0x174] sm:$0xf0]  ;;  %v5700_v52 = vor.u32 %v4894_v36, %v3527_v32 }
  0x2c   : > { %v4939_v42 = vld [vmem:[%s8198_s1 + $0x174] sm:$0xf]  ;;  %v3666_v47 = vld [vmem:[%s8198_s1 + $0x178] sm:$0xf0]  ;;  %v3745_v48 = vld [vmem:[%s8198_s1 + $0x1f0] sm:$0xf]  ;;  %v5709_v55 = vor.u32 %v4893_v37, %v3529_v39  ;;  %v5711_v59 = vor.u32 %v4940_v41, %v3664_v40 }
  0x2d   : > { %505 = vmatpush.bf16.msra.mxu0 %v5604_v5  ;;  %v4956_v49 = vld [vmem:[%s8198_s1 + $0x1f4] sm:$0xf0]  ;;  %8266 = vst [vmem:[#allocation8_spill] sm:$0xff] %v5700_v52  ;;  %v4955_v53 = vld [vmem:[%s8198_s1 + $0x1f4] sm:$0xf]  ;;  %v5713_v60 = vor.u32 %v4939_v42, %v3666_v47  ;;  %p379_p10 = scmp.lt.s32.totalorder %s5376_s21, 1 }
  0x2e   : > { %518 = vmatpush.bf16.msra.mxu1 %v5608_v6  ;;  %611 = vmatpush.bf16.msra.mxu2 %v5610_v9  ;;  %v3747_v54 = vld [vmem:[%s8198_s1 + $0x1f8] sm:$0xf0]  ;;  %8267 = vst [vmem:[#allocation9_spill] sm:$0xff] %v5709_v55  ;;  %v5715_v61 = vor.u32 %v4956_v49, %v3745_v48  ;;  %v3656_v63 = vld [vmem:[%s8198_s1 + $0x160] sm:$0xf]  ;;  %s8272_s0 = sld [smem:[#allocation32_spill]] }
  0x2f   : > { %624 = vmatpush.bf16.msra.mxu3 %v5622_v14  ;;  %v4938_v0 = vld [vmem:[%s8198_s1 + $0x164] sm:$0xf0]  ;;  %v4937_v1 = vld [vmem:[%s8198_s1 + $0x164] sm:$0xf]  ;;  %v5727_v2 = vor.u32 %v4955_v53, %v3747_v54  ;;  %v3658_v4 = vld [vmem:[%s8198_s1 + $0x168] sm:$0xf0] }
  0x30   : > { %8268 = vst [vmem:[#allocation10_spill] sm:$0xff] %v5715_v61  ;;  %v3737_v10 = vld [vmem:[%s8198_s1 + $0x1e0] sm:$0xf]  ;;  %v4954_v11 = vld [vmem:[%s8198_s1 + $0x1e4] sm:$0xf0]  ;;  %v5749_v18 = vor.u32 %v4938_v0, %v3656_v63  ;;  %v5756_v20 = vor.u32 %v4937_v1, %v3658_v4  ;;  %s380_s24 = scalar_select %p379_p10, %s5376_s21, 1 }
  0x31   : > { %506 = vmatpush.bf16.msra.mxu0 %v5640_v23  ;;  %8269 = vst [vmem:[#allocation11_spill] sm:$0xff] %v5727_v2  ;;  %v4953_v13 = vld [vmem:[%s8198_s1 + $0x1e4] sm:$0xf]  ;;  %v3739_v15 = vld [vmem:[%s8198_s1 + $0x1e8] sm:$0xf0]  ;;  %v5758_v22 = vor.u32 %v4954_v11, %v3737_v10  ;;  %vm1179_vm0 = vcmask 1043456  }
  0x32   : > { %519 = vmatpush.bf16.msra.mxu1 %v5650_v27  ;;  %612 = vmatpush.bf16.msra.mxu2 %v5652_v28  ;;  %v3648_v19 = vld [vmem:[%s8198_s1 + $0x150] sm:$0xf]  ;;  %v4936_v24 = vld [vmem:[%s8198_s1 + $0x154] sm:$0xf0]  ;;  %v4935_v26 = vld [vmem:[%s8198_s1 + $0x154] sm:$0xf]  ;;  %v5768_v30 = vor.u32 %v4953_v13, %v3739_v15 }
  0x33   : > { %625 = vmatpush.bf16.msra.mxu3 %v5664_v35  ;;  %8270 = vst [vmem:[#allocation12_spill] sm:$0xff] %v5758_v22  ;;  %v3650_v31 = vld [vmem:[%s8198_s1 + $0x158] sm:$0xf0]  ;;  %v3729_v32 = vld [vmem:[%s8198_s1 + $0x1d0] sm:$0xf]  ;;  %s4892_s26 = sshll.u32 %s380_s24, 4  ;;  %v5786_v40 = vor.u32 %v4936_v24, %v3648_v19 }
  0x34   : > { %8271 = vst [vmem:[#allocation13_spill] sm:$0xff] %v5768_v30  ;;  %v4952_v36 = vld [vmem:[%s8198_s1 + $0x1d4] sm:$0xf0]  ;;  %v4951_v37 = vld [vmem:[%s8198_s1 + $0x1d4] sm:$0xf]  ;;  %s5797_s15 = scalar_lea.vmem %s8272_s0, %s4892_s26  ;;  %v5801_v47 = vor.u32 %v4935_v26, %v3650_v31  ;;  %s377_s24 = sand.u32 1, %s5285_s18  }
  0x35   : > { %507 = vmatpush.bf16.msra.mxu0 %v5685_v43  ;;  %v3731_v39 = vld [vmem:[%s8198_s1 + $0x1d8] sm:$0xf0]  ;;  %v3640_v41 = vld [vmem:[%s8198_s1 + $0x140] sm:$0xf]  ;;  %v4934_v42 = vld [vmem:[%s8198_s1 + $0x144] sm:$0xf0]  ;;  %v5803_v48 = vor.u32 %v4952_v36, %v3729_v32 }
  0x36   : > { %520 = vmatpush.bf16.msra.mxu1 %v5698_v51  ;;  %613 = vmatpush.bf16.msra.mxu2 %v5700_v52  ;;  %v4933_v49 = vld [vmem:[%s8198_s1 + $0x144] sm:$0xf]  ;;  %v5809_v53 = vld [vmem:[%s5797_s15] sm:$0xf]  ;;  %v5815_v63 = vor.u32 %v4951_v37, %v3731_v39  ;;  %v3642_v0 = vld [vmem:[%s8198_s1 + $0x148] sm:$0xf0]  ;;  %v5836_v13 = vor.u32 %v4934_v42, %v3640_v41 }
  0x37   : > { %626 = vmatpush.bf16.msra.mxu3 %v5709_v55  ;;  %8273 = vst [vmem:[#allocation14_spill] sm:$0xff] %v5803_v48  ;;  %v5812_v54 = vld [vmem:[%s5797_s15 + $0x4] sm:$0xf]  ;;  %v3721_v1 = vld [vmem:[%s8198_s1 + $0x1c0] sm:$0xf]  ;;  %v5841_v15 = vor.u32 %v4933_v49, %v3642_v0  ;;  %s378_s26 = scalar_lea.vmem [#allocation3], %s377_s24 }
  0x38   : > { %8274 = vst [vmem:[#allocation15_spill] sm:$0xff] %v5812_v54  ;;  %v4950_v4 = vld [vmem:[%s8198_s1 + $0x1c4] sm:$0xf0]  ;;  %v4949_v10 = vld [vmem:[%s8198_s1 + $0x1c4] sm:$0xf]  ;;  %508 = vmatmul.bf16.vlgmr.msra.gmra.mxu0 %v5812_v54  ;;  %s3381_s25 = sshll.u32 %s378_s26, 4  ;;  %s3382_s25 = int_to_ptr.vmem [resolvable:$true] %s3381_s25 }
  0x39   : > { %731 = vmatpush.bf16.msrb.mxu0 %v5711_v59  ;;  %8275 = vst [vmem:[#allocation16_spill] sm:$0xff] %v5815_v63  ;;  %614 = vmatmul.bf16.vlgmr.msra.gmra.mxu2 %v5809_v53  ;;  %v3723_v11 = vld [vmem:[%s8198_s1 + $0x1c8] sm:$0xf0]  ;;  %v5843_v19 = vor.u32 %v4950_v4, %v3721_v1  ;;  %v3632_v24 = vld [vmem:[%s8198_s1 + $0x130] sm:$0xf]  ;;  %s3383_s29 = sshll.u32 %s3379_s16, 4  ;;  %s3384_s29 = int_to_ptr.hbm [resolvable:$true] %s3383_s29 }
  0x3a   : > { %744 = vmatpush.bf16.msrb.mxu1 %v5713_v60  ;;  %858 = vmatpush.bf16.msrb.mxu2 %v5715_v61  ;;  %v4932_v26 = vld [vmem:[%s8198_s1 + $0x134] sm:$0xf0]  ;;  %v4931_v31 = vld [vmem:[%s8198_s1 + $0x134] sm:$0xf]  ;;  %v5855_v32 = vor.u32 %v4949_v10, %v3723_v11  ;;  %v3634_v36 = vld [vmem:[%s8198_s1 + $0x138] sm:$0xf0] }
  0x3b   : > { %871 = vmatpush.bf16.msrb.mxu3 %v5727_v2  ;;  %521 = vmatmul.bf16.vlgmr.msra.gmra.mxu1 %v5812_v54  ;;  %8276 = vst [vmem:[#allocation17_spill] sm:$0xff] %v5843_v19  ;;  %v3713_v37 = vld [vmem:[%s8198_s1 + $0x1b0] sm:$0xf]  ;;  %v4948_v39 = vld [vmem:[%s8198_s1 + $0x1b4] sm:$0xf0]  ;;  %v5873_v49 = vor.u32 %v4932_v26, %v3632_v24  ;;  %v5877_v0 = vor.u32 %v4931_v31, %v3634_v36  ;;  %vm3368_vm3 = vcmask 73728  }
  0x3c   : > { %627 = vmatmul.bf16.vlgmr.msra.gmra.mxu3 %v5809_v53  ;;  %8277 = vst [vmem:[#allocation18_spill] sm:$0xff] %v5855_v32  ;;  %v4947_v41 = vld [vmem:[%s8198_s1 + $0x1b4] sm:$0xf]  ;;  %v3715_v42 = vld [vmem:[%s8198_s1 + $0x1b8] sm:$0xf0]  ;;  %v5879_v1 = vor.u32 %v4948_v39, %v3713_v37  ;;  %s3371_s30 = scalar_lea.sflag [#allocation4], %s377_s24 }
  0x3d   : > { %732 = vmatpush.bf16.msrb.mxu0 %v5749_v18  ;;  %v3624_v4 = vld [vmem:[%s8198_s1 + $0x120] sm:$0xf]  ;;  %v4930_v10 = vld [vmem:[%s8198_s1 + $0x124] sm:$0xf0]  ;;  %v4929_v11 = vld [vmem:[%s8198_s1 + $0x124] sm:$0xf]  ;;  %v5891_v24 = vor.u32 %v4947_v41, %v3715_v42 }
  0x3e   : > { %745 = vmatpush.bf16.msrb.mxu1 %v5756_v20  ;;  %859 = vmatpush.bf16.msrb.mxu2 %v5758_v22  ;;  %8278 = vst [vmem:[#allocation19_spill] sm:$0xff] %v5879_v1  ;;  %v3626_v26 = vld [vmem:[%s8198_s1 + $0x128] sm:$0xf0]  ;;  %v3705_v31 = vld [vmem:[%s8198_s1 + $0x1a0] sm:$0xf]  ;;  %v5909_v41 = vor.u32 %v4930_v10, %v3624_v4  ;;  %s5245_s12 = sshra.s32 %s3384_s29, 4  ;;  %s5246_s12 = int_to_ptr.hbm [resolvable:$true] %s5245_s12 }
  0x3f   : > { %872 = vmatpush.bf16.msrb.mxu3 %v5768_v30  ;;  %8279 = vst [vmem:[#allocation20_spill] sm:$0xff] %v5891_v24  ;;  %v4946_v36 = vld [vmem:[%s8198_s1 + $0x1a4] sm:$0xf0]  ;;  %v4945_v37 = vld [vmem:[%s8198_s1 + $0x1a4] sm:$0xf]  ;;  %v5913_v42 = vor.u32 %v4929_v11, %v3626_v26  ;;  %s5247_s13 = scalar_lea.hbm %s5246_s12, 1  ;;  %p5252_p0 = scmp.lt.s32.totalorder %s5246_s12, %s8208_s11 }
  0x40   : > { %v3707_v39 = vld [vmem:[%s8198_s1 + $0x1a8] sm:$0xf0]  ;;  %v4927_v4 = vld [vmem:[%s8198_s1 + $0x114] sm:$0xf]  ;;  %v3618_v11 = vld [vmem:[%s8198_s1 + $0x118] sm:$0xf0]  ;;  %p5248_p11 = scmp.ne.s32.totalorder %s5246_s12, %s5247_s13 }
  0x41   : > { %733 = vmatpush.bf16.msrb.mxu0 %v5786_v40  ;;  %v5927_v10 = vor.u32 %v4945_v37, %v3707_v39  ;;  %v3697_v26 = vld [vmem:[%s8198_s1 + $0x190] sm:$0xf]  ;;  %v3699_v37 = vld [vmem:[%s8198_s1 + $0x198] sm:$0xf0]  ;;  %v3608_v39 = vld [vmem:[%s8198_s1 + $0x100] sm:$0xf]  ;;  %v5961_v22 = vor.u32 %v4927_v4, %v3618_v11 }
  0x42   : > { %746 = vmatpush.bf16.msrb.mxu1 %v5801_v47  ;;  %860 = vmatpush.bf16.msrb.mxu2 %v5803_v48  ;;  %v4925_v48 = vld [vmem:[%s8198_s1 + $0x104] sm:$0xf]  ;;  %v3610_v30 = vld [vmem:[%s8198_s1 + $0x108] sm:$0xf0]  ;;  %v4942_v54 = vld [vmem:[%s8198_s1 + $0x184] sm:$0xf0]  ;;  %p5249_p12 = pnand %p5248_p11, %p5393_p5 }
  0x43   : > { %873 = vmatpush.bf16.msrb.mxu3 %v5815_v63  ;;  %v4928_v63 = vld [vmem:[%s8198_s1 + $0x114] sm:$0xf0]  ;;  %8281 = vst [vmem:[#allocation22_spill] sm:$0xff] %v5927_v10  ;;  %v4941_v2 = vld [vmem:[%s8198_s1 + $0x184] sm:$0xf]  ;;  %s5251_s0 = scalar_lea.hbm %s8208_s11, 2 }
  0x44   : > { %v3691_v4 = vld [vmem:[%s8198_s1 + $0x188] sm:$0xf0]  ;;  %v3825_v11 = vld [vmem:[%s8198_s1 + $0x270] sm:$0xf]  ;;  %v3817_v52 = vld [vmem:[%s8198_s1 + $0x260] sm:$0xf]  ;;  %p5250_p13 = pneg %p5249_p12  ;;  %p5253_p1 = scmp.lt.s32.totalorder %s5251_s0, %s5247_s13 }
  0x45   : > { %734 = vmatpush.bf16.msrb.mxu0 %v5836_v13  ;;  %vm1180_vm1 = vsmask.f32 3328 }
  0x46   : > { %747 = vmatpush.bf16.msrb.mxu1 %v5841_v15  ;;  %861 = vmatpush.bf16.msrb.mxu2 %v5843_v19  ;;  %v3616_v19 = vld [vmem:[%s8198_s1 + $0x110] sm:$0xf]  ;;  %vm7107_vm2 = vmand %vm1179_vm0, %vm1180_vm1  ;;  %p5254_p2 = por %p5253_p1, %p5252_p0 }
  0x47   : > { %874 = vmatpush.bf16.msrb.mxu3 %v5855_v32  ;;  %v5915_v32 = vor.u32 %v4946_v36, %v3705_v31  ;;  %v4944_v31 = vld [vmem:[%s8198_s1 + $0x194] sm:$0xf0]  ;;  %v4943_v36 = vld [vmem:[%s8198_s1 + $0x194] sm:$0xf] }
  0x48   : > { %v5975_v61 = vor.u32 %v4943_v36, %v3699_v37  ;;  %v4971_v36 = vld [vmem:[%s8198_s1 + $0x274] sm:$0xf]  ;;  %v3827_v37 = vld [vmem:[%s8198_s1 + $0x278] sm:$0xf0]  ;;  %p5255_p3 = pnand %p5254_p2, %p5250_p13 }
  0x49   : > { %735 = vmatpush.bf16.msrb.mxu0 %v5873_v49  ;;  %8280 = vst [vmem:[#allocation21_spill] sm:$0xff] %v5915_v32  ;;  %v6006_v55 = vor.u32 %v4971_v36, %v3827_v37  ;;  %v4968_v36 = vld [vmem:[%s8198_s1 + $0x254] sm:$0xf0] }
  0x4a   : > { %748 = vmatpush.bf16.msrb.mxu1 %v5877_v0  ;;  %862 = vmatpush.bf16.msrb.mxu2 %v5879_v1  ;;  %v4926_v1 = vld [vmem:[%s8198_s1 + $0x104] sm:$0xf0] }
  0x4b   : > { %875 = vmatpush.bf16.msrb.mxu3 %v5891_v24  ;;  %v5948_v24 = vor.u32 %v4928_v63, %v3616_v19  ;;  %v5963_v63 = vor.u32 %v4944_v31, %v3697_v26  ;;  %v3689_v19 = vld [vmem:[%s8198_s1 + $0x180] sm:$0xf]  ;;  %v4972_v26 = vld [vmem:[%s8198_s1 + $0x274] sm:$0xf0]  ;;  %v5987_v31 = vor.u32 %v4926_v1, %v3608_v39  ;;  %v6002_v1 = vor.u32 %v4941_v2, %v3691_v4  ;;  %v3819_v2 = vld [vmem:[%s8198_s1 + $0x268] sm:$0xf0] }
  0x4c   : > { %v6004_v39 = vor.u32 %v4972_v26, %v3825_v11  ;;  %v6031_v4 = vld [vmem:[%s5797_s15 + $0x8] sm:$0xf]  ;;  %v3809_v26 = vld [vmem:[%s8198_s1 + $0x250] sm:$0xf] }
  0x4d   : > { %736 = vmatpush.bf16.msrb.mxu0 %v5909_v41  ;;  %8282 = vst [vmem:[#allocation23_spill] sm:$0xff] %v6002_v1  ;;  %v6055_v37 = vor.u32 %v4968_v36, %v3809_v26 }
  0x4e   : > { %749 = vmatpush.bf16.msrb.mxu1 %v5913_v42  ;;  %863 = vmatpush.bf16.msrb.mxu2 %v5915_v32  ;;  %v5999_v32 = vor.u32 %v4942_v54, %v3689_v19  ;;  %v6024_v54 = vld [vmem:[%s5797_s15 + $0xc] sm:$0xf] }
  0x4f   : > { %876 = vmatpush.bf16.msrb.mxu3 %v5927_v10  ;;  %v5997_v10 = vor.u32 %v4925_v48, %v3610_v30  ;;  %v4970_v30 = vld [vmem:[%s8198_s1 + $0x264] sm:$0xf0]  ;;  %v4969_v48 = vld [vmem:[%s8198_s1 + $0x264] sm:$0xf] }
  0x50   : > { %v6028_v19 = vor.u32 %v4970_v30, %v3817_v52  ;;  %v6035_v11 = vor.u32 %v4969_v48, %v3819_v2  ;;  %v4967_v52 = vld [vmem:[%s8198_s1 + $0x254] sm:$0xf]  ;;  %v3801_v30 = vld [vmem:[%s8198_s1 + $0x240] sm:$0xf]  ;;  %v4966_v48 = vld [vmem:[%s8198_s1 + $0x244] sm:$0xf0] }
  0x51   : > { %737 = vmatpush.bf16.msrb.mxu0 %v5948_v24  ;;  %v4965_v2 = vld [vmem:[%s8198_s1 + $0x244] sm:$0xf]  ;;  %v6075_v26 = vor.u32 %v4966_v48, %v3801_v30  ;;  %v904_v30 = vunpack.c.l.b16 %v5809_v53 }
  0x52   : > { %750 = vmatpush.bf16.msrb.mxu1 %v5961_v22  ;;  %864 = vmatpush.bf16.msrb.mxu2 %v5963_v63  ;;  %v4961_v53 = vld [vmem:[%s8198_s1 + $0x224] sm:$0xf] }
  0x53   : > { %877 = vmatpush.bf16.msrb.mxu3 %v5975_v61 }
  0x55   : > { %738 = vmatpush.bf16.msrb.mxu0 %v5987_v31 }
  0x56   : > { %751 = vmatpush.bf16.msrb.mxu1 %v5997_v10  ;;  %865 = vmatpush.bf16.msrb.mxu2 %v5999_v32 }
  0x57   : > { %878 = vmatpush.bf16.msrb.mxu3 %v6002_v1 }
  0x58   : > { %739 = vmatmul.bf16.vlgmr.msrb.gmra.mxu0 %v6031_v4 }
  0x59   : > { %994 = vmatpush.bf16.msra.mxu0 %v6004_v39  ;;  %866 = vmatmul.bf16.vlgmr.msrb.gmra.mxu2 %v6024_v54 }
  0x5a   : > { %1007 = vmatpush.bf16.msra.mxu1 %v6006_v55  ;;  %1022 = vmatpush.bf16.msra.mxu2 %v5412_v3  ;;  %v3811_v3 = vld [vmem:[%s8198_s1 + $0x258] sm:$0xf0] }
  0x5b   : > { %1035 = vmatpush.bf16.msra.mxu3 %v5423_v7  ;;  %752 = vmatmul.bf16.vlgmr.msrb.gmra.mxu1 %v6031_v4  ;;  %v6059_v7 = vor.u32 %v4967_v52, %v3811_v3  ;;  %v4964_v52 = vld [vmem:[%s8198_s1 + $0x234] sm:$0xf0]  ;;  %v4963_v3 = vld [vmem:[%s8198_s1 + $0x234] sm:$0xf] }
  0x5c   : > { %879 = vmatmul.bf16.vlgmr.msrb.gmra.mxu3 %v6024_v54 }
  0x5d   : > { %995 = vmatpush.bf16.msra.mxu0 %v6028_v19 }
  0x5e   : > { %1008 = vmatpush.bf16.msra.mxu1 %v6035_v11  ;;  %1023 = vmatpush.bf16.msra.mxu2 %v5450_v16  ;;  %v3803_v16 = vld [vmem:[%s8198_s1 + $0x248] sm:$0xf0] }
  0x5f   : > { %1036 = vmatpush.bf16.msra.mxu3 %v5452_v17  ;;  %v6079_v36 = vor.u32 %v4965_v2, %v3803_v16  ;;  %v3793_v17 = vld [vmem:[%s8198_s1 + $0x230] sm:$0xf]  ;;  %v4962_v16 = vld [vmem:[%s8198_s1 + $0x224] sm:$0xf0] }
  0x60   : > { %v6096_v48 = vor.u32 %v4964_v52, %v3793_v17  ;;  %v905_v17 = vpack.c.b16 %v904_v30, %v904_v30  ;;  %v4959_v30 = vld [vmem:[%s8198_s1 + $0x214] sm:$0xf] }
  0x61   : > { %996 = vmatpush.bf16.msra.mxu0 %v6055_v37 }
  0x62   : > { %1009 = vmatpush.bf16.msra.mxu1 %v6059_v7  ;;  %1024 = vmatpush.bf16.msra.mxu2 %v5487_v29  ;;  %v3795_v29 = vld [vmem:[%s8198_s1 + $0x238] sm:$0xf0] }
  0x63   : > { %1037 = vmatpush.bf16.msra.mxu3 %v5500_v33  ;;  %v6100_v2 = vor.u32 %v4963_v3, %v3795_v29  ;;  %v3785_v33 = vld [vmem:[%s8198_s1 + $0x220] sm:$0xf]  ;;  %v4960_v29 = vld [vmem:[%s8198_s1 + $0x214] sm:$0xf0] }
  0x64   : > { %v6116_v52 = vor.u32 %v4962_v16, %v3785_v33  ;;  %v909_v33 = vshll.u32 %v905_v17, 16 }
  0x65   : > { %997 = vmatpush.bf16.msra.mxu0 %v6075_v26 }
  0x66   : > { %1010 = vmatpush.bf16.msra.mxu1 %v6079_v36  ;;  %1025 = vmatpush.bf16.msra.mxu2 %v5532_v44  ;;  %v3787_v44 = vld [vmem:[%s8198_s1 + $0x228] sm:$0xf0] }
  0x67   : > { %1038 = vmatpush.bf16.msra.mxu3 %v5536_v45  ;;  %v6120_v3 = vor.u32 %v4961_v53, %v3787_v44  ;;  %v3777_v45 = vld [vmem:[%s8198_s1 + $0x210] sm:$0xf]  ;;  %v4958_v44 = vld [vmem:[%s8198_s1 + $0x204] sm:$0xf0] }
  0x68   : > { %v6136_v16 = vor.u32 %v4960_v29, %v3777_v45  ;;  %v4957_v45 = vld [vmem:[%s8198_s1 + $0x204] sm:$0xf]  ;;  %v907_v29 = vshrl.u32 %v905_v17, 16  ;;  %v3955_v17 = vld [vmem:[%s8198_s1 + $0x50] sm:$0xf] }
  0x69   : > { %998 = vmatpush.bf16.msra.mxu0 %v6096_v48 }
  0x6a   : > { %1011 = vmatpush.bf16.msra.mxu1 %v6100_v2  ;;  %1026 = vmatpush.bf16.msra.mxu2 %v5568_v56  ;;  %v3779_v56 = vld [vmem:[%s8198_s1 + $0x218] sm:$0xf0] }
  0x6b   : > { %1039 = vmatpush.bf16.msra.mxu3 %v5572_v57  ;;  %v6140_v53 = vor.u32 %v4959_v30, %v3779_v56  ;;  %v3769_v57 = vld [vmem:[%s8198_s1 + $0x200] sm:$0xf]  ;;  %v911_v30 = vrot.slane %v909_v33, 1  ;;  %v3957_v33 = vld [vmem:[%s8198_s1 + $0x58] sm:$0xf0] }
  0x6c   : > { %v6156_v56 = vor.u32 %v4958_v44, %v3769_v57  ;;  %v3883_v44 = vld [vmem:[%s8198_s1 + $0xc0] sm:$0xf] }
  0x6d   : > { %999 = vmatpush.bf16.msra.mxu0 %v6116_v52 }
  0x6e   : > { %1012 = vmatpush.bf16.msra.mxu1 %v6120_v3  ;;  %1027 = vmatpush.bf16.msra.mxu2 %v5604_v5  ;;  %v3771_v5 = vld [vmem:[%s8198_s1 + $0x208] sm:$0xf0] }
  0x6f   : > { %1040 = vmatpush.bf16.msra.mxu3 %v5608_v6  ;;  %v6160_v1 = vor.u32 %v4957_v45, %v3771_v5  ;;  %v6164_v6 = vor.u32 %v911_v30, %v907_v29  ;;  %v4998_v45 = vld [vmem:[%s8198_s1 + $0xc4] sm:$0xf0]  ;;  %v4997_v5 = vld [vmem:[%s8198_s1 + $0xc4] sm:$0xf]  ;;  %v3885_v30 = vld [vmem:[%s8198_s1 + $0xc8] sm:$0xf0] }
  0x71   : > { %1000 = vmatpush.bf16.msra.mxu0 %v6136_v16 }
  0x72   : > { %1013 = vmatpush.bf16.msra.mxu1 %v6140_v53  ;;  %1028 = vmatpush.bf16.msra.mxu2 %v5640_v23  ;;  %v8294_v23 = vld [vmem:[#allocation19_spill] sm:$0xff] }
  0x73   : > { %1041 = vmatpush.bf16.msra.mxu3 %v5650_v27  ;;  %v8295_v27 = vld [vmem:[#allocation20_spill] sm:$0xff] }
  0x75   : > { %1001 = vmatpush.bf16.msra.mxu0 %v6156_v56 }
  0x76   : > { %1014 = vmatpush.bf16.msra.mxu1 %v6160_v1  ;;  %1029 = vmatpush.bf16.msra.mxu2 %v5685_v43  ;;  %v8297_v43 = vld [vmem:[#allocation22_spill] sm:$0xff] }
  0x77   : > { %1042 = vmatpush.bf16.msra.mxu3 %v5698_v51 }
  0x78   : > { %1002 = vmatmul.bf16.vlgmr.msra.gmra.mxu0 %v6164_v6 }
  0x79   : > { %1048 = vmatpush.bf16.msrb.mxu0 %v5425_v8  ;;  %1015 = vmatmul.bf16.vlgmr.msra.gmra.mxu1 %v6164_v6  ;;  %v8283_v8 = vld [vmem:[#allocation8_spill] sm:$0xff] }
  0x7a   : > { %1061 = vmatpush.bf16.msrb.mxu1 %v5437_v12  ;;  %1074 = vmatpush.bf16.msrb.mxu2 %v5711_v59  ;;  %v8284_v12 = vld [vmem:[#allocation9_spill] sm:$0xff] }
  0x7b   : > { %1087 = vmatpush.bf16.msrb.mxu3 %v5713_v60  ;;  %1030 = vmatmul.bf16.vlgmr.msra.gmra.mxu2 %v6031_v4  ;;  %v5004_v59 = vld [vmem:[%s8198_s1 + $0xf4] sm:$0xf0]  ;;  %v5003_v60 = vld [vmem:[%s8198_s1 + $0xf4] sm:$0xf] }
  0x7c   : > { %1043 = vmatmul.bf16.vlgmr.msra.gmra.mxu3 %v6031_v4  ;;  %v3965_v4 = vld [vmem:[%s8198_s1 + $0x68] sm:$0xf0] }
  0x7d   : > { %1049 = vmatpush.bf16.msrb.mxu0 %v5464_v21  ;;  %v8285_v21 = vld [vmem:[#allocation10_spill] sm:$0xff] }
  0x7e   : > { %1062 = vmatpush.bf16.msrb.mxu1 %v5475_v25  ;;  %1075 = vmatpush.bf16.msrb.mxu2 %v5749_v18  ;;  %v8286_v25 = vld [vmem:[#allocation11_spill] sm:$0xff]  ;;  %v3909_v18 = vld [vmem:[%s8198_s1 + $0xf8] sm:$0xf0] }
  0x7f   : > { %1088 = vmatpush.bf16.msrb.mxu3 %v5756_v20  ;;  %v3971_v20 = vld [vmem:[%s8198_s1 + $0x70] sm:$0xf] }
  0x81   : > { %1050 = vmatpush.bf16.msrb.mxu0 %v5502_v34  ;;  %v8287_v34 = vld [vmem:[#allocation15_spill] sm:$0xff] }
  0x82   : > { %1063 = vmatpush.bf16.msrb.mxu1 %v5514_v38  ;;  %1076 = vmatpush.bf16.msrb.mxu2 %v5786_v40  ;;  %v8288_v38 = vld [vmem:[#allocation12_spill] sm:$0xff]  ;;  %v4987_v40 = vld [vmem:[%s8198_s1 + $0x74] sm:$0xf] }
  0x83   : > { %1089 = vmatpush.bf16.msrb.mxu3 %v5801_v47  ;;  %v3973_v47 = vld [vmem:[%s8198_s1 + $0x78] sm:$0xf0] }
  0x85   : > { %1051 = vmatpush.bf16.msrb.mxu0 %v5538_v46  ;;  %v8289_v46 = vld [vmem:[#allocation13_spill] sm:$0xff] }
  0x86   : > { %1064 = vmatpush.bf16.msrb.mxu1 %v5550_v50  ;;  %1077 = vmatpush.bf16.msrb.mxu2 %v5836_v13  ;;  %v8290_v50 = vld [vmem:[#allocation14_spill] sm:$0xff] }
  0x87   : > { %1090 = vmatpush.bf16.msrb.mxu3 %v5841_v15 }
  0x89   : > { %1052 = vmatpush.bf16.msrb.mxu0 %v5574_v58  ;;  %v8291_v58 = vld [vmem:[#allocation16_spill] sm:$0xff] }
  0x8a   : > { %1065 = vmatpush.bf16.msrb.mxu1 %v5586_v62  ;;  %1078 = vmatpush.bf16.msrb.mxu2 %v5873_v49  ;;  %v8292_v62 = vld [vmem:[#allocation17_spill] sm:$0xff] }
  0x8b   : > { %1091 = vmatpush.bf16.msrb.mxu3 %v5877_v0  ;;  %v6264_v0 = vor.u32 %v5003_v60, %v3909_v18  ;;  %v4993_v60 = vld [vmem:[%s8198_s1 + $0xa4] sm:$0xf] }
  0x8d   : > { %1053 = vmatpush.bf16.msrb.mxu0 %v5610_v9  ;;  %v8293_v9 = vld [vmem:[#allocation18_spill] sm:$0xff] }
  0x8e   : > { %1066 = vmatpush.bf16.msrb.mxu1 %v5622_v14  ;;  %1079 = vmatpush.bf16.msrb.mxu2 %v5909_v41  ;;  %v1131_v14 = vunpack.c.l.b16 %v8287_v34  ;;  %v5002_v41 = vld [vmem:[%s8198_s1 + $0xe4] sm:$0xf0] }
  0x8f   : > { %1092 = vmatpush.bf16.msrb.mxu3 %v5913_v42  ;;  %v5001_v42 = vld [vmem:[%s8198_s1 + $0xe4] sm:$0xf] }
  0x91   : > { %1054 = vmatpush.bf16.msrb.mxu0 %v5652_v28  ;;  %v1132_v28 = vpack.c.b16 %v1131_v14, %v1131_v14  ;;  %v4980_v14 = vld [vmem:[%s8198_s1 + $0x34] sm:$0xf0] }
  0x92   : > { %1067 = vmatpush.bf16.msrb.mxu1 %v5664_v35  ;;  %1080 = vmatpush.bf16.msrb.mxu2 %v5948_v24  ;;  %v8296_v35 = vld [vmem:[#allocation21_spill] sm:$0xff] }
  0x93   : > { %1093 = vmatpush.bf16.msrb.mxu3 %v5961_v22  ;;  %v1136_v51 = vshll.u32 %v1132_v28, 16  ;;  %v4988_v22 = vld [vmem:[%s8198_s1 + $0x74] sm:$0xf0]  ;;  %v1134_v13 = vshrl.u32 %v1132_v28, 16 }
  0x94   : > { %v6266_v24 = vor.u32 %v4988_v22, %v3971_v20  ;;  %v3869_v22 = vld [vmem:[%s8198_s1 + $0xa8] sm:$0xf0] }
  0x95   : > { %1055 = vmatpush.bf16.msrb.mxu0 %v8283_v8  ;;  %v1138_v15 = vrot.slane %v1136_v51, 1  ;;  %v4981_v8 = vld [vmem:[%s8198_s1 + $0x44] sm:$0xf] }
  0x96   : > { %1068 = vmatpush.bf16.msrb.mxu1 %v8284_v12  ;;  %1081 = vmatpush.bf16.msrb.mxu2 %v5987_v31  ;;  %v3963_v31 = vld [vmem:[%s8198_s1 + $0x60] sm:$0xf]  ;;  %v3949_v12 = vld [vmem:[%s8198_s1 + $0x48] sm:$0xf0] }
  0x97   : > { %1094 = vmatpush.bf16.msrb.mxu3 %v5997_v10  ;;  %v6278_v10 = vor.u32 %v4987_v40, %v3973_v47  ;;  %v3931_v40 = vld [vmem:[%s8198_s1 + $0x20] sm:$0xf]  ;;  %v4978_v47 = vld [vmem:[%s8198_s1 + $0x24] sm:$0xf0] }
  0x98   : > { %1056 = vmatmul.bf16.vlgmr.msrb.gmra.mxu0 %v8287_v34 }
  0x99   : > { %1102 = vmatpush.bf16.msra.mxu0 %v8285_v21  ;;  %1082 = vmatmul.bf16.vlgmr.msrb.gmra.mxu2 %v6024_v54  ;;  %v6373_v21 = vor.u32 %v4998_v45, %v3883_v44  ;;  %v4990_v44 = vld [vmem:[%s8198_s1 + $0x84] sm:$0xf0] }
  0x9a   : > { %1115 = vmatpush.bf16.msra.mxu1 %v8286_v25  ;;  %1141 = vmatpush.bf16.msra.mxu2 %v6004_v39  ;;  %v4986_v39 = vld [vmem:[%s8198_s1 + $0x64] sm:$0xf0]  ;;  %v6377_v25 = vor.u32 %v4997_v5, %v3885_v30 }
  0x9b   : > { %1154 = vmatpush.bf16.msra.mxu3 %v6006_v55  ;;  %1069 = vmatmul.bf16.vlgmr.msrb.gmra.mxu1 %v8287_v34  ;;  %v3907_v55 = vld [vmem:[%s8198_s1 + $0xf0] sm:$0xf] }
  0x9c   : > { %1095 = vmatmul.bf16.vlgmr.msrb.gmra.mxu3 %v6024_v54  ;;  %v6262_v49 = vor.u32 %v5004_v59, %v3907_v55  ;;  %v8298_v54 = vld [vmem:[#allocation23_spill] sm:$0xff] }
  0x9d   : > { %1103 = vmatpush.bf16.msra.mxu0 %v8288_v38  ;;  %v3875_v38 = vld [vmem:[%s8198_s1 + $0xb0] sm:$0xf]  ;;  %v3867_v55 = vld [vmem:[%s8198_s1 + $0xa0] sm:$0xf]  ;;  %v4994_v59 = vld [vmem:[%s8198_s1 + $0xa4] sm:$0xf0] }
  0x9e   : > { %1116 = vmatpush.bf16.msra.mxu1 %v8289_v46  ;;  %1142 = vmatpush.bf16.msra.mxu2 %v6028_v19  ;;  %v1139_v19 = vor.u32 %v1138_v15, %v1134_v13  ;;  %v4996_v46 = vld [vmem:[%s8198_s1 + $0xb4] sm:$0xf0]  ;;  %v4977_v13 = vld [vmem:[%s8198_s1 + $0x24] sm:$0xf]  ;;  %v3933_v15 = vld [vmem:[%s8198_s1 + $0x28] sm:$0xf0] }
  0x9f   : > { %1155 = vmatpush.bf16.msra.mxu3 %v6035_v11  ;;  %v6409_v28 = vor.u32 %v4996_v46, %v3875_v38  ;;  %v4974_v46 = vld [vmem:[%s8198_s1 + $0x4] sm:$0xf0] }
  0xa1   : > { %1104 = vmatpush.bf16.msra.mxu0 %v8290_v50  ;;  %v4995_v50 = vld [vmem:[%s8198_s1 + $0xb4] sm:$0xf] }
  0xa2   : > { %1117 = vmatpush.bf16.msra.mxu1 %v8291_v58  ;;  %1143 = vmatpush.bf16.msra.mxu2 %v6055_v37  ;;  %v6391_v58 = vor.u32 %v4981_v8, %v3949_v12  ;;  %v3915_v8 = vld [vmem:[%s8198_s1] sm:$0xf] }
  0xa3   : > { %1156 = vmatpush.bf16.msra.mxu3 %v6059_v7  ;;  %v6305_v7 = vor.u32 %v4986_v39, %v3963_v31  ;;  %v4992_v31 = vld [vmem:[%s8198_s1 + $0x94] sm:$0xf0]  ;;  %v4991_v39 = vld [vmem:[%s8198_s1 + $0x94] sm:$0xf] }
  0xa5   : > { %1105 = vmatpush.bf16.msra.mxu0 %v8292_v62  ;;  %v3877_v62 = vld [vmem:[%s8198_s1 + $0xb8] sm:$0xf0] }
  0xa6   : > { %1118 = vmatpush.bf16.msra.mxu1 %v8293_v9  ;;  %1144 = vmatpush.bf16.msra.mxu2 %v6075_v26  ;;  %v3891_v26 = vld [vmem:[%s8198_s1 + $0xd0] sm:$0xf] }
  0xa7   : > { %1157 = vmatpush.bf16.msra.mxu3 %v6079_v36  ;;  %v4999_v36 = vld [vmem:[%s8198_s1 + $0xd4] sm:$0xf]  ;;  %v3939_v9 = vld [vmem:[%s8198_s1 + $0x30] sm:$0xf] }
  0xa8   : > { %v6415_v51 = vor.u32 %v4980_v14, %v3939_v9  ;;  %v4051_v9 = vld [vmem:[%s8198_s1 + $0x170] sm:$0xf]  ;;  %v5020_v14 = vld [vmem:[%s8198_s1 + $0x174] sm:$0xf0] }
  0xa9   : > { %1106 = vmatpush.bf16.msra.mxu0 %v8294_v23  ;;  %v4979_v23 = vld [vmem:[%s8198_s1 + $0x34] sm:$0xf] }
  0xaa   : > { %1119 = vmatpush.bf16.msra.mxu1 %v8295_v27  ;;  %1145 = vmatpush.bf16.msra.mxu2 %v6096_v48  ;;  %v3941_v27 = vld [vmem:[%s8198_s1 + $0x38] sm:$0xf0] }
  0xab   : > { %1158 = vmatpush.bf16.msra.mxu3 %v6100_v2  ;;  %v3893_v2 = vld [vmem:[%s8198_s1 + $0xd8] sm:$0xf0]  ;;  %v6427_v20 = vor.u32 %v4979_v23, %v3941_v27  ;;  %v5019_v23 = vld [vmem:[%s8198_s1 + $0x174] sm:$0xf] }
  0xad   : > { %1107 = vmatpush.bf16.msra.mxu0 %v8296_v35 }
  0xae   : > { %1120 = vmatpush.bf16.msra.mxu1 %v8297_v43  ;;  %1146 = vmatpush.bf16.msra.mxu2 %v6116_v52  ;;  %v4984_v52 = vld [vmem:[%s8198_s1 + $0x54] sm:$0xf0]  ;;  %v6413_v43 = vor.u32 %v4995_v50, %v3877_v62  ;;  %v4973_v50 = vld [vmem:[%s8198_s1 + $0x4] sm:$0xf]  ;;  %v3917_v62 = vld [vmem:[%s8198_s1 + $0x8] sm:$0xf0] }
  0xaf   : > { %1159 = vmatpush.bf16.msra.mxu3 %v6120_v3  ;;  %v4983_v3 = vld [vmem:[%s8198_s1 + $0x54] sm:$0xf]  ;;  %v6343_v57 = vor.u32 %v4984_v52, %v3955_v17  ;;  %v3925_v17 = vld [vmem:[%s8198_s1 + $0x18] sm:$0xf0] }
  0xb0   : > { %v6355_v29 = vor.u32 %v4983_v3, %v3957_v33  ;;  %v3851_v33 = vld [vmem:[%s8198_s1 + $0x80] sm:$0xf] }
  0xb1   : > { %1108 = vmatpush.bf16.msra.mxu0 %v5963_v63  ;;  %v3901_v63 = vld [vmem:[%s8198_s1 + $0xe8] sm:$0xf0]  ;;  %v6530_v27 = vor.u32 %v4990_v44, %v3851_v33  ;;  %v5033_v33 = vld [vmem:[%s8198_s1 + $0x1e4] sm:$0xf] }
  0xb2   : > { %1121 = vmatpush.bf16.msra.mxu1 %v5975_v61  ;;  %1147 = vmatpush.bf16.msra.mxu2 %v6136_v16  ;;  %v3899_v61 = vld [vmem:[%s8198_s1 + $0xe0] sm:$0xf]  ;;  %v6303_v37 = vor.u32 %v5001_v42, %v3901_v63  ;;  %v6451_v42 = vor.u32 %v4978_v47, %v3931_v40  ;;  %v3859_v63 = vld [vmem:[%s8198_s1 + $0x90] sm:$0xf]  ;;  %v4134_v40 = vld [vmem:[%s8198_s1 + $0x1f8] sm:$0xf0] }
  0xb3   : > { %1160 = vmatpush.bf16.msra.mxu3 %v6140_v53  ;;  %v6299_v11 = vor.u32 %v5002_v41, %v3899_v61  ;;  %v6341_v53 = vor.u32 %v4999_v36, %v3893_v2  ;;  %v6445_v61 = vor.u32 %v4994_v59, %v3867_v55  ;;  %v6449_v41 = vor.u32 %v4993_v60, %v3869_v22  ;;  %v4975_v2 = vld [vmem:[%s8198_s1 + $0x14] sm:$0xf]  ;;  %v4132_v55 = vld [vmem:[%s8198_s1 + $0x1f0] sm:$0xf]  ;;  %v5036_v59 = vld [vmem:[%s8198_s1 + $0x1f4] sm:$0xf0] }
  0xb4   : > { %8299 = vst [vmem:[#allocation8_spill] sm:$0xff] %v6451_v42  ;;  %v6485_v3 = vor.u32 %v4992_v31, %v3859_v63  ;;  %v6509_v38 = vor.u32 %v4975_v2, %v3925_v17  ;;  %v5035_v22 = vld [vmem:[%s8198_s1 + $0x1f4] sm:$0xf]  ;;  %v4124_v2 = vld [vmem:[%s8198_s1 + $0x1e0] sm:$0xf] }
  0xb5   : > { %1109 = vmatpush.bf16.msra.mxu0 %v5999_v32  ;;  %v4985_v32 = vld [vmem:[%s8198_s1 + $0x64] sm:$0xf]  ;;  %v509_v35 = vpop.f32.mrf.mxu0  ;;  %v5034_v17 = vld [vmem:[%s8198_s1 + $0x1e4] sm:$0xf0]  ;;  %v4126_v44 = vld [vmem:[%s8198_s1 + $0x1e8] sm:$0xf0] }
  0xb6   : > { %1122 = vmatpush.bf16.msra.mxu1 %v8298_v54  ;;  %1148 = vmatpush.bf16.msra.mxu2 %v6156_v56  ;;  %v6318_v48 = vor.u32 %v4985_v32, %v3965_v4  ;;  %v3947_v56 = vld [vmem:[%s8198_s1 + $0x40] sm:$0xf]  ;;  %v3861_v32 = vld [vmem:[%s8198_s1 + $0x98] sm:$0xf0]  ;;  %v3923_v4 = vld [vmem:[%s8198_s1 + $0x10] sm:$0xf] }
  0xb7   : > { %1161 = vmatpush.bf16.msra.mxu3 %v6160_v1  ;;  %v5000_v1 = vld [vmem:[%s8198_s1 + $0xd4] sm:$0xf0]  ;;  %v6495_v5 = vor.u32 %v4991_v39, %v3861_v32  ;;  %8302 = vst [vmem:[#allocation11_spill] sm:$0xff] %v6509_v38  ;;  %v6560_v39 = vor.u32 %v5036_v59, %v4132_v55  ;;  %v5018_v32 = vld [vmem:[%s8198_s1 + $0x164] sm:$0xf0] }
  0xb8   : > { %1110 = vmatmul.bf16.vlgmr.msra.gmra.mxu0 %v6164_v6  ;;  %v6337_v16 = vor.u32 %v5000_v1, %v3891_v26  ;;  %v522_v18 = vpop.f32.mrf.mxu1  ;;  %v4976_v26 = vld [vmem:[%s8198_s1 + $0x14] sm:$0xf0]  ;;  %v5031_v55 = vld [vmem:[%s8198_s1 + $0x1d4] sm:$0xf]  ;;  %v4118_v59 = vld [vmem:[%s8198_s1 + $0x1d8] sm:$0xf0] }
  0xb9   : > { %1299 = vmatpush.bf16.msrb.mxu0 %v6262_v49  ;;  %1123 = vmatmul.bf16.vlgmr.msra.gmra.mxu1 %v6164_v6  ;;  %v4982_v6 = vld [vmem:[%s8198_s1 + $0x44] sm:$0xf0]  ;;  %v6497_v30 = vor.u32 %v4976_v26, %v3923_v4  ;;  %8305 = vst [vmem:[#allocation13_spill] sm:$0xff] %v6560_v39  ;;  %v5017_v4 = vld [vmem:[%s8198_s1 + $0x164] sm:$0xf]  ;;  %v6572_v26 = vor.u32 %v5035_v22, %v4134_v40 }
  0xba   : > { %1312 = vmatpush.bf16.msrb.mxu1 %v6264_v0  ;;  %1405 = vmatpush.bf16.msrb.mxu2 %v6266_v24  ;;  %v6379_v34 = vor.u32 %v4982_v6, %v3947_v56  ;;  %v4989_v56 = vld [vmem:[%s8198_s1 + $0x84] sm:$0xf]  ;;  %v3853_v6 = vld [vmem:[%s8198_s1 + $0x88] sm:$0xf0] }
  0xbb   : > { %1418 = vmatpush.bf16.msrb.mxu3 %v6278_v10  ;;  %1149 = vmatmul.bf16.vlgmr.msra.gmra.mxu2 %v1139_v19  ;;  %8301 = vst [vmem:[#allocation10_spill] sm:$0xff] %v6497_v30  ;;  %v6543_v60 = vor.u32 %v4989_v56, %v3853_v6  ;;  %v6599_v6 = vld [vmem:[%s5797_s15 + $0xc] sm:$0xf] }
  0xbc   : > { %1162 = vmatmul.bf16.vlgmr.msra.gmra.mxu3 %v1139_v19  ;;  %v615_v54 = vpop.f32.mrf.mxu2  ;;  %v6463_v19 = vor.u32 %v4977_v13, %v3933_v15  ;;  %v6554_v13 = vor.u32 %v4973_v50, %v3917_v62  ;;  %v6556_v15 = vor.u32 %v5020_v14, %v4051_v9  ;;  %8306 = vst [vmem:[#allocation14_spill] sm:$0xff] %v6572_v26  ;;  %v5016_v50 = vld [vmem:[%s8198_s1 + $0x154] sm:$0xf0]  ;;  %v5015_v62 = vld [vmem:[%s8198_s1 + $0x154] sm:$0xf] }
  0xbd   : > { %1300 = vmatpush.bf16.msrb.mxu0 %v6299_v11  ;;  %v6474_v1 = vadd.f32 %v615_v54, %v509_v35  ;;  %v511_v45 = vpop.f32.mrf.mxu0  ;;  %v4053_v35 = vld [vmem:[%s8198_s1 + $0x178] sm:$0xf0]  ;;  %v4043_v54 = vld [vmem:[%s8198_s1 + $0x160] sm:$0xf]  ;;  %8307 = vst [vmem:[#allocation16_spill] sm:$0xff] %v6599_v6  ;;  %v6617_v9 = vor.u32 %v5033_v33, %v4126_v44 }
  0xbe   : > { %1313 = vmatpush.bf16.msrb.mxu1 %v6303_v37  ;;  %1406 = vmatpush.bf16.msrb.mxu2 %v6305_v7  ;;  %8300 = vst [vmem:[#allocation9_spill] sm:$0xff] %v6463_v19  ;;  %v6558_v31 = vor.u32 %v5019_v23, %v4053_v35  ;;  %v6592_v45 = vld [vmem:[%s5797_s15 + $0x8] sm:$0xf]  ;;  %v6596_v56 = vor.u32 %v5018_v32, %v4043_v54  ;;  %v4037_v14 = vld [vmem:[%s8198_s1 + $0x158] sm:$0xf0] }
  0xbf   : > { %1419 = vmatpush.bf16.msrb.mxu3 %v6318_v48  ;;  %v628_v36 = vpop.f32.mrf.mxu3  ;;  %8304 = vst [vmem:[#allocation12_spill] sm:$0xff] %v6554_v13  ;;  %v4116_v23 = vld [vmem:[%s8198_s1 + $0x1d0] sm:$0xf]  ;;  %v5032_v35 = vld [vmem:[%s8198_s1 + $0x1d4] sm:$0xf0]  ;;  %v6643_v40 = vor.u32 %v5015_v62, %v4037_v14 }
  0xc0   : > { %v6482_v52 = vadd.f32 %v628_v36, %v522_v18  ;;  %v524_v12 = vpop.f32.mrf.mxu1  ;;  %v6545_v18 = vor.u32 %v4974_v46, %v3915_v8  ;;  %v4045_v36 = vld [vmem:[%s8198_s1 + $0x168] sm:$0xf0]  ;;  %v4035_v46 = vld [vmem:[%s8198_s1 + $0x150] sm:$0xf]  ;;  %8309 = vst [vmem:[#allocation18_spill] sm:$0xff] %v6617_v9 }
  0xc1   : > { %1301 = vmatpush.bf16.msrb.mxu0 %v6337_v16  ;;  %v6603_v8 = vor.u32 %v5017_v4, %v4045_v36  ;;  %v6605_v12 = vor.u32 %v5034_v17, %v4124_v2  ;;  %v6638_v22 = vor.u32 %v5016_v50, %v4035_v46  ;;  %v5014_v54 = vld [vmem:[%s8198_s1 + $0x144] sm:$0xf0]  ;;  %v5013_v32 = vld [vmem:[%s8198_s1 + $0x144] sm:$0xf]  ;;  %v6657_v4 = vor.u32 %v5031_v55, %v4118_v59  ;;  %v4029_v36 = vld [vmem:[%s8198_s1 + $0x148] sm:$0xf0] }
  0xc2   : > { %1314 = vmatpush.bf16.msrb.mxu1 %v6341_v53  ;;  %1407 = vmatpush.bf16.msrb.mxu2 %v6343_v57  ;;  %8303 = vst [vmem:[#allocation15_spill] sm:$0xff] %v6545_v18  ;;  %v4108_v2 = vld [vmem:[%s8198_s1 + $0x1c0] sm:$0xf]  ;;  %v5030_v17 = vld [vmem:[%s8198_s1 + $0x1c4] sm:$0xf0]  ;;  %v6682_v14 = vor.u32 %v5013_v32, %v4029_v36 }
  0xc3   : > { %1420 = vmatpush.bf16.msrb.mxu3 %v6355_v29  ;;  %8308 = vst [vmem:[#allocation17_spill] sm:$0xff] %v6605_v12  ;;  %v5029_v33 = vld [vmem:[%s8198_s1 + $0x1c4] sm:$0xf]  ;;  %v4110_v44 = vld [vmem:[%s8198_s1 + $0x1c8] sm:$0xf0] }
  0xc4   : > { %v617_v47 = vpop.f32.mrf.mxu2  ;;  %8311 = vst [vmem:[#allocation20_spill] sm:$0xff] %v6657_v4  ;;  %v4019_v62 = vld [vmem:[%s8198_s1 + $0x130] sm:$0xf]  ;;  %v5012_v59 = vld [vmem:[%s8198_s1 + $0x134] sm:$0xf0] }
  0xc5   : > { %1302 = vmatpush.bf16.msrb.mxu0 %v6373_v21  ;;  %v6645_v47 = vor.u32 %v5032_v35, %v4116_v23  ;;  %v6684_v23 = vor.u32 %v5030_v17, %v4108_v2  ;;  %v4100_v36 = vld [vmem:[%s8198_s1 + $0x1b0] sm:$0xf]  ;;  %v5028_v2 = vld [vmem:[%s8198_s1 + $0x1b4] sm:$0xf0]  ;;  %v5027_v17 = vld [vmem:[%s8198_s1 + $0x1b4] sm:$0xf] }
  0xc6   : > { %1315 = vmatpush.bf16.msrb.mxu1 %v6377_v25  ;;  %1408 = vmatpush.bf16.msrb.mxu2 %v6379_v34 }
  0xc7   : > { %1421 = vmatpush.bf16.msrb.mxu3 %v6391_v58  ;;  %v630_v63 = vpop.f32.mrf.mxu3  ;;  %8310 = vst [vmem:[#allocation19_spill] sm:$0xff] %v6645_v47 }
  0xc8   : > { %v4027_v63 = vld [vmem:[%s8198_s1 + $0x140] sm:$0xf]  ;;  %8312 = vst [vmem:[#allocation21_spill] sm:$0xff] %v6684_v23 }
  0xc9   : > { %1303 = vmatpush.bf16.msrb.mxu0 %v6409_v28  ;;  %v6675_v46 = vor.u32 %v5014_v54, %v4027_v63  ;;  %v5011_v63 = vld [vmem:[%s8198_s1 + $0x134] sm:$0xf]  ;;  %v4057_v54 = vld [vmem:[%s5797_s15] sm:$0xff]  }
  0xca   : > { %1316 = vmatpush.bf16.msrb.mxu1 %v6413_v43  ;;  %1409 = vmatpush.bf16.msrb.mxu2 %v6415_v51 }
  0xcb   : > { %1422 = vmatpush.bf16.msrb.mxu3 %v6427_v20 }
  0xcd   : > { %1304 = vmatpush.bf16.msrb.mxu0 %v6445_v61 }
  0xce   : > { %1317 = vmatpush.bf16.msrb.mxu1 %v6449_v41  ;;  %1410 = vmatpush.bf16.msrb.mxu2 %v6451_v42 }
  0xcf   : > { %1423 = vmatpush.bf16.msrb.mxu3 %v6463_v19 }
  0xd1   : > { %1305 = vmatpush.bf16.msrb.mxu0 %v6485_v3 }
  0xd2   : > { %1318 = vmatpush.bf16.msrb.mxu1 %v6495_v5  ;;  %1411 = vmatpush.bf16.msrb.mxu2 %v6497_v30 }
  0xd3   : > { %1424 = vmatpush.bf16.msrb.mxu3 %v6509_v38 }
  0xd5   : > { %1306 = vmatpush.bf16.msrb.mxu0 %v6530_v27  ;;  %v740_v50 = vpop.f32.mrf.mxu0 }
  0xd6   : > { %1319 = vmatpush.bf16.msrb.mxu1 %v6543_v60  ;;  %1412 = vmatpush.bf16.msrb.mxu2 %v6545_v18  ;;  %v757_v35 = vadd.f32 %v740_v50, %v6474_v1  ;;  %v4021_v1 = vld [vmem:[%s8198_s1 + $0x138] sm:$0xf0] }
  0xd7   : > { %1425 = vmatpush.bf16.msrb.mxu3 %v6554_v13  ;;  %v6718_v50 = vor.u32 %v5011_v63, %v4021_v1 }
  0xd8   : > { %1307 = vmatmul.bf16.vlgmr.msrb.gmra.mxu0 %v6599_v6  ;;  %v753_v55 = vpop.f32.mrf.mxu1 }
  0xd9   : > { %1539 = vmatpush.bf16.msra.mxu0 %v6556_v15  ;;  %1413 = vmatmul.bf16.vlgmr.msrb.gmra.mxu2 %v6592_v45  ;;  %v758_v32 = vadd.f32 %v753_v55, %v6482_v52  ;;  %v4102_v52 = vld [vmem:[%s8198_s1 + $0x1b8] sm:$0xf0]  ;;  %8315 = vst [vmem:[#allocation24_spill] sm:$0xff] %v6718_v50  ;;  %v6720_v55 = vor.u32 %v5028_v2, %v4100_v36  ;;  %v4013_v2 = vld [vmem:[%s8198_s1 + $0x128] sm:$0xf0] }
  0xda   : > { %1552 = vmatpush.bf16.msra.mxu1 %v6558_v31  ;;  %1675 = vmatpush.bf16.msra.mxu2 %v6560_v39  ;;  %v6732_v63 = vor.u32 %v5027_v17, %v4102_v52  ;;  %v5008_v39 = vld [vmem:[%s8198_s1 + $0x114] sm:$0xf0] }
  0xdb   : > { %1688 = vmatpush.bf16.msra.mxu3 %v6572_v26  ;;  %1320 = vmatmul.bf16.vlgmr.msrb.gmra.mxu1 %v6599_v6  ;;  %8316 = vst [vmem:[#allocation25_spill] sm:$0xff] %v6720_v55  ;;  %v5026_v6 = vld [vmem:[%s8198_s1 + $0x1a4] sm:$0xf0]  ;;  %v4003_v26 = vld [vmem:[%s8198_s1 + $0x110] sm:$0xf] }
  0xdc   : > { %1426 = vmatmul.bf16.vlgmr.msrb.gmra.mxu3 %v6592_v45  ;;  %8317 = vst [vmem:[#allocation26_spill] sm:$0xff] %v6732_v63 }
  0xdd   : > { %1540 = vmatpush.bf16.msra.mxu0 %v6596_v56 }
  0xde   : > { %1553 = vmatpush.bf16.msra.mxu1 %v6603_v8  ;;  %1676 = vmatpush.bf16.msra.mxu2 %v6605_v12  ;;  %v5010_v12 = vld [vmem:[%s8198_s1 + $0x124] sm:$0xf0] }
  0xdf   : > { %1689 = vmatpush.bf16.msra.mxu3 %v6617_v9  ;;  %v6695_v9 = vor.u32 %v5029_v33, %v4110_v44  ;;  %v6714_v33 = vor.u32 %v5012_v59, %v4019_v62  ;;  %v1585_v44 = vunpack.c.h.b16 %v4057_v54  ;;  %v5009_v62 = vld [vmem:[%s8198_s1 + $0x124] sm:$0xf]  ;;  %v1449_v59 = vunpack.c.l.b16 %v4057_v54  ;;  %v880_v36 = vpop.f32.mrf.mxu3 }
  0xe0   : > { %v6745_v54 = vadd.f32 %v880_v36, %v758_v32  ;;  %v6758_v32 = vor.u32 %v5009_v62, %v4013_v2  ;;  %v5024_v62 = vld [vmem:[%s8198_s1 + $0x194] sm:$0xf0]  ;;  %v4086_v2 = vld [vmem:[%s8198_s1 + $0x198] sm:$0xf0] }
  0xe1   : > { %1541 = vmatpush.bf16.msra.mxu0 %v6638_v22  ;;  %8313 = vst [vmem:[#allocation22_spill] sm:$0xff] %v6695_v9  ;;  %v1586_v52 = vpack.c.b16 %v1585_v44, %v1585_v44 }
  0xe2   : > { %1554 = vmatpush.bf16.msra.mxu1 %v6643_v40  ;;  %1677 = vmatpush.bf16.msra.mxu2 %v6645_v47  ;;  %8314 = vst [vmem:[#allocation23_spill] sm:$0xff] %v6714_v33  ;;  %v4011_v47 = vld [vmem:[%s8198_s1 + $0x120] sm:$0xf] }
  0xe3   : > { %1690 = vmatpush.bf16.msra.mxu3 %v6657_v4  ;;  %v867_v4 = vpop.f32.mrf.mxu2  ;;  %v6754_v17 = vor.u32 %v5010_v12, %v4011_v47  ;;  %8319 = vst [vmem:[#allocation28_spill] sm:$0xff] %v6758_v32  ;;  %v5007_v12 = vld [vmem:[%s8198_s1 + $0x114] sm:$0xf]  ;;  %v1450_v47 = vpack.c.b16 %v1449_v59, %v1449_v59 }
  0xe4   : > { %v6734_v1 = vadd.f32 %v867_v4, %v757_v35  ;;  %v5025_v4 = vld [vmem:[%s8198_s1 + $0x1a4] sm:$0xf]  ;;  %v4094_v35 = vld [vmem:[%s8198_s1 + $0x1a8] sm:$0xf0]  ;;  %v5023_v59 = vld [vmem:[%s8198_s1 + $0x194] sm:$0xf] }
  0xe5   : > { %1542 = vmatpush.bf16.msra.mxu0 %v6675_v46  ;;  %8318 = vst [vmem:[#allocation27_spill] sm:$0xff] %v6754_v17  ;;  %v6772_v44 = vor.u32 %v5025_v4, %v4094_v35  ;;  %v6790_v4 = vor.u32 %v5008_v39, %v4003_v26  ;;  %v3995_v35 = vld [vmem:[%s8198_s1 + $0x100] sm:$0xf]  ;;  %v5005_v39 = vld [vmem:[%s8198_s1 + $0x104] sm:$0xf]  ;;  %v1454_v18 = vshll.u32 %v1450_v47, 16  ;;  %v6811_v30 = vor.u32 %v5023_v59, %v4086_v2 }
  0xe6   : > { %1555 = vmatpush.bf16.msra.mxu1 %v6682_v14  ;;  %1678 = vmatpush.bf16.msra.mxu2 %v6684_v23  ;;  %v4092_v23 = vld [vmem:[%s8198_s1 + $0x1a0] sm:$0xf]  ;;  %v3997_v26 = vld [vmem:[%s8198_s1 + $0x108] sm:$0xf0]  ;;  %v4212_v59 = vld [vmem:[%s8198_s1 + $0x270] sm:$0xf] }
  0xe7   : > { %1691 = vmatpush.bf16.msra.mxu3 %v6695_v9  ;;  %v742_v9 = vpop.f32.mrf.mxu0  ;;  %v6760_v36 = vor.u32 %v5026_v6, %v4092_v23  ;;  %8321 = vst [vmem:[#allocation30_spill] sm:$0xff] %v6772_v44  ;;  %v4005_v6 = vld [vmem:[%s8198_s1 + $0x118] sm:$0xf0]  ;;  %v4084_v23 = vld [vmem:[%s8198_s1 + $0x190] sm:$0xf]  ;;  %v6842_v19 = vor.u32 %v5005_v39, %v3997_v26 }
  0xe8   : > { %v755_v9 = vpop.f32.mrf.mxu1  ;;  %8322 = vst [vmem:[#allocation31_spill] sm:$0xff] %v6790_v4  ;;  %v6802_v13 = vor.u32 %v5024_v62, %v4084_v23  ;;  %v5021_v23 = vld [vmem:[%s8198_s1 + $0x184] sm:$0xf]  ;;  %v882_v62 = vpop.f32.mrf.mxu3  ;;  %v5052_v2 = vld [vmem:[%s8198_s1 + $0x274] sm:$0xf0] }
  0xe9   : > { %1543 = vmatpush.bf16.msra.mxu0 %v6714_v33  ;;  %8320 = vst [vmem:[#allocation29_spill] sm:$0xff] %v6760_v36  ;;  %v5006_v9 = vld [vmem:[%s8198_s1 + $0x104] sm:$0xf0]  ;;  %v5051_v62 = vld [vmem:[%s8198_s1 + $0x274] sm:$0xf] }
  0xea   : > { %1556 = vmatpush.bf16.msra.mxu1 %v6718_v50  ;;  %1679 = vmatpush.bf16.msra.mxu2 %v6720_v55  ;;  %v6800_v55 = vor.u32 %v5007_v12, %v4005_v6  ;;  %v4076_v12 = vld [vmem:[%s8198_s1 + $0x180] sm:$0xf]  ;;  %v5022_v6 = vld [vmem:[%s8198_s1 + $0x184] sm:$0xf0]  ;;  %v6849_v50 = vor.u32 %v5052_v2, %v4212_v59  ;;  %v4196_v26 = vld [vmem:[%s8198_s1 + $0x250] sm:$0xf] }
  0xeb   : > { %1692 = vmatpush.bf16.msra.mxu3 %v6732_v63  ;;  %v1590_v63 = vshll.u32 %v1586_v52, 16  ;;  %v869_v38 = vpop.f32.mrf.mxu2  ;;  %v6844_v42 = vor.u32 %v5022_v6, %v4076_v12  ;;  %v5048_v12 = vld [vmem:[%s8198_s1 + $0x254] sm:$0xf0]  ;;  %v5047_v6 = vld [vmem:[%s8198_s1 + $0x254] sm:$0xf] }
  0xec   : > { %v4078_v38 = vld [vmem:[%s8198_s1 + $0x188] sm:$0xf0]  ;;  %v5046_v59 = vld [vmem:[%s8198_s1 + $0x244] sm:$0xf0]  ;;  %v5045_v2 = vld [vmem:[%s8198_s1 + $0x244] sm:$0xf] }
  0xed   : > { %1544 = vmatpush.bf16.msra.mxu0 %v6754_v17  ;;  %v1592_v17 = vrot.slane %v1590_v63, 1  ;;  %v4204_v63 = vld [vmem:[%s8198_s1 + $0x260] sm:$0xf] }
  0xee   : > { %1557 = vmatpush.bf16.msra.mxu1 %v6758_v32  ;;  %1680 = vmatpush.bf16.msra.mxu2 %v6760_v36  ;;  %v4214_v36 = vld [vmem:[%s8198_s1 + $0x278] sm:$0xf0]  ;;  %v1588_v32 = vshrl.u32 %v1586_v52, 16  ;;  %v5050_v52 = vld [vmem:[%s8198_s1 + $0x264] sm:$0xf0] }
  0xef   : > { %1693 = vmatpush.bf16.msra.mxu3 %v6772_v44  ;;  %v6832_v44 = vor.u32 %v5006_v9, %v3995_v35  ;;  %v1452_v35 = vshrl.u32 %v1450_v47, 16  ;;  %v1456_v9 = vrot.slane %v1454_v18, 1  ;;  %v6851_v33 = vor.u32 %v5051_v62, %v4214_v36  ;;  %v5049_v18 = vld [vmem:[%s8198_s1 + $0x264] sm:$0xf]  ;;  %v4206_v36 = vld [vmem:[%s8198_s1 + $0x268] sm:$0xf0] }
  0xf0   : > { %v6860_v47 = vor.u32 %v1592_v17, %v1588_v32  ;;  %v6874_v17 = vor.u32 %v5050_v52, %v4204_v63  ;;  %v6878_v32 = vor.u32 %v5049_v18, %v4206_v36  ;;  %v4180_v18 = vld [vmem:[%s8198_s1 + $0x230] sm:$0xf]  ;;  %v5043_v36 = vld [vmem:[%s8198_s1 + $0x234] sm:$0xf] }
  0xf1   : > { %1545 = vmatpush.bf16.msra.mxu0 %v6790_v4  ;;  %v6847_v4 = vor.u32 %v5021_v23, %v4078_v38  ;;  %v6870_v39 = vor.u32 %v1456_v9, %v1452_v35  ;;  %v6898_v23 = vor.u32 %v5048_v12, %v4196_v26  ;;  %v4188_v38 = vld [vmem:[%s8198_s1 + $0x240] sm:$0xf] }
  0xf2   : > { %1558 = vmatpush.bf16.msra.mxu1 %v6800_v55  ;;  %1681 = vmatpush.bf16.msra.mxu2 %v6802_v13  ;;  %v6921_v63 = vor.u32 %v5046_v59, %v4188_v38 }
  0xf3   : > { %1694 = vmatpush.bf16.msra.mxu3 %v6811_v30 }
  0xf5   : > { %1546 = vmatpush.bf16.msra.mxu0 %v6832_v44  ;;  %v1003_v62 = vpop.f32.mrf.mxu0 }
  0xf6   : > { %1559 = vmatpush.bf16.msra.mxu1 %v6842_v19  ;;  %1682 = vmatpush.bf16.msra.mxu2 %v6844_v42  ;;  %v6919_v35 = vadd.f32 %v1003_v62, %v6734_v1  ;;  %v1016_v9 = vpop.f32.mrf.mxu1  ;;  %v5044_v1 = vld [vmem:[%s8198_s1 + $0x234] sm:$0xf0] }
  0xf7   : > { %1695 = vmatpush.bf16.msra.mxu3 %v6847_v4  ;;  %v6945_v26 = vor.u32 %v5044_v1, %v4180_v18  ;;  %v5040_v18 = vld [vmem:[%s8198_s1 + $0x214] sm:$0xf0]  ;;  %v5039_v1 = vld [vmem:[%s8198_s1 + $0x214] sm:$0xf] }
  0xf8   : > { %1547 = vmatmul.bf16.vlgmr.msra.gmra.mxu0 %v6870_v39 }
  0xf9   : > { %1810 = vmatpush.bf16.msrb.mxu0 %v6849_v50  ;;  %1683 = vmatmul.bf16.vlgmr.msra.gmra.mxu2 %v6860_v47 }
  0xfa   : > { %1823 = vmatpush.bf16.msrb.mxu1 %v6851_v33  ;;  %1838 = vmatpush.bf16.msrb.mxu2 %v6262_v49  ;;  %v4198_v49 = vld [vmem:[%s8198_s1 + $0x258] sm:$0xf0] }
  0xfb   : > { %1851 = vmatpush.bf16.msrb.mxu3 %v6264_v0  ;;  %1560 = vmatmul.bf16.vlgmr.msra.gmra.mxu1 %v6870_v39  ;;  %v6902_v0 = vor.u32 %v5047_v6, %v4198_v49  ;;  %v5042_v6 = vld [vmem:[%s8198_s1 + $0x224] sm:$0xf0] }
  0xfc   : > { %1696 = vmatmul.bf16.vlgmr.msra.gmra.mxu3 %v6860_v47 }
  0xfd   : > { %1811 = vmatpush.bf16.msrb.mxu0 %v6874_v17  ;;  %v1005_v59 = vpop.f32.mrf.mxu0 }
  0xfe   : > { %1824 = vmatpush.bf16.msrb.mxu1 %v6878_v32  ;;  %1839 = vmatpush.bf16.msrb.mxu2 %v6299_v11  ;;  %v4190_v11 = vld [vmem:[%s8198_s1 + $0x248] sm:$0xf0]  ;;  %v6964_v49 = vpop.f32.mrf.mxu2  ;;  %v1018_v62 = vpop.f32.mrf.mxu1 }
  0xff   : > { %1852 = vmatpush.bf16.msrb.mxu3 %v6303_v37  ;;  %v6926_v37 = vadd.f32 %v1016_v9, %v6745_v54  ;;  %v6928_v52 = vor.u32 %v5045_v2, %v4190_v11  ;;  %v1720_v54 = vunpack.c.l.b16 %v6592_v45  ;;  %v5041_v45 = vld [vmem:[%s8198_s1 + $0x224] sm:$0xf]  ;;  %v6966_v38 = vpop.f32.mrf.mxu3  ;;  %v4164_v9 = vld [vmem:[%s8198_s1 + $0x210] sm:$0xf] }
 0x101   : > { %1812 = vmatpush.bf16.msrb.mxu0 %v6898_v23  ;;  %v1721_v2 = vpack.c.b16 %v1720_v54, %v1720_v54 }
 0x102   : > { %1825 = vmatpush.bf16.msrb.mxu1 %v6902_v0  ;;  %1840 = vmatpush.bf16.msrb.mxu2 %v6337_v16  ;;  %v4182_v16 = vld [vmem:[%s8198_s1 + $0x238] sm:$0xf0] }
 0x103   : > { %1853 = vmatpush.bf16.msrb.mxu3 %v6341_v53  ;;  %v6949_v12 = vor.u32 %v5043_v36, %v4182_v16  ;;  %v4172_v53 = vld [vmem:[%s8198_s1 + $0x220] sm:$0xf]  ;;  %v1725_v36 = vshll.u32 %v1721_v2, 16  ;;  %v6989_v16 = vor.u32 %v5040_v18, %v4164_v9  ;;  %v1723_v59 = vshrl.u32 %v1721_v2, 16  ;;  %v8340_v2 = vld [vmem:[#allocation20_spill] sm:$0xff] }
 0x104   : > { %v6969_v11 = vor.u32 %v5042_v6, %v4172_v53  ;;  %v5038_v53 = vld [vmem:[%s8198_s1 + $0x204] sm:$0xf0]  ;;  %v5037_v6 = vld [vmem:[%s8198_s1 + $0x204] sm:$0xf] }
 0x105   : > { %1813 = vmatpush.bf16.msrb.mxu0 %v6921_v63  ;;  %v1727_v62 = vrot.slane %v1725_v36, 1  ;;  %v8341_v36 = vld [vmem:[#allocation21_spill] sm:$0xff] }
 0x106   : > { %1826 = vmatpush.bf16.msrb.mxu1 %v6928_v52  ;;  %1841 = vmatpush.bf16.msrb.mxu2 %v6373_v21  ;;  %v4174_v21 = vld [vmem:[%s8198_s1 + $0x228] sm:$0xf0] }
 0x107   : > { %1854 = vmatpush.bf16.msrb.mxu3 %v6377_v25  ;;  %v6973_v25 = vor.u32 %v5041_v45, %v4174_v21  ;;  %v1033_v45 = vpop.f32.mrf.mxu2  ;;  %v1046_v21 = vpop.f32.mrf.mxu3  ;;  %v7017_v18 = vor.u32 %v1727_v62, %v1723_v59  ;;  %v8344_v59 = vld [vmem:[#allocation26_spill] sm:$0xff] }
 0x109   : > { %1814 = vmatpush.bf16.msrb.mxu0 %v6945_v26 }
 0x10a   : > { %1827 = vmatpush.bf16.msrb.mxu1 %v6949_v12  ;;  %1842 = vmatpush.bf16.msrb.mxu2 %v6409_v28  ;;  %v4166_v28 = vld [vmem:[%s8198_s1 + $0x218] sm:$0xf0] }
 0x10b   : > { %1855 = vmatpush.bf16.msrb.mxu3 %v6413_v43  ;;  %v6993_v54 = vor.u32 %v5039_v1, %v4166_v28  ;;  %v4156_v43 = vld [vmem:[%s8198_s1 + $0x200] sm:$0xf] }
 0x10c   : > { %v7009_v9 = vor.u32 %v5038_v53, %v4156_v43 }
 0x10d   : > { %1815 = vmatpush.bf16.msrb.mxu0 %v6969_v11 }
 0x10e   : > { %1828 = vmatpush.bf16.msrb.mxu1 %v6973_v25  ;;  %1843 = vmatpush.bf16.msrb.mxu2 %v6445_v61  ;;  %v4158_v61 = vld [vmem:[%s8198_s1 + $0x208] sm:$0xf0] }
 0x10f   : > { %1856 = vmatpush.bf16.msrb.mxu3 %v6449_v41  ;;  %v7013_v41 = vor.u32 %v5037_v6, %v4158_v61  ;;  %v8343_v61 = vld [vmem:[#allocation25_spill] sm:$0xff] }
 0x111   : > { %1816 = vmatpush.bf16.msrb.mxu0 %v6989_v16 }
 0x112   : > { %1829 = vmatpush.bf16.msrb.mxu1 %v6993_v54  ;;  %1844 = vmatpush.bf16.msrb.mxu2 %v6485_v3 }
 0x113   : > { %1857 = vmatpush.bf16.msrb.mxu3 %v6495_v5  ;;  %v8324_v5 = vld [vmem:[#allocation24_spill] sm:$0xff] }
 0x115   : > { %1817 = vmatpush.bf16.msrb.mxu0 %v7009_v9 }
 0x116   : > { %1830 = vmatpush.bf16.msrb.mxu1 %v7013_v41  ;;  %1845 = vmatpush.bf16.msrb.mxu2 %v6530_v27  ;;  %v8325_v27 = vld [vmem:[#allocation8_spill] sm:$0xff] }
 0x117   : > { %1858 = vmatpush.bf16.msrb.mxu3 %v6543_v60 }
 0x118   : > { %1818 = vmatmul.bf16.vlgmr.msrb.gmra.mxu0 %v7017_v18 }
 0x119   : > { %1864 = vmatpush.bf16.msra.mxu0 %v6266_v24  ;;  %1831 = vmatmul.bf16.vlgmr.msrb.gmra.mxu1 %v7017_v18  ;;  %v1057_v24 = vpop.f32.mrf.mxu0 }
 0x11a   : > { %1877 = vmatpush.bf16.msra.mxu1 %v6278_v10  ;;  %1890 = vmatpush.bf16.msra.mxu2 %v6556_v15  ;;  %v1070_v10 = vpop.f32.mrf.mxu1  ;;  %v8328_v15 = vld [vmem:[#allocation28_spill] sm:$0xff] }
 0x11b   : > { %1903 = vmatpush.bf16.msra.mxu3 %v6558_v31  ;;  %1846 = vmatmul.bf16.vlgmr.msrb.gmra.mxu2 %v6870_v39 }
 0x11c   : > { %1859 = vmatmul.bf16.vlgmr.msrb.gmra.mxu3 %v6870_v39  ;;  %v8339_v39 = vld [vmem:[#allocation19_spill] sm:$0xff] }
 0x11d   : > { %1865 = vmatpush.bf16.msra.mxu0 %v6305_v7  ;;  %v1083_v7 = vpop.f32.mrf.mxu2 }
 0x11e   : > { %1878 = vmatpush.bf16.msra.mxu1 %v6318_v48  ;;  %1891 = vmatpush.bf16.msra.mxu2 %v6596_v56  ;;  %v8329_v56 = vld [vmem:[#allocation10_spill] sm:$0xff] }
 0x11f   : > { %1904 = vmatpush.bf16.msra.mxu3 %v6603_v8  ;;  %v1096_v48 = vpop.f32.mrf.mxu3  ;;  %v8332_v8 = vld [vmem:[#allocation15_spill] sm:$0xff] }
 0x121   : > { %1866 = vmatpush.bf16.msra.mxu0 %v6343_v57  ;;  %v1059_v57 = vpop.f32.mrf.mxu0 }
 0x122   : > { %1879 = vmatpush.bf16.msra.mxu1 %v6355_v29  ;;  %1892 = vmatpush.bf16.msra.mxu2 %v6638_v22  ;;  %v8323_v29 = vld [vmem:[#allocation23_spill] sm:$0xff]  ;;  %v1072_v3 = vpop.f32.mrf.mxu1  ;;  %v8333_v22 = vld [vmem:[#allocation12_spill] sm:$0xff] }
 0x123   : > { %1905 = vmatpush.bf16.msra.mxu3 %v6643_v40  ;;  %v8334_v40 = vld [vmem:[#allocation13_spill] sm:$0xff] }
 0x125   : > { %1867 = vmatpush.bf16.msra.mxu0 %v6379_v34  ;;  %v8326_v34 = vld [vmem:[#allocation9_spill] sm:$0xff]  ;;  %v1085_v60 = vpop.f32.mrf.mxu2 }
 0x126   : > { %1880 = vmatpush.bf16.msra.mxu1 %v6391_v58  ;;  %1893 = vmatpush.bf16.msra.mxu2 %v6675_v46  ;;  %v8327_v58 = vld [vmem:[#allocation27_spill] sm:$0xff]  ;;  %v8335_v46 = vld [vmem:[#allocation14_spill] sm:$0xff] }
 0x127   : > { %1906 = vmatpush.bf16.msra.mxu3 %v6682_v14  ;;  %v1098_v31 = vpop.f32.mrf.mxu3  ;;  %v8336_v14 = vld [vmem:[#allocation16_spill] sm:$0xff] }
 0x128   : > { %v5066_v31 = vld [vmem:[%s8200_s3 + $0x64] sm:$0xf0] }
 0x129   : > { %1868 = vmatpush.bf16.msra.mxu0 %v6415_v51  ;;  %v8330_v51 = vld [vmem:[#allocation11_spill] sm:$0xff] }
 0x12a   : > { %1881 = vmatpush.bf16.msra.mxu1 %v6427_v20  ;;  %1894 = vmatpush.bf16.msra.mxu2 %v8323_v29  ;;  %v8331_v20 = vld [vmem:[#allocation31_spill] sm:$0xff] }
 0x12b   : > { %1907 = vmatpush.bf16.msra.mxu3 %v8324_v5 }
 0x12d   : > { %1869 = vmatpush.bf16.msra.mxu0 %v8325_v27 }
 0x12e   : > { %1882 = vmatpush.bf16.msra.mxu1 %v8326_v34  ;;  %1895 = vmatpush.bf16.msra.mxu2 %v8327_v58  ;;  %v1182_v34 = vld [vmem:[#allocation2] sm:$0xf] }
 0x12f   : > { %1908 = vmatpush.bf16.msra.mxu3 %v8328_v15  ;;  %v4348_v15 = vld [vmem:[%s8200_s3 + $0x60] sm:$0xf] }
 0x131   : > { %1870 = vmatpush.bf16.msra.mxu0 %v8329_v56  ;;  %v4350_v56 = vld [vmem:[%s8200_s3 + $0x68] sm:$0xf0] }
 0x132   : > { %1883 = vmatpush.bf16.msra.mxu1 %v8330_v51  ;;  %1896 = vmatpush.bf16.msra.mxu2 %v8331_v20  ;;  %v7137_v51 = vor.u32 %v5066_v31, %v4348_v15  ;;  %v4340_v20 = vld [vmem:[%s8200_s3 + $0x50] sm:$0xf] }
 0x133   : > { %1909 = vmatpush.bf16.msra.mxu3 %v6800_v55  ;;  %v8337_v55 = vld [vmem:[#allocation17_spill] sm:$0xff] }
 0x135   : > { %1871 = vmatpush.bf16.msra.mxu0 %v8332_v8 }
 0x136   : > { %1884 = vmatpush.bf16.msra.mxu1 %v8333_v22  ;;  %1897 = vmatpush.bf16.msra.mxu2 %v6832_v44  ;;  %v8338_v44 = vld [vmem:[#allocation18_spill] sm:$0xff] }
 0x137   : > { %1910 = vmatpush.bf16.msra.mxu3 %v6842_v19  ;;  %v1058_v19 = vadd.f32 %v1057_v24, %v6964_v49  ;;  %v8342_v49 = vld [vmem:[#allocation22_spill] sm:$0xff] }
 0x138   : > { %1872 = vmatmul.bf16.vlgmr.msra.gmra.mxu0 %v8336_v14 }
 0x139   : > { %1918 = vmatpush.bf16.msrb.mxu0 %v8334_v40  ;;  %1898 = vmatmul.bf16.vlgmr.msra.gmra.mxu2 %v6860_v47  ;;  %v1100_v1 = vadd.f32 %v1083_v7, %v1058_v19  ;;  %v5062_v40 = vld [vmem:[%s8200_s3 + $0x44] sm:$0xf0] }
 0x13a   : > { %1931 = vmatpush.bf16.msrb.mxu1 %v8335_v46  ;;  %1957 = vmatpush.bf16.msrb.mxu2 %v6849_v50  ;;  %v1111_v50 = vpop.f32.mrf.mxu0  ;;  %v5061_v46 = vld [vmem:[%s8200_s3 + $0x44] sm:$0xf] }
 0x13b   : > { %1970 = vmatpush.bf16.msrb.mxu3 %v6851_v33  ;;  %1885 = vmatmul.bf16.vlgmr.msra.gmra.mxu1 %v8336_v14  ;;  %v1071_v33 = vadd.f32 %v1070_v10, %v6966_v38  ;;  %v8345_v10 = vld [vmem:[#allocation29_spill] sm:$0xff] }
 0x13c   : > { %1911 = vmatmul.bf16.vlgmr.msra.gmra.mxu3 %v6860_v47  ;;  %v1124_v47 = vpop.f32.mrf.mxu1 }
 0x13d   : > { %1919 = vmatpush.bf16.msrb.mxu0 %v8337_v55  ;;  %v1101_v28 = vadd.f32 %v1096_v48, %v1071_v33  ;;  %v8346_v48 = vld [vmem:[#allocation30_spill] sm:$0xff] }
 0x13e   : > { %1932 = vmatpush.bf16.msrb.mxu1 %v8338_v44  ;;  %1958 = vmatpush.bf16.msrb.mxu2 %v6874_v17  ;;  %v1947_v17 = vunpack.c.l.b16 %v8336_v14  ;;  %v1150_v43 = vpop.f32.mrf.mxu2  ;;  %v4334_v14 = vld [vmem:[%s8200_s3 + $0x48] sm:$0xf0]  ;;  %v5060_v33 = vld [vmem:[%s8200_s3 + $0x34] sm:$0xf0] }
 0x13f   : > { %1971 = vmatpush.bf16.msrb.mxu3 %v6878_v32  ;;  %v1128_v32 = vadd.f32 %v1111_v50, %v1100_v1  ;;  %v1129_v38 = vadd.f32 %v1124_v47, %v1101_v28  ;;  %v1163_v6 = vpop.f32.mrf.mxu3  ;;  %v7178_v19 = vor.u32 %v5061_v46, %v4334_v14  ;;  %v4324_v50 = vld [vmem:[%s8200_s3 + $0x30] sm:$0xf]  ;;  %v5059_v47 = vld [vmem:[%s8200_s3 + $0x34] sm:$0xf]  ;;  %v4284_v14 = vld [vmem:[%s8200_s3 + $0xe0] sm:$0xf] }
 0x140   : > { %v1948_v45 = vpack.c.b16 %v1947_v17, %v1947_v17  ;;  %v7193_v1 = vor.u32 %v5060_v33, %v4324_v50  ;;  %v5058_v17 = vld [vmem:[%s8200_s3 + $0x24] sm:$0xf0]  ;;  %v5081_v50 = vld [vmem:[%s8200_s3 + $0xe4] sm:$0xf] }
 0x141   : > { %1920 = vmatpush.bf16.msrb.mxu0 %v8339_v39  ;;  %v1167_v53 = vadd.f32 %v1150_v43, %v1128_v32 }
 0x142   : > { %1933 = vmatpush.bf16.msrb.mxu1 %v8340_v2  ;;  %1959 = vmatpush.bf16.msrb.mxu2 %v6898_v23  ;;  %v1113_v23 = vpop.f32.mrf.mxu0  ;;  %v1952_v7 = vshll.u32 %v1948_v45, 16  ;;  %v1950_v3 = vshrl.u32 %v1948_v45, 16  ;;  %v4326_v2 = vld [vmem:[%s8200_s3 + $0x38] sm:$0xf0]  ;;  %v4308_v45 = vld [vmem:[%s8200_s3 + $0x10] sm:$0xf] }
 0x143   : > { %1972 = vmatpush.bf16.msrb.mxu3 %v6902_v0  ;;  %v1168_v0 = vadd.f32 %v1163_v6, %v1129_v38  ;;  %v1169_v62 = vmax.f32 %v6919_v35, %v1167_v53  ;;  %v7196_v28 = vor.u32 %v5059_v47, %v4326_v2  ;;  %v4318_v38 = vld [vmem:[%s8200_s3 + $0x28] sm:$0xf0] }
 0x144   : > { %v1126_v21 = vpop.f32.mrf.mxu1  ;;  %v1954_v5 = vrot.slane %v1952_v7, 1  ;;  %v5054_v7 = vld [vmem:[%s8200_s3 + $0x4] sm:$0xf0]  ;;  %v4286_v2 = vld [vmem:[%s8200_s3 + $0xe8] sm:$0xf0] }
 0x145   : > { %1921 = vmatpush.bf16.msrb.mxu0 %v8341_v36  ;;  %v4316_v36 = vld [vmem:[%s8200_s3 + $0x20] sm:$0xf]  ;;  %v5056_v21 = vld [vmem:[%s8200_s3 + $0x14] sm:$0xf0] }
 0x146   : > { %1934 = vmatpush.bf16.msrb.mxu1 %v8342_v49  ;;  %1960 = vmatpush.bf16.msrb.mxu2 %v6921_v63  ;;  %v1170_v63 = vmax.f32 %v6926_v37, %v1168_v0  ;;  %v1152_v35 = vpop.f32.mrf.mxu2  ;;  %v4356_v37 = vld [vmem:[%s8200_s3 + $0x70] sm:$0xf]  ;;  %v5057_v49 = vld [vmem:[%s8200_s3 + $0x24] sm:$0xf]  ;;  %v7211_v23 = vor.u32 %v5058_v17, %v4316_v36  ;;  %v7294_v17 = vor.u32 %v5081_v50, %v4286_v2  ;;  %v4502_v50 = vld [vmem:[%s8200_s3 + $0x1d8] sm:$0xf0] }
 0x147   : > { %1973 = vmatpush.bf16.msrb.mxu3 %v6928_v52  ;;  %v5228_v52 = vld [vmem:[%s8199_s2] ss:$0 sm:$0xff]  ;;  %v1165_v29 = vpop.f32.mrf.mxu3  ;;  %v7214_v0 = vor.u32 %v5057_v49, %v4318_v38  ;;  %v4302_v35 = vld [vmem:[%s8200_s3 + $0x8] sm:$0xf0]  ;;  %v5080_v49 = vld [vmem:[%s8200_s3 + $0xd4] sm:$0xf0] }
 0x148   : > { %v1171_v24 = vmax.f32 %v1169_v62, %v1170_v63  ;;  %v5055_v62 = vld [vmem:[%s8200_s3 + $0x14] sm:$0xf]  ;;  %v4310_v63 = vld [vmem:[%s8200_s3 + $0x18] sm:$0xf0]  ;;  %v4252_v2 = vld [vmem:[%s8200_s3 + $0xa0] sm:$0xf] }
 0x149   : > { %1922 = vmatpush.bf16.msrb.mxu0 %v8343_v61  ;;  %v5079_v38 = vld [vmem:[%s8200_s3 + $0xd4] sm:$0xf] }
 0x14a   : > { %1935 = vmatpush.bf16.msrb.mxu1 %v8344_v59  ;;  %1961 = vmatpush.bf16.msrb.mxu2 %v6945_v26  ;;  %v1176_v57 = vadd.f32 %v5228_v52, %v1171_v24  ;;  %v5068_v26 = vld [vmem:[%s8200_s3 + $0x74] sm:$0xf0]  ;;  %v7229_v52 = vor.u32 %v5056_v21, %v4308_v45  ;;  %v7232_v24 = vor.u32 %v5055_v62, %v4310_v63  ;;  %v5115_v21 = vld [vmem:[%s8200_s3 + $0x1f4] sm:$0xf]  ;;  %v4518_v63 = vld [vmem:[%s8200_s3 + $0x1f8] sm:$0xf0] }
 0x14b   : > { %1974 = vmatpush.bf16.msrb.mxu3 %v6949_v12  ;;  %v5067_v12 = vld [vmem:[%s8200_s3 + $0x74] sm:$0xf]  ;;  %v7114_v60 = vor.u32 %v5068_v26, %v4356_v37  ;;  %v5116_v45 = vld [vmem:[%s8200_s3 + $0x1f4] sm:$0xf0] }
 0x14d   : > { %1923 = vmatpush.bf16.msrb.mxu0 %v8345_v10  ;;  %v4300_v10 = vld [vmem:[%s8200_s3] sm:$0xf] }
 0x14e   : > { %1936 = vmatpush.bf16.msrb.mxu1 %v8346_v48  ;;  %1962 = vmatpush.bf16.msrb.mxu2 %v6969_v11  ;;  %v1177_v11 = vmax.f32 %v1176_v57, 0.0  ;;  %v5053_v57 = vld [vmem:[%s8200_s3 + $0x4] sm:$0xf]  ;;  %v7247_v26 = vor.u32 %v5054_v7, %v4300_v10  ;;  %v4268_v10 = vld [vmem:[%s8200_s3 + $0xc0] sm:$0xf] }
 0x14f   : > { %1975 = vmatpush.bf16.msrb.mxu3 %v6973_v25  ;;  %v4358_v25 = vld [vmem:[%s8200_s3 + $0x78] sm:$0xf0]  ;;  %v5078_v7 = vld [vmem:[%s8200_s3 + $0xc4] sm:$0xf0] }
 0x150   : > { %v1178_v58 = vpack.c.bf16 %v1177_v11, %v1177_v11 }
 0x151   : > { %1924 = vmatpush.bf16.msrb.mxu0 %v6802_v13  ;;  %v7116_v13 = vor.u32 %v5067_v12, %v4358_v25  ;;  %v7250_v12 = vor.u32 %v5053_v57, %v4302_v35  ;;  %v7340_v35 = vor.u32 %v5115_v21, %v4518_v63 }
 0x152   : > { %1937 = vmatpush.bf16.msrb.mxu1 %v6811_v30  ;;  %1963 = vmatpush.bf16.msrb.mxu2 %v6989_v16  ;;  %v1183_v30 = vsel %vm7107_vm2, %v1178_v58, %v1182_v34  ;;  %v1955_v16 = vor.u32 %v1954_v5, %v1950_v3 }
 0x153   : > { %1976 = vmatpush.bf16.msrb.mxu3 %v6993_v54  ;;  %v5065_v54 = vld [vmem:[%s8200_s3 + $0x64] sm:$0xf]  ;;  %1184 = vst [vmem:[#allocation2] sm:$0xf] %v1183_v30 }
 0x155   : > { %1925 = vmatpush.bf16.msrb.mxu0 %v6844_v42  ;;  %v7141_v42 = vor.u32 %v5065_v54, %v4350_v56  ;;  %v1308_v44 = vpop.f32.mrf.mxu0  ;;  %v4292_v56 = vld [vmem:[%s8200_s3 + $0xf0] sm:$0xf] }
 0x156   : > { %1938 = vmatpush.bf16.msrb.mxu1 %v6847_v4  ;;  %1964 = vmatpush.bf16.msrb.mxu2 %v7009_v9  ;;  %v5064_v4 = vld [vmem:[%s8200_s3 + $0x54] sm:$0xf0]  ;;  %v5063_v9 = vld [vmem:[%s8200_s3 + $0x54] sm:$0xf] }
 0x157   : > { %1977 = vmatpush.bf16.msrb.mxu3 %v7013_v41  ;;  %v4342_v41 = vld [vmem:[%s8200_s3 + $0x58] sm:$0xf0]  ;;  %v7157_v8 = vor.u32 %v5064_v4, %v4340_v20  ;;  %v5084_v20 = vld [vmem:[%s8200_s3 + $0xf4] sm:$0xf0]  ;;  %v5083_v4 = vld [vmem:[%s8200_s3 + $0xf4] sm:$0xf] }
 0x158   : > { %1926 = vmatmul.bf16.vlgmr.msrb.gmra.mxu0 %v7017_v18  ;;  %v7160_v22 = vor.u32 %v5063_v9, %v4342_v41  ;;  %v1321_v39 = vpop.f32.mrf.mxu1  ;;  %v7267_v41 = vor.u32 %v5084_v20, %v4292_v56  ;;  %v5076_v56 = vld [vmem:[%s8200_s3 + $0xb4] sm:$0xf0]  ;;  %v5075_v20 = vld [vmem:[%s8200_s3 + $0xb4] sm:$0xf] }
 0x159   : > { %1939 = vmatmul.bf16.vlgmr.msrb.gmra.mxu1 %v7017_v18  ;;  %1965 = vmatmul.bf16.vlgmr.msrb.gmra.mxu2 %v1955_v16  ;;  %v4332_v18 = vld [vmem:[%s8200_s3 + $0x40] sm:$0xf] }
 0x15a   : > { %2220 = vmatpush.bf16.msra.mxu2 %v7114_v60  ;;  %1978 = vmatmul.bf16.vlgmr.msrb.gmra.mxu3 %v1955_v16  ;;  %v7175_v55 = vor.u32 %v5062_v40, %v4332_v18  ;;  %v7254_v29 = vld [vmem:[#allocation2] sm:$0x7]  ;;  %v4294_v18 = vld [vmem:[%s8200_s3 + $0xf8] sm:$0xf0] }
 0x15b   : > { %2233 = vmatpush.bf16.msra.mxu3 %v7116_v13  ;;  %v7272_v40 = vor.u32 %v5083_v4, %v4294_v18  ;;  %2114 = vmatpush.bf16.msra.mxu0 %v7267_v41  ;;  %v4500_v18 = vld [vmem:[%s8200_s3 + $0x1d0] sm:$0xf]  ;;  %v2264_v27 = vunpack.c.l.b16 %v7254_v29 }
 0x15c   : > { %v1414_v32 = vpop.f32.mrf.mxu2 }
 0x15d   : > { %v1415_v43 = vadd.f32 %v1414_v32, %v1308_v44  ;;  %v1310_v61 = vpop.f32.mrf.mxu0  ;;  %2127 = vmatpush.bf16.msra.mxu1 %v7272_v40  ;;  %v5082_v44 = vld [vmem:[%s8200_s3 + $0xe4] sm:$0xf0]  ;;  %v4276_v32 = vld [vmem:[%s8200_s3 + $0xd0] sm:$0xf] }
 0x15e   : > { %2221 = vmatpush.bf16.msra.mxu2 %v7137_v51  ;;  %v7287_v47 = vor.u32 %v5082_v44, %v4284_v14  ;;  %v4516_v61 = vld [vmem:[%s8200_s3 + $0x1f0] sm:$0xf]  ;;  %v5111_v44 = vld [vmem:[%s8200_s3 + $0x1d4] sm:$0xf] }
 0x15f   : > { %2234 = vmatpush.bf16.msra.mxu3 %v7141_v42  ;;  %v1427_v53 = vpop.f32.mrf.mxu3  ;;  %v7326_v62 = vor.u32 %v5116_v45, %v4516_v61  ;;  %v4492_v61 = vld [vmem:[%s8200_s3 + $0x1c0] sm:$0xf]  ;;  %v5110_v45 = vld [vmem:[%s8200_s3 + $0x1c4] sm:$0xf0] }
 0x160   : > { %v1428_v6 = vadd.f32 %v1427_v53, %v1321_v39  ;;  %v1323_v59 = vpop.f32.mrf.mxu1  ;;  %2115 = vmatpush.bf16.msra.mxu0 %v7287_v47  ;;  %v4278_v53 = vld [vmem:[%s8200_s3 + $0xd8] sm:$0xf0] }
 0x161   : > { %2128 = vmatpush.bf16.msra.mxu1 %v7294_v17 }
 0x162   : > { %2222 = vmatpush.bf16.msra.mxu2 %v7157_v8 }
 0x163   : > { %2235 = vmatpush.bf16.msra.mxu3 %v7160_v22 }
 0x164   : > { %v1416_v48 = vpop.f32.mrf.mxu2 }
 0x166   : > { %2223 = vmatpush.bf16.msra.mxu2 %v7175_v55 }
 0x167   : > { %2236 = vmatpush.bf16.msra.mxu3 %v7178_v19  ;;  %v1429_v37 = vpop.f32.mrf.mxu3 }
 0x168   : > { %v7342_v37 = vor.u32 %v5078_v7, %v4268_v10  ;;  %v5109_v10 = vld [vmem:[%s8200_s3 + $0x1c4] sm:$0xf]  ;;  %v4494_v7 = vld [vmem:[%s8200_s3 + $0x1c8] sm:$0xf0] }
 0x16a   : > { %2224 = vmatpush.bf16.msra.mxu2 %v7193_v1 }
 0x16b   : > { %2237 = vmatpush.bf16.msra.mxu3 %v7196_v28 }
 0x16e   : > { %2225 = vmatpush.bf16.msra.mxu2 %v7211_v23 }
 0x16f   : > { %2238 = vmatpush.bf16.msra.mxu3 %v7214_v0 }
 0x172   : > { %2226 = vmatpush.bf16.msra.mxu2 %v7229_v52 }
 0x173   : > { %2239 = vmatpush.bf16.msra.mxu3 %v7232_v24 }
 0x175   : > { %v1548_v11 = vpop.f32.mrf.mxu0 }
 0x176   : > { %2227 = vmatpush.bf16.msra.mxu2 %v7247_v26  ;;  %v1565_v25 = vadd.f32 %v1548_v11, %v1415_v43  ;;  %v7307_v43 = vor.u32 %v5080_v49, %v4276_v32  ;;  %v5077_v11 = vld [vmem:[%s8200_s3 + $0xc4] sm:$0xf]  ;;  %v5074_v32 = vld [vmem:[%s8200_s3 + $0xa4] sm:$0xf0] }
 0x177   : > { %2240 = vmatpush.bf16.msra.mxu3 %v7250_v12  ;;  %v5073_v49 = vld [vmem:[%s8200_s3 + $0xa4] sm:$0xf]  ;;  %v7425_v63 = vor.u32 %v5074_v32, %v4252_v2 }
 0x178   : > { %v1561_v3 = vpop.f32.mrf.mxu1  ;;  %2116 = vmatpush.bf16.msra.mxu0 %v7307_v43  ;;  %v5069_v2 = vld [vmem:[%s8200_s3 + $0x84] sm:$0xf] }
 0x179   : > { %2228 = vmatmul.bf16.vlgmr.msra.gmra.mxu2 %v7254_v29  ;;  %v1566_v5 = vadd.f32 %v1561_v3, %v1428_v6  ;;  %v7312_v6 = vor.u32 %v5079_v38, %v4278_v53  ;;  %v4508_v3 = vld [vmem:[%s8200_s3 + $0x1e0] sm:$0xf]  ;;  %v7413_v38 = vor.u32 %v5111_v44, %v4502_v50  ;;  %v4254_v53 = vld [vmem:[%s8200_s3 + $0xa8] sm:$0xf0]  ;;  %v5070_v50 = vld [vmem:[%s8200_s3 + $0x84] sm:$0xf0] }
 0x17a   : > { %2241 = vmatmul.bf16.vlgmr.msra.gmra.mxu3 %v7254_v29  ;;  %2490 = vmatpush.bf16.msrb.mxu2 %v7326_v62  ;;  %v4236_v44 = vld [vmem:[%s8200_s3 + $0x80] sm:$0xf]  ;;  %v4590_v29 = vld [vmem:[%s8200_s3 + $0x268] sm:$0xf0] }
 0x17b   : > { %2129 = vmatpush.bf16.msra.mxu1 %v7312_v6  ;;  %2503 = vmatpush.bf16.msrb.mxu3 %v7340_v35 }
 0x17c   : > { %v1684_v34 = vpop.f32.mrf.mxu2  ;;  %2117 = vmatpush.bf16.msra.mxu0 %v7342_v37 }
 0x17d   : > { %v1701_v58 = vadd.f32 %v1684_v34, %v1565_v25  ;;  %v1550_v30 = vpop.f32.mrf.mxu0  ;;  %v4270_v25 = vld [vmem:[%s8200_s3 + $0xc8] sm:$0xf0] }
 0x17e   : > { %v7354_v34 = vor.u32 %v5077_v11, %v4270_v25  ;;  %v7434_v11 = vor.u32 %v5073_v49, %v4254_v53  ;;  %v4244_v25 = vld [vmem:[%s8200_s3 + $0x90] sm:$0xf]  ;;  %v4238_v49 = vld [vmem:[%s8200_s3 + $0x88] sm:$0xf0] }
 0x17f   : > { %v1697_v15 = vpop.f32.mrf.mxu3  ;;  %v4436_v53 = vld [vmem:[%s8200_s3 + $0x170] sm:$0xf] }
 0x180   : > { %v1702_v31 = vadd.f32 %v1697_v15, %v1566_v5  ;;  %v1563_v16 = vpop.f32.mrf.mxu1  ;;  %v5113_v15 = vld [vmem:[%s8200_s3 + $0x1e4] sm:$0xf]  ;;  %2130 = vmatpush.bf16.msra.mxu1 %v7354_v34 }
 0x184   : > { %v1686_v54 = vpop.f32.mrf.mxu2 }
 0x185   : > { %v4260_v54 = vld [vmem:[%s8200_s3 + $0xb0] sm:$0xf] }
 0x186   : > { %v7380_v4 = vor.u32 %v5076_v56, %v4260_v54  ;;  %v4484_v54 = vld [vmem:[%s8200_s3 + $0x1b0] sm:$0xf]  ;;  %v5108_v56 = vld [vmem:[%s8200_s3 + $0x1b4] sm:$0xf0] }
 0x187   : > { %v1699_v9 = vpop.f32.mrf.mxu3  ;;  %v7482_v32 = vor.u32 %v5108_v56, %v4484_v54  ;;  %v5105_v54 = vld [vmem:[%s8200_s3 + $0x1a4] sm:$0xf] }
 0x188   : > { %v4262_v9 = vld [vmem:[%s8200_s3 + $0xb8] sm:$0xf0]  ;;  %2118 = vmatpush.bf16.msra.mxu0 %v7380_v4 }
 0x189   : > { %v7392_v14 = vor.u32 %v5075_v20, %v4262_v9  ;;  %v5107_v9 = vld [vmem:[%s8200_s3 + $0x1b4] sm:$0xf]  ;;  %8350 = vst [vmem:[#allocation24_spill] sm:$0xff] %v7482_v32 }
 0x18b   : > { %2131 = vmatpush.bf16.msra.mxu1 %v7392_v14 }
 0x18c   : > { %2119 = vmatpush.bf16.msra.mxu0 %v7425_v63 }
 0x18f   : > { %2132 = vmatpush.bf16.msra.mxu1 %v7434_v11 }
 0x195   : > { %v1819_v46 = vpop.f32.mrf.mxu0 }
 0x196   : > { %v7285_v33 = vadd.f32 %v1819_v46, %v1701_v58  ;;  %v1832_v39 = vpop.f32.mrf.mxu1  ;;  %v5114_v58 = vld [vmem:[%s8200_s3 + $0x1e4] sm:$0xf0]  ;;  %v5112_v46 = vld [vmem:[%s8200_s3 + $0x1d4] sm:$0xf0] }
 0x197   : > { %v7292_v36 = vadd.f32 %v1832_v39, %v1702_v31  ;;  %v4510_v31 = vld [vmem:[%s8200_s3 + $0x1e8] sm:$0xf0]  ;;  %v7366_v30 = vor.u32 %v5114_v58, %v4508_v3  ;;  %v7401_v39 = vor.u32 %v5112_v46, %v4500_v18  ;;  %v5072_v3 = vld [vmem:[%s8200_s3 + $0x94] sm:$0xf0]  ;;  %v5071_v58 = vld [vmem:[%s8200_s3 + $0x94] sm:$0xf] }
 0x198   : > { %v7368_v16 = vor.u32 %v5113_v15, %v4510_v31  ;;  %v4246_v15 = vld [vmem:[%s8200_s3 + $0x98] sm:$0xf0]  ;;  %v7452_v31 = vor.u32 %v5109_v10, %v4494_v7  ;;  %v7461_v20 = vor.u32 %v5072_v3, %v4244_v25  ;;  %v7503_v7 = vor.u32 %v5070_v50, %v4236_v44  ;;  %v4428_v44 = vld [vmem:[%s8200_s3 + $0x160] sm:$0xf]  ;;  %v5098_v50 = vld [vmem:[%s8200_s3 + $0x164] sm:$0xf0] }
 0x199   : > { %2491 = vmatpush.bf16.msrb.mxu2 %v7366_v30  ;;  %v4486_v18 = vld [vmem:[%s8200_s3 + $0x1b8] sm:$0xf0]  ;;  %v7470_v46 = vor.u32 %v5071_v58, %v4246_v15  ;;  %v4476_v58 = vld [vmem:[%s8200_s3 + $0x1a0] sm:$0xf]  ;;  %v5106_v15 = vld [vmem:[%s8200_s3 + $0x1a4] sm:$0xf0] }
 0x19a   : > { %2504 = vmatpush.bf16.msrb.mxu3 %v7368_v16  ;;  %8349 = vst [vmem:[#allocation23_spill] sm:$0xff] %v7452_v31  ;;  %v4438_v10 = vld [vmem:[%s8200_s3 + $0x178] sm:$0xf0]  ;;  %2120 = vmatpush.bf16.msra.mxu0 %v7461_v20  ;;  %v7524_v56 = vor.u32 %v5106_v15, %v4476_v58 }
 0x19b   : > { %2133 = vmatpush.bf16.msra.mxu1 %v7470_v46 }
 0x19c   : > { %8352 = vst [vmem:[#allocation9_spill] sm:$0xff] %v7524_v56 }
 0x19d   : > { %v1821_v57 = vpop.f32.mrf.mxu0  ;;  %2492 = vmatpush.bf16.msrb.mxu2 %v7401_v39 }
 0x19e   : > { %v7323_v59 = vpop.f32.mrf.mxu2  ;;  %v1834_v5 = vpop.f32.mrf.mxu1  ;;  %2505 = vmatpush.bf16.msrb.mxu3 %v7413_v38  ;;  %2121 = vmatpush.bf16.msra.mxu0 %v7503_v7 }
 0x19f   : > { %v7337_v48 = vpop.f32.mrf.mxu3  ;;  %v7443_v5 = vor.u32 %v5110_v45, %v4492_v61  ;;  %v5100_v61 = vld [vmem:[%s8200_s3 + $0x174] sm:$0xf0]  ;;  %v7494_v45 = vor.u32 %v5107_v9, %v4486_v18  ;;  %v4478_v9 = vld [vmem:[%s8200_s3 + $0x1a8] sm:$0xf0] }
 0x1a0   : > { %v7508_v25 = vor.u32 %v5100_v61, %v4436_v53  ;;  %v7531_v18 = vor.u32 %v5105_v54, %v4478_v9  ;;  %v4430_v53 = vld [vmem:[%s8200_s3 + $0x168] sm:$0xf0]  ;;  %v4468_v61 = vld [vmem:[%s8200_s3 + $0x190] sm:$0xf]  ;;  %v5103_v54 = vld [vmem:[%s8200_s3 + $0x194] sm:$0xf] }
 0x1a1   : > { %2493 = vmatpush.bf16.msrb.mxu2 %v7443_v5  ;;  %8351 = vst [vmem:[#allocation8_spill] sm:$0xff] %v7494_v45  ;;  %v4470_v9 = vld [vmem:[%s8200_s3 + $0x198] sm:$0xf0] }
 0x1a2   : > { %2506 = vmatpush.bf16.msrb.mxu3 %v7452_v31  ;;  %2354 = vmatpush.bf16.msrb.mxu0 %v7508_v25  ;;  %8353 = vst [vmem:[#allocation27_spill] sm:$0xff] %v7531_v18 }
 0x1a5   : > { %2494 = vmatpush.bf16.msrb.mxu2 %v7482_v32 }
 0x1a6   : > { %v1849_v21 = vpop.f32.mrf.mxu2  ;;  %2507 = vmatpush.bf16.msrb.mxu3 %v7494_v45 }
 0x1a7   : > { %v1862_v57 = vpop.f32.mrf.mxu3  ;;  %v5099_v21 = vld [vmem:[%s8200_s3 + $0x174] sm:$0xf] }
 0x1a8   : > { %v7506_v57 = vor.u32 %v5069_v2, %v4238_v49  ;;  %v7511_v3 = vor.u32 %v5099_v21, %v4438_v10  ;;  %v5097_v2 = vld [vmem:[%s8200_s3 + $0x164] sm:$0xf]  ;;  %v7545_v49 = vor.u32 %v5098_v50, %v4428_v44  ;;  %v5104_v21 = vld [vmem:[%s8200_s3 + $0x194] sm:$0xf0]  ;;  %v7571_v50 = vor.u32 %v5103_v54, %v4470_v9  ;;  %v4422_v54 = vld [vmem:[%s8200_s3 + $0x158] sm:$0xf0] }
 0x1a9   : > { %2495 = vmatpush.bf16.msrb.mxu2 %v7524_v56  ;;  %v7558_v58 = vor.u32 %v5097_v2, %v4430_v53  ;;  %v7560_v15 = vor.u32 %v5104_v21, %v4468_v61  ;;  %v4420_v2 = vld [vmem:[%s8200_s3 + $0x150] sm:$0xf]  ;;  %v5096_v53 = vld [vmem:[%s8200_s3 + $0x154] sm:$0xf0]  ;;  %v5095_v61 = vld [vmem:[%s8200_s3 + $0x154] sm:$0xf] }
 0x1aa   : > { %2134 = vmatpush.bf16.msra.mxu1 %v7506_v57  ;;  %2508 = vmatpush.bf16.msrb.mxu3 %v7531_v18  ;;  %8355 = vst [vmem:[#allocation10_spill] sm:$0xff] %v7571_v50  ;;  %v7585_v21 = vor.u32 %v5096_v53, %v4420_v2  ;;  %v4460_v9 = vld [vmem:[%s8200_s3 + $0x180] sm:$0xf]  ;;  %v7596_v18 = vor.u32 %v5095_v61, %v4422_v54  ;;  %v5101_v2 = vld [vmem:[%s8200_s3 + $0x184] sm:$0xf] }
 0x1ab   : > { %8354 = vst [vmem:[#allocation28_spill] sm:$0xff] %v7560_v15  ;;  %2355 = vmatpush.bf16.msrb.mxu0 %v7545_v49  ;;  %v4462_v53 = vld [vmem:[%s8200_s3 + $0x188] sm:$0xf0]  ;;  %v5094_v61 = vld [vmem:[%s8200_s3 + $0x144] sm:$0xf0] }
 0x1ac   : > { %v7609_v45 = vor.u32 %v5101_v2, %v4462_v53  ;;  %v5093_v54 = vld [vmem:[%s8200_s3 + $0x144] sm:$0xf]  ;;  %v4414_v2 = vld [vmem:[%s8200_s3 + $0x148] sm:$0xf0] }
 0x1ad   : > { %2496 = vmatpush.bf16.msrb.mxu2 %v7560_v15  ;;  %v5102_v15 = vld [vmem:[%s8200_s3 + $0x184] sm:$0xf0] }
 0x1ae   : > { %2367 = vmatpush.bf16.msrb.mxu1 %v7511_v3  ;;  %2509 = vmatpush.bf16.msrb.mxu3 %v7571_v50  ;;  %v7598_v56 = vor.u32 %v5102_v15, %v4460_v9  ;;  %8357 = vst [vmem:[#allocation31_spill] sm:$0xff] %v7609_v45  ;;  %v4412_v15 = vld [vmem:[%s8200_s3 + $0x140] sm:$0xf] }
 0x1af   : > { %2356 = vmatpush.bf16.msrb.mxu0 %v7585_v21  ;;  %v7626_v9 = vor.u32 %v5094_v61, %v4412_v15  ;;  %v5092_v15 = vld [vmem:[%s8200_s3 + $0x134] sm:$0xf0]  ;;  %v5091_v61 = vld [vmem:[%s8200_s3 + $0x134] sm:$0xf] }
 0x1b0   : > { %8356 = vst [vmem:[#allocation11_spill] sm:$0xff] %v7598_v56 }
 0x1b1   : > { %2497 = vmatpush.bf16.msrb.mxu2 %v7598_v56  ;;  %v7632_v56 = vor.u32 %v5093_v54, %v4414_v2 }
 0x1b2   : > { %2368 = vmatpush.bf16.msrb.mxu1 %v7558_v58  ;;  %2510 = vmatpush.bf16.msrb.mxu3 %v7609_v45 }
 0x1b3   : > { %2357 = vmatpush.bf16.msrb.mxu0 %v7626_v9 }
 0x1b5   : > { %v7556_v10 = vpop.f32.mrf.mxu0  ;;  %2649 = vmatpush.bf16.msra.mxu2 %v7267_v41  ;;  %v4404_v41 = vld [vmem:[%s8200_s3 + $0x130] sm:$0xf] }
 0x1b6   : > { %2369 = vmatpush.bf16.msrb.mxu1 %v7596_v18  ;;  %2662 = vmatpush.bf16.msra.mxu3 %v7272_v40  ;;  %v7646_v40 = vor.u32 %v5092_v15, %v4404_v41  ;;  %v5090_v41 = vld [vmem:[%s8200_s3 + $0x124] sm:$0xf0] }
 0x1b8   : > { %v7568_v44 = vpop.f32.mrf.mxu1  ;;  %2358 = vmatpush.bf16.msrb.mxu0 %v7646_v40 }
 0x1b9   : > { %2650 = vmatpush.bf16.msra.mxu2 %v7287_v47  ;;  %v4396_v47 = vld [vmem:[%s8200_s3 + $0x120] sm:$0xf] }
 0x1ba   : > { %2370 = vmatpush.bf16.msrb.mxu1 %v7632_v56  ;;  %2663 = vmatpush.bf16.msra.mxu3 %v7294_v17  ;;  %v5089_v17 = vld [vmem:[%s8200_s3 + $0x124] sm:$0xf]  ;;  %v7666_v15 = vor.u32 %v5090_v41, %v4396_v47  ;;  %v4390_v47 = vld [vmem:[%s8200_s3 + $0x118] sm:$0xf0]  ;;  %v4380_v41 = vld [vmem:[%s8200_s3 + $0x100] sm:$0xf] }
 0x1bc   : > { %v7606_v50 = vpop.f32.mrf.mxu2  ;;  %2359 = vmatpush.bf16.msrb.mxu0 %v7666_v15 }
 0x1bd   : > { %v1875_v53 = vpop.f32.mrf.mxu0  ;;  %2651 = vmatpush.bf16.msra.mxu2 %v7307_v43  ;;  %v5088_v43 = vld [vmem:[%s8200_s3 + $0x114] sm:$0xf0] }
 0x1be   : > { %2664 = vmatpush.bf16.msra.mxu3 %v7312_v6 }
 0x1bf   : > { %v7611_v32 = vpop.f32.mrf.mxu3 }
 0x1c0   : > { %v1888_v31 = vpop.f32.mrf.mxu1 }
 0x1c1   : > { %v4406_v31 = vld [vmem:[%s8200_s3 + $0x138] sm:$0xf0]  ;;  %2652 = vmatpush.bf16.msra.mxu2 %v7342_v37  ;;  %v5085_v37 = vld [vmem:[%s8200_s3 + $0x104] sm:$0xf] }
 0x1c2   : > { %v7652_v54 = vor.u32 %v5091_v61, %v4406_v31  ;;  %v4398_v61 = vld [vmem:[%s8200_s3 + $0x128] sm:$0xf0]  ;;  %2665 = vmatpush.bf16.msra.mxu3 %v7354_v34  ;;  %v1874_v34 = vadd.f32 %v7556_v10, %v7323_v59 }
 0x1c3   : > { %v7672_v31 = vor.u32 %v5089_v17, %v4398_v61  ;;  %v5086_v17 = vld [vmem:[%s8200_s3 + $0x104] sm:$0xf0] }
 0x1c4   : > { %v1901_v2 = vpop.f32.mrf.mxu2  ;;  %2371 = vmatpush.bf16.msrb.mxu1 %v7652_v54 }
 0x1c5   : > { %v4388_v2 = vld [vmem:[%s8200_s3 + $0x110] sm:$0xf]  ;;  %2653 = vmatpush.bf16.msra.mxu2 %v7380_v4  ;;  %v1916_v4 = vadd.f32 %v7606_v50, %v1874_v34 }
 0x1c6   : > { %v7686_v6 = vor.u32 %v5088_v43, %v4388_v2  ;;  %v4382_v2 = vld [vmem:[%s8200_s3 + $0x108] sm:$0xf0]  ;;  %v7707_v43 = vor.u32 %v5086_v17, %v4380_v41  ;;  %2666 = vmatpush.bf16.msra.mxu3 %v7392_v14 }
 0x1c7   : > { %v1914_v53 = vpop.f32.mrf.mxu3  ;;  %v7710_v45 = vor.u32 %v5085_v37, %v4382_v2 }
 0x1c8   : > { %2372 = vmatpush.bf16.msrb.mxu1 %v7672_v31  ;;  %v5087_v53 = vld [vmem:[%s8200_s3 + $0x114] sm:$0xf]  ;;  %2360 = vmatpush.bf16.msrb.mxu0 %v7686_v6 }
 0x1c9   : > { %v7698_v61 = vor.u32 %v5087_v53, %v4390_v47  ;;  %2654 = vmatpush.bf16.msra.mxu2 %v7425_v63  ;;  %v1887_v47 = vadd.f32 %v7568_v44, %v7337_v48 }
 0x1ca   : > { %2667 = vmatpush.bf16.msra.mxu3 %v7434_v11 }
 0x1cb   : > { %v1917_v14 = vadd.f32 %v7611_v32, %v1887_v47  ;;  %v1996_v47 = vld [vmem:[#allocation2 + $0x4] sm:$0xf] }
 0x1cc   : > { %2373 = vmatpush.bf16.msrb.mxu1 %v7698_v61  ;;  %2361 = vmatpush.bf16.msrb.mxu0 %v7707_v43 }
 0x1cd   : > { %2655 = vmatpush.bf16.msra.mxu2 %v7461_v20 }
 0x1ce   : > { %2668 = vmatpush.bf16.msra.mxu3 %v7470_v46  ;;  %v5229_v46 = vld [vmem:[%s8199_s2] ss:$0 sm:$0xff] }
 0x1d0   : > { %2374 = vmatpush.bf16.msrb.mxu1 %v7710_v45 }
 0x1d1   : > { %2656 = vmatpush.bf16.msra.mxu2 %v7503_v7 }
 0x1d2   : > { %2669 = vmatpush.bf16.msra.mxu3 %v7506_v57 }
 0x1d5   : > { %v1927_v53 = vpop.f32.mrf.mxu0 }
 0x1d6   : > { %v1940_v41 = vpop.f32.mrf.mxu1  ;;  %v1944_v17 = vadd.f32 %v1927_v53, %v1916_v4  ;;  %v5131_v4 = vld [vmem:[%s8200_s3 + $0x274] sm:$0xf] }
 0x1d7   : > { %v1945_v63 = vadd.f32 %v1940_v41, %v1917_v14  ;;  %v4598_v14 = vld [vmem:[%s8200_s3 + $0x278] sm:$0xf0] }
 0x1dc   : > { %v1966_v37 = vpop.f32.mrf.mxu2 }
 0x1dd   : > { %v1983_v59 = vadd.f32 %v1966_v37, %v1944_v17  ;;  %v1979_v10 = vpop.f32.mrf.mxu3  ;;  %v1929_v11 = vpop.f32.mrf.mxu0  ;;  %v4588_v37 = vld [vmem:[%s8200_s3 + $0x260] sm:$0xf] }
 0x1de   : > { %v1984_v48 = vadd.f32 %v1979_v10, %v1945_v63  ;;  %v1942_v44 = vpop.f32.mrf.mxu1  ;;  %v7750_v63 = vor.u32 %v5131_v4, %v4598_v14  ;;  %v5129_v10 = vld [vmem:[%s8200_s3 + $0x264] sm:$0xf] }
 0x1df   : > { %v1985_v20 = vmax.f32 %v7285_v33, %v1983_v59  ;;  %v4596_v33 = vld [vmem:[%s8200_s3 + $0x270] sm:$0xf]  ;;  %v5130_v59 = vld [vmem:[%s8200_s3 + $0x264] sm:$0xf0]  ;;  %v2265_v44 = vpack.c.b16 %v2264_v27, %v2264_v27 }
 0x1e0   : > { %v1986_v50 = vmax.f32 %v7292_v36, %v1984_v48  ;;  %v5132_v36 = vld [vmem:[%s8200_s3 + $0x274] sm:$0xf0] }
 0x1e1   : > { %v7748_v17 = vor.u32 %v5132_v36, %v4596_v33  ;;  %v4572_v33 = vld [vmem:[%s8200_s3 + $0x240] sm:$0xf]  ;;  %v5126_v36 = vld [vmem:[%s8200_s3 + $0x244] sm:$0xf0] }
 0x1e2   : > { %v1987_v32 = vmax.f32 %v1985_v20, %v1986_v50  ;;  %v7771_v20 = vor.u32 %v5130_v59, %v4588_v37  ;;  %v7773_v50 = vor.u32 %v5129_v10, %v4590_v29  ;;  %v5125_v37 = vld [vmem:[%s8200_s3 + $0x244] sm:$0xf]  ;;  %v4574_v59 = vld [vmem:[%s8200_s3 + $0x248] sm:$0xf0] }
 0x1e4   : > { %v1992_v2 = vadd.f32 %v5229_v46, %v1987_v32  ;;  %v1968_v34 = vpop.f32.mrf.mxu2  ;;  %v4580_v46 = vld [vmem:[%s8200_s3 + $0x250] sm:$0xf]  ;;  %v5128_v32 = vld [vmem:[%s8200_s3 + $0x254] sm:$0xf0] }
 0x1e5   : > { %v1981_v53 = vpop.f32.mrf.mxu3  ;;  %v4582_v34 = vld [vmem:[%s8200_s3 + $0x258] sm:$0xf0] }
 0x1e6   : > { %v1993_v7 = vmax.f32 %v1992_v2, 0.0  ;;  %v5127_v2 = vld [vmem:[%s8200_s3 + $0x254] sm:$0xf] }
 0x1e8   : > { %v1994_v41 = vpack.c.bf16 %v1993_v7, %v1993_v7 }
 0x1ea   : > { %v1997_v57 = vsel %vm7107_vm2, %v1994_v41, %v1996_v47  ;;  %v2269_v47 = vshll.u32 %v2265_v44, 16  ;;  %v7789_v41 = vor.u32 %v5128_v32, %v4580_v46  ;;  %v7813_v46 = vor.u32 %v5126_v36, %v4572_v33 }
 0x1eb   : > { %1998 = vst [vmem:[#allocation2 + $0x4] sm:$0xf] %v1997_v57  ;;  %v7791_v57 = vor.u32 %v5127_v2, %v4582_v34  ;;  %v7815_v32 = vor.u32 %v5125_v37, %v4574_v59  ;;  %v4564_v2 = vld [vmem:[%s8200_s3 + $0x230] sm:$0xf]  ;;  %v5124_v34 = vld [vmem:[%s8200_s3 + $0x234] sm:$0xf0] }
 0x1ec   : > { %v7835_v33 = vor.u32 %v5124_v34, %v4564_v2  ;;  %v4548_v34 = vld [vmem:[%s8200_s3 + $0x210] sm:$0xf] }
 0x1f2   : > { %v7764_v11 = vld [vmem:[#allocation2 + $0x4] sm:$0x7] }
 0x1f3   : > { %2122 = vmatmul.bf16.vlgmr.msra.gmra.mxu0 %v7764_v11  ;;  %2135 = vmatmul.bf16.vlgmr.msra.gmra.mxu1 %v7764_v11  ;;  %v2400_v48 = vunpack.c.l.b16 %v7764_v11 }
 0x1f4   : > { %2621 = vmatpush.bf16.msra.mxu0 %v7748_v17  ;;  %2634 = vmatpush.bf16.msra.mxu1 %v7750_v63 }
 0x1f5   : > { %v2401_v53 = vpack.c.b16 %v2400_v48, %v2400_v48  ;;  %v2271_v48 = vrot.slane %v2269_v47, 1  ;;  %v2267_v47 = vshrl.u32 %v2265_v44, 16  ;;  %v4558_v44 = vld [vmem:[%s8200_s3 + $0x228] sm:$0xf0] }
 0x1f7   : > { %v2405_v7 = vshll.u32 %v2401_v53, 16  ;;  %v2403_v14 = vshrl.u32 %v2401_v53, 16  ;;  %v5123_v53 = vld [vmem:[%s8200_s3 + $0x234] sm:$0xf]  ;;  %v2272_v37 = vor.u32 %v2271_v48, %v2267_v47 }
 0x1f8   : > { %2622 = vmatpush.bf16.msra.mxu0 %v7771_v20  ;;  %2635 = vmatpush.bf16.msra.mxu1 %v7773_v50 }
 0x1f9   : > { %v2407_v27 = vrot.slane %v2405_v7, 1  ;;  %v4566_v7 = vld [vmem:[%s8200_s3 + $0x238] sm:$0xf0] }
 0x1fa   : > { %v7837_v36 = vor.u32 %v5123_v53, %v4566_v7  ;;  %v4550_v53 = vld [vmem:[%s8200_s3 + $0x218] sm:$0xf0]  ;;  %v2518_v7 = vld [vmem:[#allocation2] sm:$0xe] }
 0x1fb   : > { %v7809_v29 = vor.u32 %v2407_v27, %v2403_v14  ;;  %v4556_v14 = vld [vmem:[%s8200_s3 + $0x220] sm:$0xf] }
 0x1fc   : > { %v7799_v4 = vpop.f32.mrf.mxu2  ;;  %2623 = vmatpush.bf16.msra.mxu0 %v7789_v41  ;;  %2636 = vmatpush.bf16.msra.mxu1 %v7791_v57 }
 0x1fd   : > { %v7807_v10 = vpop.f32.mrf.mxu3  ;;  %2498 = vmatmul.bf16.vlgmr.msrb.gmra.mxu2 %v7809_v29  ;;  %2511 = vmatmul.bf16.vlgmr.msrb.gmra.mxu3 %v7809_v29 }
 0x1fe   : > { %2701 = vmatpush.bf16.msrb.mxu2 %v7508_v25  ;;  %2714 = vmatpush.bf16.msrb.mxu3 %v7511_v3  ;;  %v5122_v25 = vld [vmem:[%s8200_s3 + $0x224] sm:$0xf0]  ;;  %v5121_v3 = vld [vmem:[%s8200_s3 + $0x224] sm:$0xf] }
 0x1ff   : > { %v7855_v48 = vor.u32 %v5122_v25, %v4556_v14  ;;  %v7857_v2 = vor.u32 %v5121_v3, %v4558_v44  ;;  %v5118_v25 = vld [vmem:[%s8200_s3 + $0x204] sm:$0xf0]  ;;  %v2537_v3 = vunpack.c.l.b16 %v2518_v7  ;;  %v5137_v7 = vld [vmem:[%s8202_s5 + $0x20] sm:$0xff] }
 0x200   : > { %2624 = vmatpush.bf16.msra.mxu0 %v7813_v46  ;;  %2637 = vmatpush.bf16.msra.mxu1 %v7815_v32 }
 0x202   : > { %2702 = vmatpush.bf16.msrb.mxu2 %v7545_v49  ;;  %2715 = vmatpush.bf16.msrb.mxu3 %v7558_v58  ;;  %v5120_v49 = vld [vmem:[%s8200_s3 + $0x214] sm:$0xf0]  ;;  %v5119_v58 = vld [vmem:[%s8200_s3 + $0x214] sm:$0xf] }
 0x203   : > { %2362 = vmatmul.bf16.vlgmr.msrb.gmra.mxu0 %v2272_v37  ;;  %2375 = vmatmul.bf16.vlgmr.msrb.gmra.mxu1 %v2272_v37  ;;  %v7875_v47 = vor.u32 %v5120_v49, %v4548_v34  ;;  %v7877_v14 = vor.u32 %v5119_v58, %v4550_v53  ;;  %v2538_v34 = vpack.c.b16 %v2537_v3, %v2537_v3  ;;  %v5155_v49 = vld [vmem:[%s8202_s5 + $0xb0] sm:$0xff]  ;;  %v5162_v3 = vld [vmem:[%s8202_s5 + $0xe8] sm:$0xff] }
 0x204   : > { %v2231_v27 = vpop.f32.mrf.mxu2  ;;  %2625 = vmatpush.bf16.msra.mxu0 %v7835_v33  ;;  %2638 = vmatpush.bf16.msra.mxu1 %v7837_v36 }
 0x205   : > { %v2244_v59 = vpop.f32.mrf.mxu3  ;;  %v4540_v27 = vld [vmem:[%s8200_s3 + $0x200] sm:$0xf] }
 0x206   : > { %2703 = vmatpush.bf16.msrb.mxu2 %v7585_v21  ;;  %2716 = vmatpush.bf16.msrb.mxu3 %v7596_v18  ;;  %v5117_v18 = vld [vmem:[%s8200_s3 + $0x204] sm:$0xf]  ;;  %v4542_v21 = vld [vmem:[%s8200_s3 + $0x208] sm:$0xf0]  ;;  %v4541_v44 = vor.u32 %v5118_v25, %v4540_v27 }
 0x207   : > { %v4545_v59 = vor.u32 %v5117_v18, %v4542_v21  ;;  %v5154_v27 = vld [vmem:[%s8202_s5 + $0xa8] sm:$0xff]  ;;  %v5136_v21 = vld [vmem:[%s8202_s5 + $0x18] sm:$0xff] }
 0x208   : > { %2626 = vmatpush.bf16.msra.mxu0 %v7855_v48  ;;  %2639 = vmatpush.bf16.msra.mxu1 %v7857_v2 }
 0x20a   : > { %2704 = vmatpush.bf16.msrb.mxu2 %v7626_v9  ;;  %2717 = vmatpush.bf16.msrb.mxu3 %v7632_v56  ;;  %v7899_v56 = vrot.slane %v2538_v34, 1 }
 0x20c   : > { %2627 = vmatpush.bf16.msra.mxu0 %v7875_v47  ;;  %2640 = vmatpush.bf16.msra.mxu1 %v7877_v14 }
 0x20d   : > { %2657 = vmatmul.bf16.vlgmr.msra.gmra.mxu2 %v2272_v37  ;;  %2670 = vmatmul.bf16.vlgmr.msra.gmra.mxu3 %v2272_v37  ;;  %v5138_v37 = vld [vmem:[%s8202_s5 + $0x28] sm:$0xff] }
 0x20e   : > { %2705 = vmatpush.bf16.msrb.mxu2 %v7646_v40  ;;  %2718 = vmatpush.bf16.msrb.mxu3 %v7652_v54 }
 0x210   : > { %2628 = vmatpush.bf16.msra.mxu0 %v4541_v44  ;;  %2641 = vmatpush.bf16.msra.mxu1 %v4545_v59 }
 0x212   : > { %2706 = vmatpush.bf16.msrb.mxu2 %v7666_v15  ;;  %2719 = vmatpush.bf16.msrb.mxu3 %v7672_v31 }
 0x213   : > { %2629 = vmatmul.bf16.vlgmr.msra.gmra.mxu0 %v7899_v56  ;;  %2642 = vmatmul.bf16.vlgmr.msra.gmra.mxu1 %v7899_v56 }
 0x214   : > { %2675 = vmatpush.bf16.msrb.mxu0 %v7114_v60  ;;  %2688 = vmatpush.bf16.msrb.mxu1 %v7116_v13  ;;  %v2757_v60 = vld [vmem:[#allocation2 + $0x4] sm:$0xe] }
 0x215   : > { %v2759_v13 = vunpack.c.l.b16 %v2757_v60  ;;  %v5135_v60 = vld [vmem:[%s8202_s5 + $0x10] sm:$0xff] }
 0x216   : > { %2707 = vmatpush.bf16.msrb.mxu2 %v7686_v6  ;;  %2720 = vmatpush.bf16.msrb.mxu3 %v7698_v61 }
 0x218   : > { %2676 = vmatpush.bf16.msrb.mxu0 %v7137_v51  ;;  %2689 = vmatpush.bf16.msrb.mxu1 %v7141_v42  ;;  %v2760_v51 = vpack.c.b16 %v2759_v13, %v2759_v13  ;;  %v5161_v13 = vld [vmem:[%s8202_s5 + $0xe0] sm:$0xff] }
 0x21a   : > { %2708 = vmatpush.bf16.msrb.mxu2 %v7707_v43  ;;  %2721 = vmatpush.bf16.msrb.mxu3 %v7710_v45  ;;  %v2761_v42 = vrot.slane %v2760_v51, 1  ;;  %v5148_v43 = vld [vmem:[%s8202_s5 + $0x78] sm:$0xff]  ;;  %v5141_v51 = vld [vmem:[%s8202_s5 + $0x40] sm:$0xff] }
 0x21c   : > { %2677 = vmatpush.bf16.msrb.mxu0 %v7157_v8  ;;  %2690 = vmatpush.bf16.msrb.mxu1 %v7160_v22  ;;  %v8358_v8 = vld [vmem:[#allocation23_spill] sm:$0xff]  ;;  %v8359_v22 = vld [vmem:[#allocation24_spill] sm:$0xff] }
 0x21d   : > { %2709 = vmatmul.bf16.vlgmr.msrb.gmra.mxu2 %v7809_v29  ;;  %2722 = vmatmul.bf16.vlgmr.msrb.gmra.mxu3 %v7809_v29 }
 0x21e   : > { %2763 = vmatpush.bf16.msra.mxu2 %v7748_v17  ;;  %2776 = vmatpush.bf16.msra.mxu3 %v7750_v63 }
 0x220   : > { %2678 = vmatpush.bf16.msrb.mxu0 %v7175_v55  ;;  %2691 = vmatpush.bf16.msrb.mxu1 %v7178_v19  ;;  %v8360_v55 = vld [vmem:[#allocation8_spill] sm:$0xff]  ;;  %v8361_v19 = vld [vmem:[#allocation9_spill] sm:$0xff] }
 0x222   : > { %2764 = vmatpush.bf16.msra.mxu2 %v7771_v20  ;;  %2777 = vmatpush.bf16.msra.mxu3 %v7773_v50  ;;  %v5147_v50 = vld [vmem:[%s8202_s5 + $0x70] sm:$0xff] }
 0x224   : > { %2679 = vmatpush.bf16.msrb.mxu0 %v7193_v1  ;;  %2692 = vmatpush.bf16.msrb.mxu1 %v7196_v28  ;;  %v8362_v1 = vld [vmem:[#allocation27_spill] sm:$0xff]  ;;  %v8363_v28 = vld [vmem:[#allocation28_spill] sm:$0xff] }
 0x226   : > { %2765 = vmatpush.bf16.msra.mxu2 %v7789_v41  ;;  %2778 = vmatpush.bf16.msra.mxu3 %v7791_v57  ;;  %v5140_v41 = vld [vmem:[%s8202_s5 + $0x38] sm:$0xff]  ;;  %v5146_v57 = vld [vmem:[%s8202_s5 + $0x68] sm:$0xff] }
 0x228   : > { %2680 = vmatpush.bf16.msrb.mxu0 %v7211_v23  ;;  %2693 = vmatpush.bf16.msrb.mxu1 %v7214_v0  ;;  %v8364_v23 = vld [vmem:[#allocation10_spill] sm:$0xff]  ;;  %v8365_v0 = vld [vmem:[#allocation11_spill] sm:$0xff] }
 0x22a   : > { %2766 = vmatpush.bf16.msra.mxu2 %v7813_v46  ;;  %2779 = vmatpush.bf16.msra.mxu3 %v7815_v32  ;;  %v5139_v32 = vld [vmem:[%s8202_s5 + $0x30] sm:$0xff] }
 0x22c   : > { %2681 = vmatpush.bf16.msrb.mxu0 %v7229_v52  ;;  %2694 = vmatpush.bf16.msrb.mxu1 %v7232_v24  ;;  %v8366_v52 = vld [vmem:[#allocation31_spill] sm:$0xff] }
 0x22e   : > { %2767 = vmatpush.bf16.msra.mxu2 %v7835_v33  ;;  %2780 = vmatpush.bf16.msra.mxu3 %v7837_v36  ;;  %v5145_v33 = vld [vmem:[%s8202_s5 + $0x60] sm:$0xff]  ;;  %v5156_v36 = vld [vmem:[%s8202_s5 + $0xb8] sm:$0xff] }
 0x230   : > { %2682 = vmatpush.bf16.msrb.mxu0 %v7247_v26  ;;  %2695 = vmatpush.bf16.msrb.mxu1 %v7250_v12 }
 0x232   : > { %2768 = vmatpush.bf16.msra.mxu2 %v7855_v48  ;;  %2781 = vmatpush.bf16.msra.mxu3 %v7857_v2  ;;  %v5164_v48 = vld [vmem:[%s8202_s5 + $0xf8] sm:$0xff] }
 0x233   : > { %2683 = vmatmul.bf16.vlgmr.msrb.gmra.mxu0 %v7764_v11  ;;  %2696 = vmatmul.bf16.vlgmr.msrb.gmra.mxu1 %v7764_v11  ;;  %v5144_v2 = vld [vmem:[%s8202_s5 + $0x58] sm:$0xff] }
 0x234   : > { %2729 = vmatpush.bf16.msra.mxu0 %v7326_v62  ;;  %2742 = vmatpush.bf16.msra.mxu1 %v7340_v35 }
 0x236   : > { %2769 = vmatpush.bf16.msra.mxu2 %v7875_v47  ;;  %2782 = vmatpush.bf16.msra.mxu3 %v7877_v14  ;;  %v5163_v47 = vld [vmem:[%s8202_s5 + $0xf0] sm:$0xff] }
 0x237   : > { %v5143_v14 = vld [vmem:[%s8202_s5 + $0x50] sm:$0xff] }
 0x238   : > { %2730 = vmatpush.bf16.msra.mxu0 %v7366_v30  ;;  %2743 = vmatpush.bf16.msra.mxu1 %v7368_v16 }
 0x23a   : > { %2770 = vmatpush.bf16.msra.mxu2 %v4541_v44  ;;  %2783 = vmatpush.bf16.msra.mxu3 %v4545_v59  ;;  %v5142_v44 = vld [vmem:[%s8202_s5 + $0x48] sm:$0xff]  ;;  %v5153_v59 = vld [vmem:[%s8202_s5 + $0xa0] sm:$0xff] }
 0x23c   : > { %2731 = vmatpush.bf16.msra.mxu0 %v7401_v39  ;;  %2744 = vmatpush.bf16.msra.mxu1 %v7413_v38 }
 0x23d   : > { %2771 = vmatmul.bf16.vlgmr.msra.gmra.mxu2 %v2761_v42  ;;  %2784 = vmatmul.bf16.vlgmr.msra.gmra.mxu3 %v2761_v42  ;;  %v5152_v42 = vld [vmem:[%s8202_s5 + $0x98] sm:$0xff] }
 0x23e   : > { %3030 = vmatpush.bf16.msrb.mxu2 %v5156_v36  ;;  %3111 = vmatpush.bf16.msrb.mxu3 %v5164_v48  ;;  %v5230_v36 = vld [vmem:[%s8201_s4] ss:$0 sm:$0xff] }
 0x240   : > { %2732 = vmatpush.bf16.msra.mxu0 %v7443_v5  ;;  %2745 = vmatpush.bf16.msra.mxu1 %v8358_v8  ;;  %v5172_v8 = vld [vmem:[%s8202_s5 + $0x138] sm:$0xff] }
 0x242   : > { %3031 = vmatpush.bf16.msrb.mxu2 %v5155_v49  ;;  %3112 = vmatpush.bf16.msrb.mxu3 %v5163_v47 }
 0x244   : > { %2733 = vmatpush.bf16.msra.mxu0 %v8359_v22  ;;  %2746 = vmatpush.bf16.msra.mxu1 %v8360_v55  ;;  %v5134_v22 = vld [vmem:[%s8202_s5 + $0x8] sm:$0xff]  ;;  %v5160_v55 = vld [vmem:[%s8202_s5 + $0xd8] sm:$0xff] }
 0x246   : > { %3032 = vmatpush.bf16.msrb.mxu2 %v5154_v27  ;;  %3113 = vmatpush.bf16.msrb.mxu3 %v5162_v3  ;;  %v5179_v27 = vld [vmem:[%s8204_s7 + $0x30] sm:$0xff] }
 0x247   : > { %v5175_v3 = vld [vmem:[%s8204_s7 + $0x10] sm:$0xff] }
 0x248   : > { %2734 = vmatpush.bf16.msra.mxu0 %v8361_v19  ;;  %2747 = vmatpush.bf16.msra.mxu1 %v8362_v1  ;;  %v5151_v19 = vld [vmem:[%s8202_s5 + $0x90] sm:$0xff] }
 0x249   : > { %v5171_v1 = vld [vmem:[%s8202_s5 + $0x130] sm:$0xff] }
 0x24a   : > { %3033 = vmatpush.bf16.msrb.mxu2 %v5153_v59  ;;  %3114 = vmatpush.bf16.msrb.mxu3 %v5161_v13  ;;  %v5173_v59 = vld [vmem:[%s8204_s7] sm:$0xff]  ;;  %v5186_v13 = vld [vmem:[%s8206_s9 + $0x28] sm:$0xff] }
 0x24c   : > { %2735 = vmatpush.bf16.msra.mxu0 %v8363_v28  ;;  %2748 = vmatpush.bf16.msra.mxu1 %v8364_v23 }
 0x24e   : > { %3034 = vmatpush.bf16.msrb.mxu2 %v5152_v42  ;;  %3115 = vmatpush.bf16.msrb.mxu3 %v5160_v55  ;;  %v5184_v55 = vld [vmem:[%s8206_s9 + $0x18] sm:$0xff] }
 0x250   : > { %2736 = vmatpush.bf16.msra.mxu0 %v8365_v0  ;;  %2749 = vmatpush.bf16.msra.mxu1 %v8366_v52  ;;  %v5133_v0 = vld [vmem:[%s8202_s5] sm:$0xff]  ;;  %v5159_v52 = vld [vmem:[%s8202_s5 + $0xd0] sm:$0xff] }
 0x252   : > { %3035 = vmatpush.bf16.msrb.mxu2 %v5151_v19  ;;  %3116 = vmatpush.bf16.msrb.mxu3 %v5159_v52 }
 0x253   : > { %2737 = vmatmul.bf16.vlgmr.msra.gmra.mxu0 %v7899_v56  ;;  %2750 = vmatmul.bf16.vlgmr.msra.gmra.mxu1 %v7899_v56 }
 0x254   : > { %2889 = vmatpush.bf16.msrb.mxu0 %v5148_v43  ;;  %2950 = vmatpush.bf16.msrb.mxu1 %v5140_v41 }
 0x258   : > { %2890 = vmatpush.bf16.msrb.mxu0 %v5147_v50  ;;  %2951 = vmatpush.bf16.msrb.mxu1 %v5139_v32  ;;  %v5165_v50 = vld [vmem:[%s8202_s5 + $0x100] sm:$0xff] }
 0x25c   : > { %2891 = vmatpush.bf16.msrb.mxu0 %v5146_v57  ;;  %2952 = vmatpush.bf16.msrb.mxu1 %v5138_v37 }
 0x260   : > { %2892 = vmatpush.bf16.msrb.mxu0 %v5145_v33  ;;  %2953 = vmatpush.bf16.msrb.mxu1 %v5137_v7 }
 0x264   : > { %2893 = vmatpush.bf16.msrb.mxu0 %v5144_v2  ;;  %2954 = vmatpush.bf16.msrb.mxu1 %v5136_v21  ;;  %v5176_v21 = vld [vmem:[%s8204_s7 + $0x18] sm:$0xff] }
 0x268   : > { %2894 = vmatpush.bf16.msrb.mxu0 %v5143_v14  ;;  %2955 = vmatpush.bf16.msrb.mxu1 %v5135_v60  ;;  %v5180_v14 = vld [vmem:[%s8204_s7 + $0x38] sm:$0xff]  ;;  %v5187_v60 = vld [vmem:[%s8206_s9 + $0x30] sm:$0xff] }
 0x26c   : > { %2895 = vmatpush.bf16.msrb.mxu0 %v5142_v44  ;;  %2956 = vmatpush.bf16.msrb.mxu1 %v5134_v22  ;;  %v5174_v44 = vld [vmem:[%s8204_s7 + $0x8] sm:$0xff] }
 0x270   : > { %v2123_v24 = vpop.f32.mrf.mxu0  ;;  %v2136_v26 = vpop.f32.mrf.mxu1  ;;  %2896 = vmatpush.bf16.msrb.mxu0 %v5141_v51  ;;  %2957 = vmatpush.bf16.msrb.mxu1 %v5133_v0  ;;  %v5183_v0 = vld [vmem:[%s8206_s9 + $0x10] sm:$0xff] }
 0x271   : > { %v2230_v35 = vadd.f32 %v7799_v4, %v2123_v24  ;;  %v2243_v30 = vadd.f32 %v7807_v10, %v2136_v26  ;;  %v5150_v24 = vld [vmem:[%s8202_s5 + $0x88] sm:$0xff] }
 0x272   : > { %v5170_v26 = vld [vmem:[%s8202_s5 + $0x128] sm:$0xff]  ;;  %3036 = vmatpush.bf16.msrb.mxu2 %v5150_v24 }
 0x274   : > { %3192 = vmatpush.bf16.msra.mxu0 %v5172_v8  ;;  %3275 = vmatpush.bf16.msra.mxu1 %v5180_v14  ;;  %v5185_v8 = vld [vmem:[%s8206_s9 + $0x20] sm:$0xff] }
 0x278   : > { %v2125_v12 = vpop.f32.mrf.mxu0  ;;  %v2138_v62 = vpop.f32.mrf.mxu1  ;;  %3193 = vmatpush.bf16.msra.mxu0 %v5171_v1  ;;  %3276 = vmatpush.bf16.msra.mxu1 %v5179_v27 }
 0x279   : > { %v5158_v12 = vld [vmem:[%s8202_s5 + $0xc8] sm:$0xff]  ;;  %v5149_v62 = vld [vmem:[%s8202_s5 + $0x80] sm:$0xff] }
 0x27a   : > { %3117 = vmatpush.bf16.msrb.mxu3 %v5158_v12  ;;  %3037 = vmatpush.bf16.msrb.mxu2 %v5149_v62  ;;  %v3206_v62 = vld [vmem:[%s8203_s6] sm:$0x1] }
 0x27c   : > { %3194 = vmatpush.bf16.msra.mxu0 %v5170_v26 }
 0x280   : > { %v2363_v16 = vpop.f32.mrf.mxu0  ;;  %v2376_v39 = vpop.f32.mrf.mxu1 }
 0x281   : > { %v2380_v38 = vadd.f32 %v2363_v16, %v2230_v35  ;;  %v2381_v5 = vadd.f32 %v2376_v39, %v2243_v30  ;;  %v2499_v45 = vpop.f32.mrf.mxu2  ;;  %v2512_v9 = vpop.f32.mrf.mxu3  ;;  %v5169_v35 = vld [vmem:[%s8202_s5 + $0x120] sm:$0xff] }
 0x282   : > { %v5157_v30 = vld [vmem:[%s8202_s5 + $0xc0] sm:$0xff]  ;;  %3195 = vmatpush.bf16.msra.mxu0 %v5169_v35 }
 0x283   : > { %v7961_v40 = vadd.f32 %v2499_v45, %v2380_v38  ;;  %v7963_v54 = vadd.f32 %v2512_v9, %v2381_v5  ;;  %3118 = vmatpush.bf16.msrb.mxu3 %v5157_v30  ;;  %v5168_v38 = vld [vmem:[%s8202_s5 + $0x118] sm:$0xff]  ;;  %v5167_v5 = vld [vmem:[%s8202_s5 + $0x110] sm:$0xff] }
 0x286   : > { %3196 = vmatpush.bf16.msra.mxu0 %v5168_v38 }
 0x288   : > { %v2365_v15 = vpop.f32.mrf.mxu0  ;;  %v2378_v31 = vpop.f32.mrf.mxu1 }
 0x289   : > { %v2501_v6 = vpop.f32.mrf.mxu2  ;;  %v2514_v61 = vpop.f32.mrf.mxu3  ;;  %v5166_v15 = vld [vmem:[%s8202_s5 + $0x108] sm:$0xff] }
 0x28a   : > { %3197 = vmatpush.bf16.msra.mxu0 %v5167_v5  ;;  %v5182_v5 = vld [vmem:[%s8206_s9 + $0x8] sm:$0xff] }
 0x28e   : > { %3198 = vmatpush.bf16.msra.mxu0 %v5166_v15 }
 0x290   : > { %v7968_v17 = vpop.f32.mrf.mxu0  ;;  %v7970_v63 = vpop.f32.mrf.mxu1 }
 0x291   : > { %v7972_v11 = vpop.f32.mrf.mxu2  ;;  %v7974_v20 = vpop.f32.mrf.mxu3 }
 0x292   : > { %3199 = vmatpush.bf16.msra.mxu0 %v5165_v50  ;;  %v3306_v50 = vld [vmem:[%s8207_s10] sm:$0x1] }
 0x298   : > { %v2632_v4 = vpop.f32.mrf.mxu0  ;;  %v2645_v10 = vpop.f32.mrf.mxu1 }
 0x299   : > { %v2660_v29 = vpop.f32.mrf.mxu2  ;;  %v2673_v46 = vpop.f32.mrf.mxu3  ;;  %v2647_v4 = vadd.f32 %v7968_v17, %v7961_v40  ;;  %v2648_v10 = vadd.f32 %v7970_v63, %v7963_v54 }
 0x2a1   : > { %v8006_v58 = vpop.f32.mrf.mxu2  ;;  %v8008_v53 = vpop.f32.mrf.mxu3 }
 0x2a9   : > { %v2712_v25 = vpop.f32.mrf.mxu2  ;;  %v2725_v18 = vpop.f32.mrf.mxu3 }
 0x2aa   : > { %v5178_v25 = vld [vmem:[%s8204_s7 + $0x28] sm:$0xff]  ;;  %v5177_v18 = vld [vmem:[%s8204_s7 + $0x20] sm:$0xff] }
 0x2ab   : > { %3277 = vmatpush.bf16.msra.mxu1 %v5178_v25 }
 0x2af   : > { %3278 = vmatpush.bf16.msra.mxu1 %v5177_v18 }
 0x2b0   : > { %v2684_v34 = vpop.f32.mrf.mxu0  ;;  %v2697_v56 = vpop.f32.mrf.mxu1 }
 0x2b1   : > { %v2685_v45 = vadd.f32 %v2684_v34, %v7972_v11  ;;  %v2698_v9 = vadd.f32 %v2697_v56, %v7974_v20  ;;  %v5188_v34 = vld [vmem:[%s8206_s9 + $0x38] sm:$0xff] }
 0x2b2   : > { %3355 = vmatpush.bf16.msra.mxu2 %v5188_v34 }
 0x2b3   : > { %v2727_v61 = vadd.f32 %v8006_v58, %v2685_v45  ;;  %v2728_v43 = vadd.f32 %v8008_v53, %v2698_v9  ;;  %3279 = vmatpush.bf16.msra.mxu1 %v5176_v21  ;;  %v5181_v45 = vld [vmem:[%s8206_s9] sm:$0xff] }
 0x2b4   : > { %v3226_v9 = vld [vmem:[%s8205_s8] sm:$0x1] }
 0x2b6   : > { %3356 = vmatpush.bf16.msra.mxu2 %v5187_v60 }
 0x2b7   : > { %3280 = vmatpush.bf16.msra.mxu1 %v5175_v3 }
 0x2b8   : > { %v2686_v28 = vpop.f32.mrf.mxu0  ;;  %v2699_v23 = vpop.f32.mrf.mxu1 }
 0x2ba   : > { %3357 = vmatpush.bf16.msra.mxu2 %v5186_v13 }
 0x2bb   : > { %3281 = vmatpush.bf16.msra.mxu1 %v5174_v44 }
 0x2be   : > { %3358 = vmatpush.bf16.msra.mxu2 %v5185_v8 }
 0x2bf   : > { %3282 = vmatpush.bf16.msra.mxu1 %v5173_v59 }
 0x2c0   : > { %v2772_v16 = vpop.f32.mrf.mxu2  ;;  %v2785_v39 = vpop.f32.mrf.mxu3 }
 0x2c2   : > { %3359 = vmatpush.bf16.msra.mxu2 %v5184_v55 }
 0x2c6   : > { %3360 = vmatpush.bf16.msra.mxu2 %v5183_v0 }
 0x2c8   : > { %v2774_v31 = vpop.f32.mrf.mxu2  ;;  %v2787_v6 = vpop.f32.mrf.mxu3 }
 0x2ca   : > { %3361 = vmatpush.bf16.msra.mxu2 %v5182_v5 }
 0x2ce   : > { %3362 = vmatpush.bf16.msra.mxu2 %v5181_v45 }
 0x2d0   : > { %v2738_v41 = vpop.f32.mrf.mxu0  ;;  %v2751_v11 = vpop.f32.mrf.mxu1 }
 0x2d1   : > { %v2755_v57 = vadd.f32 %v2738_v41, %v2727_v61  ;;  %v2756_v20 = vadd.f32 %v2751_v11, %v2728_v43 }
 0x2d3   : > { %v2789_v29 = vadd.f32 %v2772_v16, %v2755_v57  ;;  %v2790_v46 = vadd.f32 %v2785_v39, %v2756_v20 }
 0x2d5   : > { %v2791_v32 = vmax.f32 %v2647_v4, %v2789_v29  ;;  %v2792_v33 = vmax.f32 %v2648_v10, %v2790_v46 }
 0x2d7   : > { %v2793_v37 = vmax.f32 %v2791_v32, %v2792_v33 }
 0x2d8   : > { %v2740_v48 = vpop.f32.mrf.mxu0  ;;  %v2753_v2 = vpop.f32.mrf.mxu1 }
 0x2d9   : > { %v2798_v49 = vadd.f32 %v5230_v36, %v2793_v37 }
 0x2db   : > { %v2799_v58 = vmax.f32 %v2798_v49, 0.0 }
 0x2dd   : > { %v2800_v53 = vpack.c.bf16 %v2799_v58, %v2799_v58 }
 0x2df   : > { %v2835_v7 = vunpack.c.l.b16 %v2800_v53  ;;  %2958 = vmatmul.bf16.vlgmr.msrb.gmra.mxu1 %v2800_v53 }
 0x2e1   : > { %v2836_v40 = vpack.c.b16 %v2835_v7, %v2835_v7 }
 0x2e3   : > { %v2838_v17 = vshrl.u32 %v2836_v40, 16  ;;  %v2980_v54 = vrot.slane %v2836_v40, 1  ;;  %v3142_v47 = vrot.slane %v2836_v40, 2 }
 0x2e5   : > { %2897 = vmatmul.bf16.vlgmr.msrb.gmra.mxu0 %v2838_v17  ;;  %3038 = vmatmul.bf16.vlgmr.msrb.gmra.mxu2 %v2980_v54  ;;  %v3061_v63 = vrot.slane %v2838_v17, 1 }
 0x2e7   : > { %3119 = vmatmul.bf16.vlgmr.msrb.gmra.mxu3 %v3061_v63 }
 0x2f5   : > { %3200 = vmatmul.bf16.vlgmr.msra.gmra.mxu0 %v3142_v47 }
 0x35c   : > { %v2959_v56 = vpop.f32.mrf.mxu1 }
 0x362   : > { %v2898_v51 = vpop.f32.mrf.mxu0 }
 0x363   : > { %v2960_v28 = vadd.f32 %v2959_v56, %v2898_v51 }
 0x364   : > { %v2961_v42 = vpop.f32.mrf.mxu1 }
 0x368   : > { %v3039_v22 = vpop.f32.mrf.mxu2 }
 0x369   : > { %v3043_v23 = vadd.f32 %v3039_v22, %v2960_v28 }
 0x36a   : > { %v2900_v19 = vpop.f32.mrf.mxu0  ;;  %v3120_v1 = vpop.f32.mrf.mxu3 }
 0x36b   : > { %v3124_v24 = vadd.f32 %v3120_v1, %v3043_v23 }
 0x370   : > { %v3041_v52 = vpop.f32.mrf.mxu2 }
 0x372   : > { %v3122_v26 = vpop.f32.mrf.mxu3  ;;  %v3201_v12 = vpop.f32.mrf.mxu0 }
 0x373   : > { %v3205_v35 = vadd.f32 %v3201_v12, %v3124_v24 }
 0x375   : > { %v3207_v30 = vadd.f32 %v3206_v62, %v3205_v35 }
 0x377   : > { %v3208_v16 = vmax.f32 %v3207_v30, 0.0 }
 0x379   : > { %v3209_v39 = vpack.c.bf16 %v3208_v16, %v3208_v16 }
 0x37a   : > { %v3203_v38 = vpop.f32.mrf.mxu0 }
 0x37b   : > { %3283 = vmatmul.bf16.vlgmr.msra.gmra.mxu1 %v3209_v39 }
 0x3f8   : > { %v3284_v15 = vpop.f32.mrf.mxu1 }
 0x3f9   : > { %v3285_v31 = vadd.f32 %v3284_v15, %v3226_v9 }
 0x3fb   : > { %v3288_v6 = vmax.f32 %v3285_v31, 0.0 }
 0x3fd   : > { %v3289_v61 = vpack.c.bf16 %v3288_v6, %v3288_v6 }
 0x3ff   : > { %3363 = vmatmul.bf16.vlgmr.msra.gmra.mxu2 %v3289_v61 }
 0x400   : > { %v3286_v43 = vpop.f32.mrf.mxu1 }
 0x482   : > { %v3364_v41 = vpop.f32.mrf.mxu2 }
 0x483   : > { %v3365_v11 = vadd.f32 %v3364_v41, %v3306_v50 }
 0x485   : > { %3369 = vst.msk [vmem:[%s378_s26] sm:$0x1] %vm3368_vm3, %v3365_v11 }
 0x486   : > { %5258 = shalt.err (!%p5255_p3)
}
 0x487   : > { %5189 = dma.vmem_to_hbm [thread:$0]  (%p5393_p5), %s3382_s25, 16, %s3384_s29, %s3371_s30  }
 0x48a   : > { %v3366_v57 = vpop.f32.mrf.mxu2 }
 0x48b PF: > { %p5195_p4 = scmp.ge.s32.totalorder %s5293_s20, 2  ;;  %s3395_s24 = sand.u32 1, %s5281_s17  }
 0x48c   : > { %s3396_s22 = scalar_lea.sflag [#allocation4], %s3395_s24 }
 0x48d   : > { %p5192_p7 = pnand %p5195_p4, %p5397_p6 }
 0x48f   : > { %p5193_p8 = pneg %p5192_p7 }
 0x491   : > { %5276 = dma.done.wait (%p5193_p8), %s3396_s22, 16  }
 0x492   : > { %5278 = vsyncadd (%p5193_p8), %s3396_s22, 4294967280  ;;  %s8367_s19 = sld [smem:[#allocation6_spill]]  ;;  %p21_p9 = scmp.ge.s32.totalorder %s5380_s23, 4  }
 0x493   : > { %s8368_s26 = sld [smem:[#allocation7_spill]]  ;;  %s8369_s17 = smov %s5285_s18 }
 0x494   : > { %s8372_s20 = smov %s5380_s23 }
 0x495   :  { %23 = sbr.rel (!%p21_p9) target bundleno = 5 (0x5), region = 115 }
 0x498   : > { %s8370_s18 = smov %s8367_s19 }
 0x499   : > { %s8371_s19 = smov %s8368_s26 }
 0x49a   :  { %3401 = vsyncpa [#allocation4], 1 }
 0x49b   :  { %3403 = vsyncpa [#allocation4 + $0x1], 1 }

</bundles_post_ra>
